<compile_context>
chip_gen: v5e
topology: v5e:2x2
jax: 0.10.0
libtpu: 0.0.40
codegen_flags: <defaults>
</compile_context>

<pallas_src>
import functools

import jax
import jax.numpy as jnp
from jax.experimental import pallas as pl
from jax.experimental.pallas import tpu as pltpu

GAMMA = 2.0  # FocalLoss default


def _focal_loss_kernel(logits_ref, tgt_ref, partial_ref, *, gamma, total_n, tile_n):
    i = pl.program_id(0)

    x = logits_ref[...].astype(jnp.float32)                   # (tn, C)
    tgt = tgt_ref[...]                                         # (tn, 1) int32

    # log-sum-exp per row: the only full-width transcendental pass.
    m = jnp.max(x, axis=-1, keepdims=True)                     # (tn, 1)
    sumexp = jnp.sum(jnp.exp(x - m), axis=-1, keepdims=True)   # (tn, 1)
    lse = jnp.log(sumexp)                                      # (tn, 1)

    # Gather the target logit x[n, t_n] via a one-hot select (VPU select + XLU sum,
    # no dynamic gather needed).
    col = jax.lax.broadcasted_iota(jnp.int32, x.shape, 1)
    x_t = jnp.sum(jnp.where(col == tgt, x, 0.0), axis=-1, keepdims=True)  # (tn, 1)

    # Focal term on the gathered (tn, 1) column only.
    log_p_t = x_t - m - lse                                    # (tn, 1)
    p_t = jnp.exp(log_p_t)
    one_m = 1.0 - p_t
    if gamma == 2.0:
        focal_w = one_m * one_m            # VPU multiply; avoids pow -> log+exp on EUP
    else:
        focal_w = one_m ** gamma
    contrib = -(focal_w * log_p_t)                             # (tn, 1) per-row loss

    # Mask rows past the true N (ragged last tile reads undefined padding rows).
    row = jax.lax.broadcasted_iota(jnp.int32, contrib.shape, 0) + i * tile_n
    contrib = jnp.where(row < total_n, contrib, 0.0)

    # Per-block partial sum; mean over N is finished outside the kernel.
    # TODO(synk): per-class `weight` and nll_loss ignore_index not implemented
    # (module defaults: weight=None, no ignore_index).
    partial_ref[...] = jnp.sum(contrib, keepdims=True)         # (1, 1)


def focal_loss(logits, targets, *, gamma=GAMMA, block_bytes=2 << 20):
    """logits: (N, C) float (f32 or bf16), targets: (N,) int. Scalar mean focal loss."""
    n, c = logits.shape
    # Pick the biggest row tile whose f32 footprint is ~block_bytes; with
    # double-buffering this stays well under every generation's scoped VMEM
    # budget (incl. v7x's 64 MiB physical / 32 MiB default).
    max_rows = max(8, block_bytes // (c * 4))
    if max_rows >= n:
        tile_n = n
    else:
        tile_n = max(8, (max_rows // 8) * 8)
    num_blocks = pl.cdiv(n, tile_n)

    tgt2d = targets.astype(jnp.int32).reshape(n, 1)
    kernel = functools.partial(
        _focal_loss_kernel, gamma=float(gamma), total_n=n, tile_n=tile_n)

    partials = pl.pallas_call(
        kernel,
        out_shape=jax.ShapeDtypeStruct((num_blocks, 1), jnp.float32),
        grid_spec=pltpu.PrefetchScalarGridSpec(
            num_scalar_prefetch=0,
            grid=(num_blocks,),
            in_specs=[
                pl.BlockSpec((tile_n, c), lambda i: (i, 0)),
                pl.BlockSpec((tile_n, 1), lambda i: (i, 0)),
            ],
            out_specs=pl.BlockSpec((1, 1), lambda i: (i, 0)),
        ),
        compiler_params=pltpu.CompilerParams(
            dimension_semantics=("parallel",),   # no carried state -> megacore-friendly
        ),
    )(logits, tgt2d)
    return jnp.sum(partials) / jnp.float32(n)


def _focal_loss_ref(logits, targets, gamma=GAMMA):
    log_prob = jax.nn.log_softmax(logits.astype(jnp.float32), axis=-1)
    prob = jnp.exp(log_prob)
    focal = ((1.0 - prob) ** gamma) * log_prob
    picked = jnp.take_along_axis(focal, targets[:, None].astype(jnp.int32), axis=-1)
    return -jnp.mean(picked)


if __name__ == "__main__":
    key = jax.random.PRNGKey(0)
    k1, k2, k3, k4 = jax.random.split(key, 4)

    # Segmentation-style shapes: batch=2, 16x16 spatial, 4 classes, flattened
    # to (N, C) rows as fed to F.log_softmax(dim=-1) / F.nll_loss.
    B, H, W, C = 2, 16, 16, 4
    N = B * H * W
    logits = jax.random.normal(k1, (N, C), dtype=jnp.float32)
    targets = jax.random.randint(k2, (N,), 0, C, dtype=jnp.int32)

    loss = focal_loss(logits, targets)
    jax.block_until_ready(loss)
    ref = _focal_loss_ref(logits, targets)
    assert jnp.allclose(loss, ref, rtol=1e-5, atol=1e-5), (loss, ref)

    # Also exercise the multi-block + ragged-tail (masked) path.
    N2, C2 = 500, 16
    logits2 = jax.random.normal(k3, (N2, C2), dtype=jnp.float32)
    targets2 = jax.random.randint(k4, (N2,), 0, C2, dtype=jnp.int32)
    loss2 = focal_loss(logits2, targets2, block_bytes=8 * 1024)  # force several tiles
    jax.block_until_ready(loss2)
    ref2 = _focal_loss_ref(logits2, targets2)
    assert jnp.allclose(loss2, ref2, rtol=1e-5, atol=1e-5), (loss2, ref2)

    print("KERNEL_OK")
</pallas_src>

<mosaic_0001>
module attributes {stable_mosaic.version = 11 : i64} {
  func.func @_focal_loss_kernel(%arg0: i32, %arg1: memref<512x4xf32, #tpu.memory_space<vmem>>, %arg2: memref<512x1xi32, #tpu.memory_space<vmem>>, %arg3: memref<1x1xf32, #tpu.memory_space<vmem>>) attributes {dimension_semantics = [#tpu.dimension_semantics<parallel>], iteration_bounds = array<i64: 1>, scalar_prefetch = 0 : i64, scratch_operands = 0 : i64, tpu.core_type = #tpu.core_type<tc>, window_params = [{transform_indices = @transform_0, window_bounds = array<i64: 512, 4>}, {transform_indices = @transform_1, window_bounds = array<i64: 512, 1>}, {transform_indices = @transform_2, window_bounds = array<i64: 1, 1>}]} {
    %c0 = arith.constant 0 : index
    %c0_0 = arith.constant 0 : index
    %0 = vector.load %arg1[%c0, %c0_0] : memref<512x4xf32, #tpu.memory_space<vmem>>, vector<512x4xf32>
    %c0_1 = arith.constant 0 : index
    %c0_2 = arith.constant 0 : index
    %1 = vector.load %arg2[%c0_1, %c0_2] : memref<512x1xi32, #tpu.memory_space<vmem>>, vector<512x1xi32>
    %cst = arith.constant dense<0xFF800000> : vector<512xf32>
    %2 = vector.multi_reduction <maximumf>, %0, %cst [1] : vector<512x4xf32> to vector<512xf32>
    %3 = vector.shape_cast %2 : vector<512xf32> to vector<512x1xf32>
    %4 = vector.broadcast %3 : vector<512x1xf32> to vector<512x4xf32>
    %5 = arith.subf %0, %4 : vector<512x4xf32>
    %6 = math.exp %5 : vector<512x4xf32>
    %cst_3 = arith.constant dense<0.000000e+00> : vector<512xf32>
    %7 = vector.multi_reduction <add>, %6, %cst_3 [1] : vector<512x4xf32> to vector<512xf32>
    %8 = vector.shape_cast %7 : vector<512xf32> to vector<512x1xf32>
    %9 = math.log %8 : vector<512x1xf32>
    %10 = tpu.iota {dimensions = array<i32: 1>} : vector<512x4xi32>
    %11 = vector.broadcast %1 : vector<512x1xi32> to vector<512x4xi32>
    %12 = arith.cmpi eq, %10, %11 : vector<512x4xi32>
    %cst_4 = arith.constant 0.000000e+00 : f32
    %13 = vector.broadcast %cst_4 : f32 to vector<512x4xf32>
    %14 = arith.select %12, %0, %13 : vector<512x4xi1>, vector<512x4xf32>
    %cst_5 = arith.constant dense<0.000000e+00> : vector<512xf32>
    %15 = vector.multi_reduction <add>, %14, %cst_5 [1] : vector<512x4xf32> to vector<512xf32>
    %16 = vector.shape_cast %15 : vector<512xf32> to vector<512x1xf32>
    %17 = arith.subf %16, %3 : vector<512x1xf32>
    %18 = arith.subf %17, %9 : vector<512x1xf32>
    %19 = math.exp %18 : vector<512x1xf32>
    %cst_6 = arith.constant 1.000000e+00 : f32
    %20 = vector.broadcast %cst_6 : f32 to vector<512x1xf32>
    %21 = arith.subf %20, %19 : vector<512x1xf32>
    %22 = arith.mulf %21, %21 : vector<512x1xf32>
    %23 = arith.mulf %22, %18 : vector<512x1xf32>
    %cst_7 = arith.constant 0.000000e+00 : f32
    %24 = vector.broadcast %cst_7 : f32 to vector<512x1xf32>
    %25 = arith.subf %24, %23 : vector<512x1xf32>
    %26 = tpu.iota {dimensions = array<i32: 0>} : vector<512x1xi32>
    %c512_i32 = arith.constant 512 : i32
    %27 = arith.muli %arg0, %c512_i32 : i32
    %28 = vector.broadcast %27 : i32 to vector<512x1xi32>
    %29 = arith.addi %26, %28 : vector<512x1xi32>
    %c512_i32_8 = arith.constant 512 : i32
    %30 = vector.broadcast %c512_i32_8 : i32 to vector<512x1xi32>
    %31 = arith.cmpi slt, %29, %30 : vector<512x1xi32>
    %cst_9 = arith.constant 0.000000e+00 : f32
    %32 = vector.broadcast %cst_9 : f32 to vector<512x1xf32>
    %33 = arith.select %31, %25, %32 : vector<512x1xi1>, vector<512x1xf32>
    %34 = vector.shape_cast %33 : vector<512x1xf32> to vector<1x512x1xf32>
    %cst_10 = arith.constant dense<0.000000e+00> : vector<1xf32>
    %35 = vector.multi_reduction <add>, %34, %cst_10 [1, 2] : vector<1x512x1xf32> to vector<1xf32>
    %36 = vector.shape_cast %35 : vector<1xf32> to vector<1x1x1xf32>
    %37 = vector.extract %36[0, 0, 0] : f32 from vector<1x1x1xf32>
    %38 = vector.broadcast %37 : f32 to vector<1x1xf32>
    %c0_11 = arith.constant 0 : index
    %c0_12 = arith.constant 0 : index
    %39 = vector.load %arg3[%c0_11, %c0_12] : memref<1x1xf32, #tpu.memory_space<vmem>>, vector<1x1xf32>
    tpu.vector_store %arg3[%c0_11, %c0_12], %38 {strides = array<i32>} : memref<1x1xf32, #tpu.memory_space<vmem>>, vector<1x1xf32>,
    return
  }
  func.func @transform_0(%arg0: i32) -> (i32, i32) {
    %c0_i32 = arith.constant 0 : i32
    %c0_i32_0 = arith.constant 0 : i32
    return %arg0, %c0_i32 : i32, i32
  }
  func.func @transform_1(%arg0: i32) -> (i32, i32) {
    %c0_i32 = arith.constant 0 : i32
    %c0_i32_0 = arith.constant 0 : i32
    return %arg0, %c0_i32 : i32, i32
  }
  func.func @transform_2(%arg0: i32) -> (i32, i32) {
    %c0_i32 = arith.constant 0 : i32
    %c0_i32_0 = arith.constant 0 : i32
    return %arg0, %c0_i32 : i32, i32
  }
}

</mosaic_0001>

<bundles_post_ra>
// kernel: tpu_custom_call.1
= control target key start
LH: loop header
LB: loop body
LE: loop exit
PB: predicated region body
PF: predicated region fallthrough
CT: control target
= control target key end

     0   :  { %vm140_vm0 = vcmask 31744   ;;  %s4711_s0 = inlined_call_operand.vmem [shape: f32[512,4], index: 0, kind: input, shape index: {}]   ;;  %s4712_s1 = inlined_call_operand.vmem [shape: s32[512,1], index: 1, kind: input, shape index: {}]   ;;  %s4713_s2 = inlined_call_operand.hbm [shape: f32[1,1], index: 2, kind: output, shape index: {}]  }
   0x1   :  { %v2787_v0 = vld [vmem:[%s4711_s0 + $0x20] sm:$0xff]  ;;  %v2792_v1 = vld [vmem:[%s4711_s0 + $0x10] sm:$0xff]  ;;  %v2808_v6 = vld [vmem:[%s4711_s0 + $0x28] sm:$0xff] }
   0x2   :  { %v2797_v2 = vld [vmem:[%s4711_s0] sm:$0xff]  ;;  %v153_v3 = vsel %vm140_vm0, %v2787_v0, -inf  ;;  %v147_v4 = vsel %vm140_vm0, %v2792_v1, -inf  ;;  %v2813_v7 = vld [vmem:[%s4711_s0 + $0x18] sm:$0xff]  ;;  %v2818_v8 = vld [vmem:[%s4711_s0 + $0x8] sm:$0xff] }
   0x3   :  { %v141_v5 = vsel %vm140_vm0, %v2797_v2, -inf  ;;  %154 = vmax.xlane.f32.xlu2 %v153_v3  ;;  %148 = vmax.xlane.f32.xlu1 %v147_v4 }
   0x4   :  { %142 = vmax.xlane.f32.xlu0 %v141_v5 }
   0x5   :  { %7 = vsyncpa [#allocation3], 0  ;;  %v156_v9 = vsel %vm140_vm0, %v2808_v6, -inf  ;;  %v150_v10 = vsel %vm140_vm0, %v2813_v7, -inf  ;;  %v144_v11 = vsel %vm140_vm0, %v2818_v8, -inf  ;;  %v2829_v12 = vld [vmem:[%s4711_s0 + $0x40] sm:$0xff] }
   0x6   :  { %v2834_v13 = vld [vmem:[%s4711_s0 + $0x38] sm:$0xff]  ;;  %v2839_v14 = vld [vmem:[%s4711_s0 + $0x30] sm:$0xff]  ;;  %v165_v15 = vsel %vm140_vm0, %v2829_v12, -inf  ;;  %v2860_v20 = vld [vmem:[%s4711_s0 + $0x48] sm:$0xff]  ;;  %s2277_s28 = sshll.u32 %s4713_s2, 4  ;;  %s2768_s29 = smov [#allocation2]   ;;  %s2278_s28 = int_to_ptr.hbm [resolvable:$true] %s2277_s28 }
   0x7   :  { %v162_v16 = vsel %vm140_vm0, %v2834_v13, -inf  ;;  %v159_v17 = vsel %vm140_vm0, %v2839_v14, -inf  ;;  %v2850_v18 = vld [vmem:[%s4711_s0 + $0x58] sm:$0xff]  ;;  %v2855_v19 = vld [vmem:[%s4711_s0 + $0x50] sm:$0xff]  ;;  %v168_v23 = vsel %vm140_vm0, %v2860_v20, -inf  ;;  %v2876_v25 = vld [vmem:[%s4711_s0 + $0x68] sm:$0xff] }
   0x8   :  { %v174_v21 = vsel %vm140_vm0, %v2850_v18, -inf  ;;  %v171_v22 = vsel %vm140_vm0, %v2855_v19, -inf  ;;  %v2871_v24 = vld [vmem:[%s4711_s0 + $0x70] sm:$0xff]  ;;  %v2881_v26 = vld [vmem:[%s4711_s0 + $0x60] sm:$0xff]  ;;  %v180_v28 = vsel %vm140_vm0, %v2876_v25, -inf  ;;  %v2892_v30 = vld [vmem:[%s4711_s0 + $0x88] sm:$0xff] }
   0x9   :  { %v183_v27 = vsel %vm140_vm0, %v2871_v24, -inf  ;;  %v177_v29 = vsel %vm140_vm0, %v2881_v26, -inf  ;;  %v2897_v31 = vld [vmem:[%s4711_s0 + $0x80] sm:$0xff]  ;;  %v2902_v32 = vld [vmem:[%s4711_s0 + $0x78] sm:$0xff]  ;;  %v192_v33 = vsel %vm140_vm0, %v2892_v30, -inf  ;;  %v2923_v38 = vld [vmem:[%s4711_s0 + $0x90] sm:$0xff] }
   0xa   :  { %v189_v34 = vsel %vm140_vm0, %v2897_v31, -inf  ;;  %v186_v35 = vsel %vm140_vm0, %v2902_v32, -inf  ;;  %v2913_v36 = vld [vmem:[%s4711_s0 + $0xa0] sm:$0xff]  ;;  %v2918_v37 = vld [vmem:[%s4711_s0 + $0x98] sm:$0xff]  ;;  %v195_v41 = vsel %vm140_vm0, %v2923_v38, -inf  ;;  %v2939_v43 = vld [vmem:[%s4711_s0 + $0xb0] sm:$0xff] }
   0xb   :  { %157 = vmax.xlane.f32.xlu2 %v156_v9  ;;  %151 = vmax.xlane.f32.xlu1 %v150_v10  ;;  %v201_v39 = vsel %vm140_vm0, %v2913_v36, -inf  ;;  %v198_v40 = vsel %vm140_vm0, %v2918_v37, -inf  ;;  %v2934_v42 = vld [vmem:[%s4711_s0 + $0xb8] sm:$0xff]  ;;  %v2944_v44 = vld [vmem:[%s4711_s0 + $0xa8] sm:$0xff]  ;;  %v207_v46 = vsel %vm140_vm0, %v2939_v43, -inf  ;;  %v2955_v48 = vld [vmem:[%s4711_s0 + $0xd0] sm:$0xff] }
   0xc   :  { %145 = vmax.xlane.f32.xlu0 %v144_v11  ;;  %v210_v45 = vsel %vm140_vm0, %v2934_v42, -inf  ;;  %v204_v47 = vsel %vm140_vm0, %v2944_v44, -inf  ;;  %v2960_v49 = vld [vmem:[%s4711_s0 + $0xc8] sm:$0xff]  ;;  %v2965_v50 = vld [vmem:[%s4711_s0 + $0xc0] sm:$0xff]  ;;  %v219_v51 = vsel %vm140_vm0, %v2955_v48, -inf  ;;  %v2986_v56 = vld [vmem:[%s4711_s0 + $0xd8] sm:$0xff] }
   0xd   :  { %v216_v52 = vsel %vm140_vm0, %v2960_v49, -inf  ;;  %v213_v53 = vsel %vm140_vm0, %v2965_v50, -inf  ;;  %v2976_v54 = vld [vmem:[%s4711_s0 + $0xe8] sm:$0xff]  ;;  %v2981_v55 = vld [vmem:[%s4711_s0 + $0xe0] sm:$0xff]  ;;  %v222_v59 = vsel %vm140_vm0, %v2986_v56, -inf  ;;  %v3002_v61 = vld [vmem:[%s4711_s0 + $0xf8] sm:$0xff] }
   0xe   :  { %v228_v57 = vsel %vm140_vm0, %v2976_v54, -inf  ;;  %v225_v58 = vsel %vm140_vm0, %v2981_v55, -inf  ;;  %v2997_v60 = vld [vmem:[%s4711_s0 + $0x100] sm:$0xff]  ;;  %v3007_v62 = vld [vmem:[%s4711_s0 + $0xf0] sm:$0xff]  ;;  %v234_v3 = vsel %vm140_vm0, %v3002_v61, -inf  ;;  %v3018_v5 = vld [vmem:[%s4711_s0 + $0x118] sm:$0xff] }
   0xf   :  { %v237_v63 = vsel %vm140_vm0, %v2997_v60, -inf  ;;  %v231_v4 = vsel %vm140_vm0, %v3007_v62, -inf  ;;  %v3023_v9 = vld [vmem:[%s4711_s0 + $0x110] sm:$0xff]  ;;  %v3028_v10 = vld [vmem:[%s4711_s0 + $0x108] sm:$0xff]  ;;  %v246_v11 = vsel %vm140_vm0, %v3018_v5, -inf  ;;  %s2275_s30 = sshll.u32 %s2768_s29, 4  ;;  %s2276_s30 = int_to_ptr.vmem [resolvable:$true] %s2275_s30 }
  0x13   :  { %166 = vmax.xlane.f32.xlu2 %v165_v15  ;;  %163 = vmax.xlane.f32.xlu1 %v162_v16  ;;  %v243_v15 = vsel %vm140_vm0, %v3023_v9, -inf  ;;  %v240_v16 = vsel %vm140_vm0, %v3028_v10, -inf }
  0x14   :  { %160 = vmax.xlane.f32.xlu0 %v159_v17  ;;  %v3039_v17 = vld [vmem:[%s4711_s0 + $0x130] sm:$0xff] }
  0x15   :  { %4787 = vst [vmem:[#allocation5_spill] sm:$0xff] %v3039_v17 }
  0x1b   :  { %175 = vmax.xlane.f32.xlu2 %v174_v21  ;;  %172 = vmax.xlane.f32.xlu1 %v171_v22  ;;  %v3044_v21 = vld [vmem:[%s4711_s0 + $0x128] sm:$0xff]  ;;  %v3049_v22 = vld [vmem:[%s4711_s0 + $0x120] sm:$0xff] }
  0x1c   :  { %169 = vmax.xlane.f32.xlu0 %v168_v23  ;;  %v255_v23 = vsel %vm140_vm0, %v3039_v17, -inf }
  0x23   :  { %184 = vmax.xlane.f32.xlu2 %v183_v27  ;;  %181 = vmax.xlane.f32.xlu1 %v180_v28  ;;  %v252_v27 = vsel %vm140_vm0, %v3044_v21, -inf  ;;  %v249_v28 = vsel %vm140_vm0, %v3049_v22, -inf }
  0x24   :  { %178 = vmax.xlane.f32.xlu0 %v177_v29  ;;  %v3060_v29 = vld [vmem:[%s4711_s0 + $0x148] sm:$0xff] }
  0x25   :  { %4788 = vst [vmem:[#allocation6_spill] sm:$0xff] %v3060_v29 }
  0x2b   :  { %193 = vmax.xlane.f32.xlu2 %v192_v33  ;;  %190 = vmax.xlane.f32.xlu1 %v189_v34  ;;  %v3065_v33 = vld [vmem:[%s4711_s0 + $0x140] sm:$0xff]  ;;  %v3070_v34 = vld [vmem:[%s4711_s0 + $0x138] sm:$0xff] }
  0x2c   :  { %187 = vmax.xlane.f32.xlu0 %v186_v35  ;;  %4789 = vst [vmem:[#allocation7_spill] sm:$0xff] %v3065_v33  ;;  %v264_v35 = vsel %vm140_vm0, %v3060_v29, -inf }
  0x2d   :  { %4790 = vst [vmem:[#allocation8_spill] sm:$0xff] %v3070_v34 }
  0x33   :  { %202 = vmax.xlane.f32.xlu2 %v201_v39  ;;  %199 = vmax.xlane.f32.xlu1 %v198_v40  ;;  %v261_v39 = vsel %vm140_vm0, %v3065_v33, -inf  ;;  %v258_v40 = vsel %vm140_vm0, %v3070_v34, -inf }
  0x34   :  { %196 = vmax.xlane.f32.xlu0 %v195_v41  ;;  %v3081_v41 = vld [vmem:[%s4711_s0 + $0x160] sm:$0xff] }
  0x35   :  { %4791 = vst [vmem:[#allocation9_spill] sm:$0xff] %v3081_v41 }
  0x3b   :  { %211 = vmax.xlane.f32.xlu2 %v210_v45  ;;  %208 = vmax.xlane.f32.xlu1 %v207_v46  ;;  %v3086_v45 = vld [vmem:[%s4711_s0 + $0x158] sm:$0xff]  ;;  %v3091_v46 = vld [vmem:[%s4711_s0 + $0x150] sm:$0xff] }
  0x3c   :  { %205 = vmax.xlane.f32.xlu0 %v204_v47  ;;  %4792 = vst [vmem:[#allocation10_spill] sm:$0xff] %v3086_v45  ;;  %v273_v47 = vsel %vm140_vm0, %v3081_v41, -inf }
  0x3d   :  { %4793 = vst [vmem:[#allocation11_spill] sm:$0xff] %v3091_v46 }
  0x43   :  { %220 = vmax.xlane.f32.xlu2 %v219_v51  ;;  %217 = vmax.xlane.f32.xlu1 %v216_v52  ;;  %v270_v51 = vsel %vm140_vm0, %v3086_v45, -inf  ;;  %v267_v52 = vsel %vm140_vm0, %v3091_v46, -inf }
  0x44   :  { %214 = vmax.xlane.f32.xlu0 %v213_v53  ;;  %v3102_v53 = vld [vmem:[%s4711_s0 + $0x178] sm:$0xff] }
  0x45   :  { %4794 = vst [vmem:[#allocation12_spill] sm:$0xff] %v3102_v53 }
  0x4b   :  { %229 = vmax.xlane.f32.xlu2 %v228_v57  ;;  %226 = vmax.xlane.f32.xlu1 %v225_v58  ;;  %v3107_v57 = vld [vmem:[%s4711_s0 + $0x170] sm:$0xff] }
  0x4c   :  { %223 = vmax.xlane.f32.xlu0 %v222_v59  ;;  %4795 = vst [vmem:[#allocation13_spill] sm:$0xff] %v3107_v57 }
  0x53   :  { %238 = vmax.xlane.f32.xlu2 %v237_v63  ;;  %235 = vmax.xlane.f32.xlu1 %v234_v3  ;;  %v3116_v63 = vld [vmem:[%s4711_s0 + $0x168] sm:$0xff] }
  0x54   :  { %232 = vmax.xlane.f32.xlu0 %v231_v4  ;;  %4798 = vst [vmem:[#allocation16_spill] sm:$0xff] %v3116_v63  ;;  %v282_v4 = vsel %vm140_vm0, %v3102_v53, -inf }
  0x5b   :  { %247 = vmax.xlane.f32.xlu2 %v246_v11  ;;  %244 = vmax.xlane.f32.xlu1 %v243_v15  ;;  %v279_v11 = vsel %vm140_vm0, %v3107_v57, -inf  ;;  %v276_v15 = vsel %vm140_vm0, %v3116_v63, -inf  ;;  %v3210_v63 = vld [vmem:[%s4711_s0 + $0x1d8] sm:$0xff]  ;;  %v3215_v57 = vld [vmem:[%s4711_s0 + $0x1d0] sm:$0xff] }
  0x5c   :  { %241 = vmax.xlane.f32.xlu0 %v240_v16  ;;  %v3129_v16 = vld [vmem:[%s4711_s0 + $0x190] sm:$0xff]  ;;  %4813 = vst [vmem:[#allocation31_spill] sm:$0xff] %v3210_v63 }
  0x5d   :  { %4800 = vst [vmem:[#allocation18_spill] sm:$0xff] %v3129_v16 }
  0x5e   :  { %4814 = vst [vmem:[#allocation32_spill] sm:$0xff] %v3215_v57 }
  0x63   :  { %256 = vmax.xlane.f32.xlu2 %v255_v23  ;;  %253 = vmax.xlane.f32.xlu1 %v252_v27  ;;  %v3134_v23 = vld [vmem:[%s4711_s0 + $0x188] sm:$0xff] }
  0x64   :  { %250 = vmax.xlane.f32.xlu0 %v249_v28  ;;  %4801 = vst [vmem:[#allocation19_spill] sm:$0xff] %v3134_v23 }
  0x6b   :  { %265 = vmax.xlane.f32.xlu2 %v264_v35  ;;  %262 = vmax.xlane.f32.xlu1 %v261_v39  ;;  %v3143_v35 = vld [vmem:[%s4711_s0 + $0x180] sm:$0xff] }
  0x6c   :  { %259 = vmax.xlane.f32.xlu0 %v258_v40  ;;  %4803 = vst [vmem:[#allocation21_spill] sm:$0xff] %v3143_v35  ;;  %v291_v40 = vsel %vm140_vm0, %v3129_v16, -inf }
  0x73   :  { %274 = vmax.xlane.f32.xlu2 %v273_v47  ;;  %271 = vmax.xlane.f32.xlu1 %v270_v51  ;;  %v288_v47 = vsel %vm140_vm0, %v3134_v23, -inf  ;;  %v285_v51 = vsel %vm140_vm0, %v3143_v35, -inf  ;;  %v3183_v35 = vld [vmem:[%s4711_s0 + $0x1c0] sm:$0xff]  ;;  %v3188_v23 = vld [vmem:[%s4711_s0 + $0x1b8] sm:$0xff] }
  0x74   :  { %268 = vmax.xlane.f32.xlu0 %v267_v52  ;;  %v3156_v52 = vld [vmem:[%s4711_s0 + $0x1a8] sm:$0xff]  ;;  %4810 = vst [vmem:[#allocation28_spill] sm:$0xff] %v3183_v35 }
  0x75   :  { %4805 = vst [vmem:[#allocation23_spill] sm:$0xff] %v3156_v52 }
  0x76   :  { %v3109_v58 = vpop.xlane.xlu2 %154  ;;  %v3111_v59 = vpop.xlane.xlu1 %148  ;;  %4811 = vst [vmem:[#allocation29_spill] sm:$0xff] %v3188_v23 }
  0x77   :  { %4796 = vst [vmem:[#allocation14_spill] sm:$0xff] %v3109_v58  ;;  %v3118_v3 = vpop.xlane.xlu0 %142 }
  0x78   :  { %4797 = vst [vmem:[#allocation15_spill] sm:$0xff] %v3111_v59 }
  0x79   :  { %4799 = vst [vmem:[#allocation17_spill] sm:$0xff] %v3118_v3 }
  0x7b   :  { %283 = vmax.xlane.f32.xlu2 %v282_v4  ;;  %280 = vmax.xlane.f32.xlu1 %v279_v11  ;;  %v3161_v4 = vld [vmem:[%s4711_s0 + $0x1a0] sm:$0xff] }
  0x7c   :  { %277 = vmax.xlane.f32.xlu0 %v276_v15  ;;  %4806 = vst [vmem:[#allocation24_spill] sm:$0xff] %v3161_v4  ;;  %v297_v16 = vsel %vm140_vm0, %v3161_v4, -inf }
  0x7e   :  { %v3136_v27 = vpop.xlane.xlu2 %157  ;;  %v3138_v28 = vpop.xlane.xlu1 %151 }
  0x7f   :  { %4802 = vst [vmem:[#allocation20_spill] sm:$0xff] %v3138_v28  ;;  %v3145_v39 = vpop.xlane.xlu0 %145 }
  0x80   :  { %4804 = vst [vmem:[#allocation22_spill] sm:$0xff] %v3145_v39  ;;  %v334_v46 = vsub.f32 %v2818_v8, %v3145_v39  ;;  %v336_v39 = vsub.f32 %v2813_v7, %v3138_v28  ;;  %v3278_v7 = vld [vmem:[%s4711_s0 + $0x1f8] sm:$0xff] }
  0x82   :  { %v399_v34 = vmul.f32 1.442695, %v334_v46  ;;  %v337_v46 = vsub.f32 %v2787_v0, %v3109_v58 }
  0x83   :  { %292 = vmax.xlane.f32.xlu2 %v291_v40  ;;  %289 = vmax.xlane.f32.xlu1 %v288_v47  ;;  %v3170_v40 = vld [vmem:[%s4711_s0 + $0x198] sm:$0xff] }
  0x84   :  { %286 = vmax.xlane.f32.xlu0 %v285_v51  ;;  %4808 = vst [vmem:[#allocation26_spill] sm:$0xff] %v3170_v40  ;;  %v300_v51 = vsel %vm140_vm0, %v3156_v52, -inf  ;;  %v294_v53 = vsel %vm140_vm0, %v3170_v40, -inf  ;;  %v306_v40 = vsel %vm140_vm0, %v3188_v23, -inf  ;;  %v315_v23 = vsel %vm140_vm0, %v3215_v57, -inf }
  0x85   :  { %v335_v57 = vsub.f32 %v2792_v1, %v3111_v59  ;;  %v405_v0 = vmul.f32 1.442695, %v337_v46 }
  0x86   :  { %v3163_v11 = vpop.xlane.xlu2 %166  ;;  %v3165_v15 = vpop.xlane.xlu1 %163 }
  0x87   :  { %4807 = vst [vmem:[#allocation25_spill] sm:$0xff] %v3165_v15  ;;  %v3172_v47 = vpop.xlane.xlu0 %160  ;;  %v340_v1 = vsub.f32 %v2834_v13, %v3165_v15 }
  0x88   :  { %4809 = vst [vmem:[#allocation27_spill] sm:$0xff] %v3172_v47 }
  0x8b   :  { %301 = vmax.xlane.f32.xlu2 %v300_v51  ;;  %298 = vmax.xlane.f32.xlu1 %v297_v16  ;;  %v3197_v51 = vld [vmem:[%s4711_s0 + $0x1b0] sm:$0xff]  ;;  %v309_v16 = vsel %vm140_vm0, %v3183_v35, -inf }
  0x8c   :  { %295 = vmax.xlane.f32.xlu0 %v294_v53  ;;  %4812 = vst [vmem:[#allocation30_spill] sm:$0xff] %v3197_v51  ;;  %v303_v4 = vsel %vm140_vm0, %v3197_v51, -inf  ;;  %v318_v51 = vsel %vm140_vm0, %v3210_v63, -inf }
  0x8e   :  { %v3190_v52 = vpop.xlane.xlu2 %175  ;;  %v3192_v41 = vpop.xlane.xlu1 %172 }
  0x8f   :  { %v3199_v53 = vpop.xlane.xlu0 %169 }
  0x93   :  { %310 = vmax.xlane.f32.xlu2 %v309_v16  ;;  %307 = vmax.xlane.f32.xlu1 %v306_v40  ;;  %v3224_v16 = vld [vmem:[%s4711_s0 + $0x1c8] sm:$0xff]  ;;  %v333_v40 = vsub.f32 %v2797_v2, %v3118_v3  ;;  %v3241_v2 = vld [vmem:[%s4711_s0 + $0x1f0] sm:$0xff] }
  0x94   :  { %304 = vmax.xlane.f32.xlu0 %v303_v4  ;;  %4815 = vst [vmem:[#allocation33_spill] sm:$0xff] %v3224_v16  ;;  %v312_v45 = vsel %vm140_vm0, %v3224_v16, -inf  ;;  %v3246_v3 = vld [vmem:[%s4711_s0 + $0x1e8] sm:$0xff] }
  0x95   :  { %v397_v17 = vmul.f32 1.442695, %v333_v40  ;;  %4816 = vst [vmem:[#allocation34_spill] sm:$0xff] %v3241_v2  ;;  %v324_v40 = vsel %vm140_vm0, %v3246_v3, -inf }
  0x96   :  { %v3217_v35 = vpop.xlane.xlu2 %184  ;;  %v3219_v29 = vpop.xlane.xlu1 %181  ;;  %4817 = vst [vmem:[#allocation35_spill] sm:$0xff] %v3246_v3 }
  0x97   :  { %v3226_v4 = vpop.xlane.xlu0 %178  ;;  %2293 = vpow2.f32 %v397_v17  ;;  %v403_v17 = vmul.f32 1.442695, %v336_v39  ;;  %v330_v39 = vsel %vm140_vm0, %v3278_v7, -inf }
  0x98   :  { %2295 = vpow2.f32 %v399_v34 }
  0x99   :  { %2297 = vpow2.f32 %v405_v0 }
  0x9a   :  { %2299 = vpow2.f32 %v403_v17 }
  0x9b   :  { %319 = vmax.xlane.f32.xlu2 %v318_v51  ;;  %316 = vmax.xlane.f32.xlu1 %v315_v23  ;;  %v3255_v23 = vld [vmem:[%s4711_s0 + $0x1e0] sm:$0xff]  ;;  %v327_v51 = vsel %vm140_vm0, %v3241_v2, -inf  ;;  %v401_v2 = vmul.f32 1.442695, %v335_v57  ;;  %v339_v57 = vsub.f32 %v2839_v14, %v3172_v47 }
  0x9c   :  { %313 = vmax.xlane.f32.xlu0 %v312_v45  ;;  %v321_v16 = vsel %vm140_vm0, %v3255_v23, -inf }
  0x9d   :  { %v2294_v58 = vpop.eup %2293  ;;  %2301 = vpow2.f32 %v401_v2  ;;  %v409_v13 = vmul.f32 1.442695, %v339_v57 }
  0x9e   :  { %v3248_v63 = vpop.xlane.xlu2 %193  ;;  %v3250_v8 = vpop.xlane.xlu1 %190  ;;  %v525_v46 = vsel %vm140_vm0, %v2294_v58, 0.0  ;;  %v342_v58 = vsub.f32 %v2860_v20, %v3199_v53 }
  0x9f   :  { %v3257_v45 = vpop.xlane.xlu0 %187  ;;  %v2296_v34 = vpop.eup %2295 }
  0xa0   :  { %v2298_v0 = vpop.eup %2297 }
  0xa1   :  { %v2300_v47 = vpop.eup %2299  ;;  %v537_v57 = vsel %vm140_vm0, %v2298_v0, 0.0  ;;  %v344_v0 = vsub.f32 %v2850_v18, %v3190_v52 }
  0xa3   :  { %328 = vmax.xlane.f32.xlu2 %v327_v51  ;;  %325 = vmax.xlane.f32.xlu1 %v324_v40  ;;  %v528_v51 = vsel %vm140_vm0, %v2296_v34, 0.0  ;;  %v411_v40 = vmul.f32 1.442695, %v340_v1  ;;  %v2302_v59 = vpop.eup %2301  ;;  %v341_v34 = vsub.f32 %v2829_v12, %v3163_v11  ;;  %v534_v1 = vsel %vm140_vm0, %v2300_v47, 0.0 }
  0xa4   :  { %322 = vmax.xlane.f32.xlu0 %v321_v16  ;;  %v338_v16 = vsub.f32 %v2808_v6, %v3136_v27  ;;  %v343_v6 = vsub.f32 %v2855_v19, %v3192_v41  ;;  %v346_v47 = vsub.f32 %v2876_v25, %v3219_v29 }
  0xa5   :  { %2303 = vpow2.f32 %v411_v40 }
  0xa6   :  { %v3271_v33 = vpop.xlane.xlu2 %202  ;;  %v3273_v3 = vpop.xlane.xlu1 %199  ;;  %v407_v17 = vmul.f32 1.442695, %v338_v16  ;;  %2305 = vpow2.f32 %v409_v13  ;;  %v417_v16 = vmul.f32 1.442695, %v343_v6 }
  0xa7   :  { %v3280_v28 = vpop.xlane.xlu0 %196 }
  0xa8   :  { %2307 = vpow2.f32 %v407_v17 }
  0xa9   :  { %2309 = vpow2.f32 %v417_v16 }
  0xab   :  { %526 = vadd.xlane.f32.xlu1 %v525_v46  ;;  %529 = vadd.xlane.f32.xlu2 %v528_v51  ;;  %v415_v46 = vmul.f32 1.442695, %v342_v58  ;;  %v2304_v19 = vpop.eup %2303  ;;  %v413_v51 = vmul.f32 1.442695, %v341_v34 }
  0xac   :  { %331 = vmax.xlane.f32.xlu0 %v330_v39  ;;  %v531_v39 = vsel %vm140_vm0, %v2302_v59, 0.0  ;;  %v2306_v13 = vpop.eup %2305  ;;  %v345_v59 = vsub.f32 %v2881_v26, %v3226_v4  ;;  %v546_v6 = vsel %vm140_vm0, %v2304_v19, 0.0  ;;  %v349_v19 = vsub.f32 %v2897_v31, %v3250_v8 }
  0xad   :  { %2311 = vpow2.f32 %v415_v46  ;;  %v543_v58 = vsel %vm140_vm0, %v2306_v13, 0.0  ;;  %v348_v13 = vsub.f32 %v2902_v32, %v3257_v45 }
  0xae   :  { %v3292_v15 = vpop.xlane.xlu2 %211  ;;  %v3294_v14 = vpop.xlane.xlu1 %208  ;;  %2313 = vpow2.f32 %v413_v51 }
  0xaf   :  { %4818 = vst [vmem:[#allocation36_spill] sm:$0xff] %v3292_v15  ;;  %v3296_v2 = vpop.xlane.xlu0 %205  ;;  %v2308_v12 = vpop.eup %2307 }
  0xb0   :  { %4819 = vst [vmem:[#allocation37_spill] sm:$0xff] %v3296_v2  ;;  %v540_v34 = vsel %vm140_vm0, %v2308_v12, 0.0  ;;  %v2310_v25 = vpop.eup %2309  ;;  %v347_v12 = vsub.f32 %v2871_v24, %v3217_v35 }
  0xb3   :  { %535 = vadd.xlane.f32.xlu1 %v534_v1  ;;  %538 = vadd.xlane.f32.xlu2 %v537_v57  ;;  %v423_v1 = vmul.f32 1.442695, %v346_v47  ;;  %v421_v57 = vmul.f32 1.442695, %v345_v59  ;;  %v2312_v46 = vpop.eup %2311  ;;  %v555_v47 = vsel %vm140_vm0, %v2310_v25, 0.0  ;;  %v352_v25 = vsub.f32 %v2918_v37, %v3273_v3 }
  0xb4   :  { %532 = vadd.xlane.f32.xlu0 %v531_v39  ;;  %v419_v39 = vmul.f32 1.442695, %v344_v0  ;;  %v2314_v18 = vpop.eup %2313  ;;  %v552_v59 = vsel %vm140_vm0, %v2312_v46, 0.0  ;;  %v351_v46 = vsub.f32 %v2923_v38, %v3280_v28 }
  0xb5   :  { %2315 = vpow2.f32 %v423_v1  ;;  %v549_v0 = vsel %vm140_vm0, %v2314_v18, 0.0  ;;  %v350_v18 = vsub.f32 %v2892_v30, %v3248_v63 }
  0xb6   :  { %v3307_v40 = vpop.xlane.xlu2 %220  ;;  %v3309_v20 = vpop.xlane.xlu1 %217  ;;  %2317 = vpow2.f32 %v421_v57 }
  0xb7   :  { %4820 = vst [vmem:[#allocation38_spill] sm:$0xff] %v3307_v40  ;;  %v3311_v17 = vpop.xlane.xlu0 %214  ;;  %2319 = vpow2.f32 %v419_v39 }
  0xb8   :  { %4821 = vst [vmem:[#allocation39_spill] sm:$0xff] %v3309_v20 }
  0xb9   :  { %4822 = vst [vmem:[#allocation40_spill] sm:$0xff] %v3311_v17 }
  0xbb   :  { %547 = vadd.xlane.f32.xlu2 %v546_v6  ;;  %544 = vadd.xlane.f32.xlu1 %v543_v58  ;;  %v429_v6 = vmul.f32 1.442695, %v349_v19  ;;  %v427_v58 = vmul.f32 1.442695, %v348_v13  ;;  %v2316_v31 = vpop.eup %2315 }
  0xbc   :  { %541 = vadd.xlane.f32.xlu0 %v540_v34  ;;  %v425_v34 = vmul.f32 1.442695, %v347_v12  ;;  %v2318_v57 = vpop.eup %2317  ;;  %v564_v19 = vsel %vm140_vm0, %v2316_v31, 0.0  ;;  %v355_v31 = vsub.f32 %v2939_v43, %v3294_v14 }
  0xbd   :  { %v2320_v24 = vpop.eup %2319  ;;  %2321 = vpow2.f32 %v429_v6  ;;  %v561_v13 = vsel %vm140_vm0, %v2318_v57, 0.0  ;;  %v354_v57 = vsub.f32 %v2944_v44, %v3296_v2 }
  0xbe   :  { %v3322_v16 = vpop.xlane.xlu2 %229  ;;  %v3324_v26 = vpop.xlane.xlu1 %226  ;;  %2323 = vpow2.f32 %v427_v58  ;;  %v558_v12 = vsel %vm140_vm0, %v2320_v24, 0.0  ;;  %v353_v24 = vsub.f32 %v2913_v36, %v3271_v33 }
  0xbf   :  { %4823 = vst [vmem:[#allocation41_spill] sm:$0xff] %v3322_v16  ;;  %v3326_v51 = vpop.xlane.xlu0 %223  ;;  %2325 = vpow2.f32 %v425_v34 }
  0xc0   :  { %4824 = vst [vmem:[#allocation42_spill] sm:$0xff] %v3324_v26 }
  0xc1   :  { %4825 = vst [vmem:[#allocation43_spill] sm:$0xff] %v3326_v51 }
  0xc3   :  { %556 = vadd.xlane.f32.xlu2 %v555_v47  ;;  %553 = vadd.xlane.f32.xlu1 %v552_v59  ;;  %v435_v47 = vmul.f32 1.442695, %v352_v25  ;;  %v433_v59 = vmul.f32 1.442695, %v351_v46  ;;  %v2322_v37 = vpop.eup %2321 }
  0xc4   :  { %550 = vadd.xlane.f32.xlu0 %v549_v0  ;;  %v431_v0 = vmul.f32 1.442695, %v350_v18  ;;  %v2324_v58 = vpop.eup %2323  ;;  %v573_v25 = vsel %vm140_vm0, %v2322_v37, 0.0  ;;  %v358_v37 = vsub.f32 %v2960_v49, %v3309_v20 }
  0xc5   :  { %v2326_v30 = vpop.eup %2325  ;;  %2327 = vpow2.f32 %v435_v47  ;;  %v570_v46 = vsel %vm140_vm0, %v2324_v58, 0.0  ;;  %v357_v58 = vsub.f32 %v2965_v50, %v3311_v17 }
  0xc6   :  { %v3337_v1 = vpop.xlane.xlu2 %238  ;;  %v3339_v32 = vpop.xlane.xlu1 %235  ;;  %2329 = vpow2.f32 %v433_v59  ;;  %v567_v18 = vsel %vm140_vm0, %v2326_v30, 0.0  ;;  %v356_v30 = vsub.f32 %v2934_v42, %v3292_v15 }
  0xc7   :  { %4826 = vst [vmem:[#allocation44_spill] sm:$0xff] %v3337_v1  ;;  %v3341_v39 = vpop.xlane.xlu0 %232  ;;  %2331 = vpow2.f32 %v431_v0 }
  0xc8   :  { %4827 = vst [vmem:[#allocation45_spill] sm:$0xff] %v3339_v32 }
  0xc9   :  { %4828 = vst [vmem:[#allocation46_spill] sm:$0xff] %v3341_v39 }
  0xcb   :  { %565 = vadd.xlane.f32.xlu2 %v564_v19  ;;  %562 = vadd.xlane.f32.xlu1 %v561_v13  ;;  %v441_v19 = vmul.f32 1.442695, %v355_v31  ;;  %v439_v13 = vmul.f32 1.442695, %v354_v57  ;;  %v2328_v43 = vpop.eup %2327 }
  0xcc   :  { %559 = vadd.xlane.f32.xlu0 %v558_v12  ;;  %v437_v12 = vmul.f32 1.442695, %v353_v24  ;;  %v2330_v59 = vpop.eup %2329  ;;  %v582_v31 = vsel %vm140_vm0, %v2328_v43, 0.0  ;;  %v361_v43 = vsub.f32 %v2981_v55, %v3324_v26 }
  0xcd   :  { %v2332_v36 = vpop.eup %2331  ;;  %2333 = vpow2.f32 %v441_v19  ;;  %v579_v57 = vsel %vm140_vm0, %v2330_v59, 0.0  ;;  %v360_v59 = vsub.f32 %v2986_v56, %v3326_v51 }
  0xce   :  { %v3352_v6 = vpop.xlane.xlu2 %247  ;;  %v3354_v38 = vpop.xlane.xlu1 %244  ;;  %2335 = vpow2.f32 %v439_v13  ;;  %v576_v24 = vsel %vm140_vm0, %v2332_v36, 0.0  ;;  %v359_v36 = vsub.f32 %v2955_v48, %v3307_v40 }
  0xcf   :  { %4829 = vst [vmem:[#allocation47_spill] sm:$0xff] %v3352_v6  ;;  %v3356_v34 = vpop.xlane.xlu0 %241  ;;  %2337 = vpow2.f32 %v437_v12 }
  0xd0   :  { %4830 = vst [vmem:[#allocation48_spill] sm:$0xff] %v3354_v38 }
  0xd1   :  { %4831 = vst [vmem:[#allocation49_spill] sm:$0xff] %v3356_v34 }
  0xd3   :  { %574 = vadd.xlane.f32.xlu2 %v573_v25  ;;  %571 = vadd.xlane.f32.xlu1 %v570_v46  ;;  %v447_v25 = vmul.f32 1.442695, %v358_v37  ;;  %v445_v46 = vmul.f32 1.442695, %v357_v58  ;;  %v2334_v49 = vpop.eup %2333 }
  0xd4   :  { %568 = vadd.xlane.f32.xlu0 %v567_v18  ;;  %v443_v18 = vmul.f32 1.442695, %v356_v30  ;;  %v2336_v13 = vpop.eup %2335  ;;  %v591_v37 = vsel %vm140_vm0, %v2334_v49, 0.0  ;;  %v364_v49 = vsub.f32 %v3002_v61, %v3339_v32 }
  0xd5   :  { %v2338_v42 = vpop.eup %2337  ;;  %2339 = vpow2.f32 %v447_v25  ;;  %v588_v58 = vsel %vm140_vm0, %v2336_v13, 0.0  ;;  %v363_v13 = vsub.f32 %v3007_v62, %v3341_v39 }
  0xd6   :  { %v3367_v47 = vpop.xlane.xlu2 %256  ;;  %v3369_v44 = vpop.xlane.xlu1 %253  ;;  %2341 = vpow2.f32 %v445_v46  ;;  %v585_v30 = vsel %vm140_vm0, %v2338_v42, 0.0  ;;  %v362_v42 = vsub.f32 %v2976_v54, %v3322_v16 }
  0xd7   :  { %4832 = vst [vmem:[#allocation50_spill] sm:$0xff] %v3367_v47  ;;  %v3371_v0 = vpop.xlane.xlu0 %250  ;;  %2343 = vpow2.f32 %v443_v18 }
  0xd8   :  { %4833 = vst [vmem:[#allocation51_spill] sm:$0xff] %v3369_v44 }
  0xd9   :  { %4834 = vst [vmem:[#allocation52_spill] sm:$0xff] %v3371_v0 }
  0xdb   :  { %583 = vadd.xlane.f32.xlu2 %v582_v31  ;;  %580 = vadd.xlane.f32.xlu1 %v579_v57  ;;  %v453_v31 = vmul.f32 1.442695, %v361_v43  ;;  %v451_v57 = vmul.f32 1.442695, %v360_v59  ;;  %v2340_v55 = vpop.eup %2339 }
  0xdc   :  { %577 = vadd.xlane.f32.xlu0 %v576_v24  ;;  %v449_v24 = vmul.f32 1.442695, %v359_v36  ;;  %v2342_v46 = vpop.eup %2341  ;;  %v600_v43 = vsel %vm140_vm0, %v2340_v55, 0.0  ;;  %v367_v55 = vsub.f32 %v3023_v9, %v3354_v38 }
  0xdd   :  { %v2344_v48 = vpop.eup %2343  ;;  %2345 = vpow2.f32 %v453_v31  ;;  %v597_v59 = vsel %vm140_vm0, %v2342_v46, 0.0  ;;  %v366_v46 = vsub.f32 %v3028_v10, %v3356_v34 }
  0xde   :  { %v3382_v19 = vpop.xlane.xlu2 %265  ;;  %v3384_v50 = vpop.xlane.xlu1 %262  ;;  %2347 = vpow2.f32 %v451_v57  ;;  %v594_v36 = vsel %vm140_vm0, %v2344_v48, 0.0  ;;  %v365_v48 = vsub.f32 %v2997_v60, %v3337_v1 }
  0xdf   :  { %4835 = vst [vmem:[#allocation53_spill] sm:$0xff] %v3382_v19  ;;  %v3386_v12 = vpop.xlane.xlu0 %259  ;;  %2349 = vpow2.f32 %v449_v24 }
  0xe0   :  { %4836 = vst [vmem:[#allocation54_spill] sm:$0xff] %v3384_v50 }
  0xe1   :  { %4837 = vst [vmem:[#allocation55_spill] sm:$0xff] %v3386_v12 }
  0xe3   :  { %592 = vadd.xlane.f32.xlu2 %v591_v37  ;;  %589 = vadd.xlane.f32.xlu1 %v588_v58  ;;  %v459_v37 = vmul.f32 1.442695, %v364_v49  ;;  %v457_v58 = vmul.f32 1.442695, %v363_v13  ;;  %v2346_v61 = vpop.eup %2345 }
  0xe4   :  { %586 = vadd.xlane.f32.xlu0 %v585_v30  ;;  %v455_v30 = vmul.f32 1.442695, %v362_v42  ;;  %v2348_v57 = vpop.eup %2347  ;;  %v609_v49 = vsel %vm140_vm0, %v2346_v61, 0.0  ;;  %v370_v61 = vsub.f32 %v3044_v21, %v3369_v44 }
  0xe5   :  { %v2350_v54 = vpop.eup %2349  ;;  %2351 = vpow2.f32 %v459_v37  ;;  %v606_v13 = vsel %vm140_vm0, %v2348_v57, 0.0  ;;  %v369_v57 = vsub.f32 %v3049_v22, %v3371_v0 }
  0xe6   :  { %v3397_v25 = vpop.xlane.xlu2 %274  ;;  %v3399_v56 = vpop.xlane.xlu1 %271  ;;  %2353 = vpow2.f32 %v457_v58  ;;  %v603_v42 = vsel %vm140_vm0, %v2350_v54, 0.0  ;;  %v368_v54 = vsub.f32 %v3018_v5, %v3352_v6 }
  0xe7   :  { %4838 = vst [vmem:[#allocation56_spill] sm:$0xff] %v3397_v25  ;;  %v3401_v18 = vpop.xlane.xlu0 %268  ;;  %2355 = vpow2.f32 %v455_v30 }
  0xe8   :  { %4839 = vst [vmem:[#allocation57_spill] sm:$0xff] %v3399_v56 }
  0xe9   :  { %4840 = vst [vmem:[#allocation58_spill] sm:$0xff] %v3401_v18 }
  0xeb   :  { %601 = vadd.xlane.f32.xlu2 %v600_v43  ;;  %598 = vadd.xlane.f32.xlu1 %v597_v59  ;;  %v465_v43 = vmul.f32 1.442695, %v367_v55  ;;  %v463_v59 = vmul.f32 1.442695, %v366_v46  ;;  %v2352_v9 = vpop.eup %2351 }
  0xec   :  { %595 = vadd.xlane.f32.xlu0 %v594_v36  ;;  %v461_v36 = vmul.f32 1.442695, %v365_v48  ;;  %v2354_v58 = vpop.eup %2353  ;;  %v618_v55 = vsel %vm140_vm0, %v2352_v9, 0.0  ;;  %v4850_v9 = vld [vmem:[#allocation7_spill] sm:$0xff] }
  0xed   :  { %v2356_v60 = vpop.eup %2355  ;;  %2357 = vpow2.f32 %v465_v43  ;;  %v615_v46 = vsel %vm140_vm0, %v2354_v58, 0.0  ;;  %v373_v58 = vsub.f32 %v4850_v9, %v3384_v50 }
  0xee   :  { %v3412_v31 = vpop.xlane.xlu2 %283  ;;  %v3414_v62 = vpop.xlane.xlu1 %280  ;;  %2359 = vpow2.f32 %v463_v59  ;;  %v612_v48 = vsel %vm140_vm0, %v2356_v60, 0.0  ;;  %v4851_v60 = vld [vmem:[#allocation8_spill] sm:$0xff] }
  0xef   :  { %4841 = vst [vmem:[#allocation59_spill] sm:$0xff] %v3412_v31  ;;  %v3416_v24 = vpop.xlane.xlu0 %277  ;;  %2361 = vpow2.f32 %v461_v36 }
  0xf0   :  { %4842 = vst [vmem:[#allocation60_spill] sm:$0xff] %v3414_v62 }
  0xf1   :  { %4843 = vst [vmem:[#allocation61_spill] sm:$0xff] %v3416_v24 }
  0xf3   :  { %610 = vadd.xlane.f32.xlu2 %v609_v49  ;;  %607 = vadd.xlane.f32.xlu1 %v606_v13  ;;  %v471_v49 = vmul.f32 1.442695, %v370_v61  ;;  %v469_v13 = vmul.f32 1.442695, %v369_v57  ;;  %v2358_v21 = vpop.eup %2357  ;;  %v372_v61 = vsub.f32 %v4851_v60, %v3386_v12  ;;  %v4852_v57 = vld [vmem:[#allocation5_spill] sm:$0xff] }
  0xf4   :  { %604 = vadd.xlane.f32.xlu0 %v603_v42  ;;  %v467_v42 = vmul.f32 1.442695, %v368_v54  ;;  %v2360_v59 = vpop.eup %2359  ;;  %v371_v54 = vsub.f32 %v4852_v57, %v3367_v47 }
  0xf5   :  { %v2362_v5 = vpop.eup %2361  ;;  %2363 = vpow2.f32 %v471_v49  ;;  %v477_v49 = vmul.f32 1.442695, %v373_v58  ;;  %v475_v44 = vmul.f32 1.442695, %v372_v61  ;;  %v4858_v61 = vld [vmem:[#allocation6_spill] sm:$0xff] }
  0xf6   :  { %v3427_v37 = vpop.xlane.xlu2 %292  ;;  %v3429_v10 = vpop.xlane.xlu1 %289  ;;  %2365 = vpow2.f32 %v469_v13  ;;  %v473_v13 = vmul.f32 1.442695, %v371_v54  ;;  %v374_v54 = vsub.f32 %v4858_v61, %v3382_v19 }
  0xf7   :  { %4844 = vst [vmem:[#allocation62_spill] sm:$0xff] %v3427_v37  ;;  %v3431_v30 = vpop.xlane.xlu0 %286  ;;  %2367 = vpow2.f32 %v467_v42 }
  0xf8   :  { %4845 = vst [vmem:[#allocation63_spill] sm:$0xff] %v3429_v10  ;;  %2369 = vpow2.f32 %v477_v49 }
  0xf9   :  { %4846 = vst [vmem:[#allocation64_spill] sm:$0xff] %v3431_v30  ;;  %2371 = vpow2.f32 %v475_v44  ;;  %v479_v44 = vmul.f32 1.442695, %v374_v54 }
  0xfa   :  { %2373 = vpow2.f32 %v473_v13 }
  0xfb   :  { %619 = vadd.xlane.f32.xlu2 %v618_v55  ;;  %616 = vadd.xlane.f32.xlu1 %v615_v46  ;;  %v627_v55 = vsel %vm140_vm0, %v2358_v21, 0.0  ;;  %v624_v46 = vsel %vm140_vm0, %v2360_v59, 0.0  ;;  %v2364_v9 = vpop.eup %2363  ;;  %v4856_v21 = vld [vmem:[#allocation10_spill] sm:$0xff] }
  0xfc   :  { %613 = vadd.xlane.f32.xlu0 %v612_v48  ;;  %v621_v48 = vsel %vm140_vm0, %v2362_v5, 0.0  ;;  %v2366_v42 = vpop.eup %2365  ;;  %v376_v59 = vsub.f32 %v4856_v21, %v3399_v56  ;;  %v4857_v5 = vld [vmem:[#allocation11_spill] sm:$0xff] }
  0xfd   :  { %v2368_v57 = vpop.eup %2367  ;;  %v375_v58 = vsub.f32 %v4857_v5, %v3401_v18 }
  0xfe   :  { %v3442_v43 = vpop.xlane.xlu2 %301  ;;  %v3444_v22 = vpop.xlane.xlu1 %298  ;;  %v483_v49 = vmul.f32 1.442695, %v376_v59 }
  0xff   :  { %4847 = vst [vmem:[#allocation65_spill] sm:$0xff] %v3442_v43  ;;  %v3446_v36 = vpop.xlane.xlu0 %295  ;;  %v481_v34 = vmul.f32 1.442695, %v375_v58  ;;  %v2370_v21 = vpop.eup %2369  ;;  %v4864_v58 = vld [vmem:[#allocation9_spill] sm:$0xff] }
 0x100   :  { %4848 = vst [vmem:[#allocation66_spill] sm:$0xff] %v3444_v22  ;;  %v2372_v13 = vpop.eup %2371  ;;  %2375 = vpow2.f32 %v483_v49  ;;  %v377_v54 = vsub.f32 %v4864_v58, %v3397_v25 }
 0x101   :  { %4849 = vst [vmem:[#allocation67_spill] sm:$0xff] %v3446_v36  ;;  %v2374_v61 = vpop.eup %2373  ;;  %2377 = vpow2.f32 %v481_v34 }
 0x102   :  { %2379 = vpow2.f32 %v479_v44  ;;  %v485_v34 = vmul.f32 1.442695, %v377_v54 }
 0x103   :  { %628 = vadd.xlane.f32.xlu2 %v627_v55  ;;  %625 = vadd.xlane.f32.xlu1 %v624_v46  ;;  %v636_v55 = vsel %vm140_vm0, %v2364_v9, 0.0  ;;  %v633_v46 = vsel %vm140_vm0, %v2366_v42, 0.0  ;;  %v4862_v9 = vld [vmem:[#allocation13_spill] sm:$0xff] }
 0x104   :  { %622 = vadd.xlane.f32.xlu0 %v621_v48  ;;  %v630_v48 = vsel %vm140_vm0, %v2368_v57, 0.0  ;;  %v379_v42 = vsub.f32 %v4862_v9, %v3414_v62  ;;  %v4863_v57 = vld [vmem:[#allocation16_spill] sm:$0xff] }
 0x105   :  { %v378_v59 = vsub.f32 %v4863_v57, %v3416_v24 }
 0x106   :  { %v3457_v50 = vpop.xlane.xlu2 %310  ;;  %v3459_v60 = vpop.xlane.xlu1 %307  ;;  %v489_v49 = vmul.f32 1.442695, %v379_v42 }
 0x107   :  { %4853 = vst [vmem:[#allocation7_spill] sm:$0xff] %v3457_v50  ;;  %v3461_v12 = vpop.xlane.xlu0 %304  ;;  %v487_v19 = vmul.f32 1.442695, %v378_v59  ;;  %v2376_v9 = vpop.eup %2375  ;;  %v4870_v59 = vld [vmem:[#allocation12_spill] sm:$0xff] }
 0x108   :  { %4854 = vst [vmem:[#allocation8_spill] sm:$0xff] %v3459_v60  ;;  %v2378_v44 = vpop.eup %2377  ;;  %2381 = vpow2.f32 %v489_v49  ;;  %v380_v54 = vsub.f32 %v4870_v59, %v3412_v31 }
 0x109   :  { %4855 = vst [vmem:[#allocation5_spill] sm:$0xff] %v3461_v12  ;;  %v2380_v58 = vpop.eup %2379  ;;  %2383 = vpow2.f32 %v487_v19 }
 0x10a   :  { %2385 = vpow2.f32 %v485_v34  ;;  %v491_v19 = vmul.f32 1.442695, %v380_v54 }
 0x10b   :  { %637 = vadd.xlane.f32.xlu2 %v636_v55  ;;  %634 = vadd.xlane.f32.xlu1 %v633_v46  ;;  %v645_v55 = vsel %vm140_vm0, %v2370_v21, 0.0  ;;  %v642_v46 = vsel %vm140_vm0, %v2372_v13, 0.0  ;;  %v4868_v21 = vld [vmem:[#allocation19_spill] sm:$0xff] }
 0x10c   :  { %631 = vadd.xlane.f32.xlu0 %v630_v48  ;;  %v639_v48 = vsel %vm140_vm0, %v2374_v61, 0.0  ;;  %v382_v13 = vsub.f32 %v4868_v21, %v3429_v10  ;;  %v4869_v61 = vld [vmem:[#allocation21_spill] sm:$0xff] }
 0x10d   :  { %v381_v42 = vsub.f32 %v4869_v61, %v3431_v30 }
 0x10e   :  { %v3472_v56 = vpop.xlane.xlu2 %319  ;;  %v3474_v5 = vpop.xlane.xlu1 %316  ;;  %v495_v49 = vmul.f32 1.442695, %v382_v13 }
 0x10f   :  { %4859 = vst [vmem:[#allocation10_spill] sm:$0xff] %v3472_v56  ;;  %v3476_v18 = vpop.xlane.xlu0 %313  ;;  %v493_v25 = vmul.f32 1.442695, %v381_v42  ;;  %v2382_v21 = vpop.eup %2381  ;;  %v4874_v42 = vld [vmem:[#allocation18_spill] sm:$0xff] }
 0x110   :  { %4860 = vst [vmem:[#allocation11_spill] sm:$0xff] %v3474_v5  ;;  %v2384_v34 = vpop.eup %2383  ;;  %2387 = vpow2.f32 %v495_v49  ;;  %v383_v54 = vsub.f32 %v4874_v42, %v3427_v37 }
 0x111   :  { %4861 = vst [vmem:[#allocation6_spill] sm:$0xff] %v3476_v18  ;;  %v2386_v59 = vpop.eup %2385  ;;  %2389 = vpow2.f32 %v493_v25 }
 0x112   :  { %2391 = vpow2.f32 %v491_v19  ;;  %v497_v25 = vmul.f32 1.442695, %v383_v54 }
 0x113   :  { %646 = vadd.xlane.f32.xlu2 %v645_v55  ;;  %643 = vadd.xlane.f32.xlu1 %v642_v46  ;;  %v654_v55 = vsel %vm140_vm0, %v2376_v9, 0.0  ;;  %v651_v46 = vsel %vm140_vm0, %v2378_v44, 0.0  ;;  %v4872_v9 = vld [vmem:[#allocation24_spill] sm:$0xff] }
 0x114   :  { %640 = vadd.xlane.f32.xlu0 %v639_v48  ;;  %v648_v48 = vsel %vm140_vm0, %v2380_v58, 0.0  ;;  %v385_v44 = vsub.f32 %v4872_v9, %v3444_v22  ;;  %v4873_v58 = vld [vmem:[#allocation26_spill] sm:$0xff] }
 0x115   :  { %v384_v13 = vsub.f32 %v4873_v58, %v3446_v36 }
 0x116   :  { %v3487_v62 = vpop.xlane.xlu2 %328  ;;  %v3489_v57 = vpop.xlane.xlu1 %325  ;;  %v501_v49 = vmul.f32 1.442695, %v385_v44 }
 0x117   :  { %4865 = vst [vmem:[#allocation13_spill] sm:$0xff] %v3487_v62  ;;  %v3491_v24 = vpop.xlane.xlu0 %322  ;;  %v499_v31 = vmul.f32 1.442695, %v384_v13  ;;  %v2388_v9 = vpop.eup %2387  ;;  %v4877_v13 = vld [vmem:[#allocation23_spill] sm:$0xff] }
 0x118   :  { %4866 = vst [vmem:[#allocation16_spill] sm:$0xff] %v3489_v57  ;;  %v2390_v19 = vpop.eup %2389  ;;  %2393 = vpow2.f32 %v501_v49  ;;  %v386_v54 = vsub.f32 %v4877_v13, %v3442_v43 }
 0x119   :  { %4867 = vst [vmem:[#allocation9_spill] sm:$0xff] %v3491_v24  ;;  %v2392_v42 = vpop.eup %2391  ;;  %2395 = vpow2.f32 %v499_v31 }
 0x11a   :  { %2397 = vpow2.f32 %v497_v25  ;;  %v503_v31 = vmul.f32 1.442695, %v386_v54 }
 0x11b   :  { %655 = vadd.xlane.f32.xlu2 %v654_v55  ;;  %652 = vadd.xlane.f32.xlu1 %v651_v46  ;;  %v663_v55 = vsel %vm140_vm0, %v2382_v21, 0.0  ;;  %v660_v46 = vsel %vm140_vm0, %v2384_v34, 0.0  ;;  %v4875_v21 = vld [vmem:[#allocation29_spill] sm:$0xff] }
 0x11c   :  { %649 = vadd.xlane.f32.xlu0 %v648_v48  ;;  %v657_v48 = vsel %vm140_vm0, %v2386_v59, 0.0  ;;  %v388_v34 = vsub.f32 %v4875_v21, %v3459_v60  ;;  %v4876_v59 = vld [vmem:[#allocation30_spill] sm:$0xff] }
 0x11d   :  { %v387_v44 = vsub.f32 %v4876_v59, %v3461_v12 }
 0x11e   :  { %v3502_v10 = vpop.xlane.xlu1 %526  ;;  %v3504_v61 = vpop.xlane.xlu2 %529  ;;  %v507_v49 = vmul.f32 1.442695, %v388_v34 }
 0x11f   :  { %v3506_v30 = vpop.xlane.xlu0 %331  ;;  %v505_v37 = vmul.f32 1.442695, %v387_v44  ;;  %v2394_v21 = vpop.eup %2393  ;;  %v4880_v44 = vld [vmem:[#allocation28_spill] sm:$0xff] }
 0x120   :  { %4871 = vst [vmem:[#allocation19_spill] sm:$0xff] %v3506_v30  ;;  %v2396_v25 = vpop.eup %2395  ;;  %2399 = vpow2.f32 %v507_v49  ;;  %v389_v54 = vsub.f32 %v4880_v44, %v3457_v50 }
 0x121   :  { %v2398_v13 = vpop.eup %2397  ;;  %2401 = vpow2.f32 %v505_v37 }
 0x122   :  { %2403 = vpow2.f32 %v503_v31  ;;  %v509_v37 = vmul.f32 1.442695, %v389_v54 }
 0x123   :  { %664 = vadd.xlane.f32.xlu2 %v663_v55  ;;  %661 = vadd.xlane.f32.xlu1 %v660_v46  ;;  %v672_v55 = vsel %vm140_vm0, %v2388_v9, 0.0  ;;  %v669_v46 = vsel %vm140_vm0, %v2390_v19, 0.0  ;;  %v4878_v9 = vld [vmem:[#allocation32_spill] sm:$0xff] }
 0x124   :  { %658 = vadd.xlane.f32.xlu0 %v657_v48  ;;  %v666_v48 = vsel %vm140_vm0, %v2392_v42, 0.0  ;;  %v391_v19 = vsub.f32 %v4878_v9, %v3474_v5  ;;  %v4879_v42 = vld [vmem:[#allocation33_spill] sm:$0xff] }
 0x125   :  { %v390_v34 = vsub.f32 %v4879_v42, %v3476_v18 }
 0x126   :  { %v3517_v22 = vpop.xlane.xlu1 %535  ;;  %v3519_v58 = vpop.xlane.xlu2 %538  ;;  %v513_v49 = vmul.f32 1.442695, %v391_v19  ;;  %v4882_v19 = vld [vmem:[#allocation31_spill] sm:$0xff] }
 0x127   :  { %v3521_v36 = vpop.xlane.xlu0 %532  ;;  %v511_v43 = vmul.f32 1.442695, %v390_v34  ;;  %v2400_v9 = vpop.eup %2399  ;;  %v392_v34 = vsub.f32 %v4882_v19, %v3472_v56  ;;  %v78_v56 = vld [vmem:[%s4712_s1 + $0x10] sm:$0xff] }
 0x128   :  { %v2402_v31 = vpop.eup %2401  ;;  %2405 = vpow2.f32 %v513_v49  ;;  %v690_v54 = vsel %vm140_vm0, %v2400_v9, 0.0  ;;  %v396_v9 = vsub.f32 %v3278_v7, %v3506_v30 }
 0x129   :  { %v2404_v44 = vpop.eup %2403  ;;  %2407 = vpow2.f32 %v511_v43  ;;  %v515_v43 = vmul.f32 1.442695, %v392_v34 }
 0x12a   :  { %2409 = vpow2.f32 %v509_v37 }
 0x12b   :  { %673 = vadd.xlane.f32.xlu2 %v672_v55  ;;  %670 = vadd.xlane.f32.xlu1 %v669_v46  ;;  %v681_v55 = vsel %vm140_vm0, %v2394_v21, 0.0  ;;  %v678_v46 = vsel %vm140_vm0, %v2396_v25, 0.0  ;;  %v4881_v21 = vld [vmem:[#allocation35_spill] sm:$0xff] }
 0x12c   :  { %667 = vadd.xlane.f32.xlu0 %v666_v48  ;;  %v675_v48 = vsel %vm140_vm0, %v2398_v13, 0.0  ;;  %v394_v25 = vsub.f32 %v4881_v21, %v3489_v57  ;;  %v393_v13 = vsub.f32 %v3255_v23, %v3491_v24 }
 0x12e   :  { %v3532_v60 = vpop.xlane.xlu2 %547  ;;  %v3534_v59 = vpop.xlane.xlu1 %544  ;;  %v517_v49 = vmul.f32 1.442695, %v393_v13 }
 0x12f   :  { %v3536_v12 = vpop.xlane.xlu0 %541  ;;  %v2406_v21 = vpop.eup %2405 }
 0x130   :  { %v2408_v37 = vpop.eup %2407 }
 0x131   :  { %v2410_v19 = vpop.eup %2409  ;;  %v696_v13 = vsel %vm140_vm0, %v2408_v37, 0.0 }
 0x132   :  { %v693_v34 = vsel %vm140_vm0, %v2410_v19, 0.0 }
 0x133   :  { %682 = vadd.xlane.f32.xlu2 %v681_v55  ;;  %679 = vadd.xlane.f32.xlu1 %v678_v46  ;;  %v687_v55 = vsel %vm140_vm0, %v2402_v31, 0.0  ;;  %v684_v46 = vsel %vm140_vm0, %v2404_v44, 0.0  ;;  %v4883_v31 = vld [vmem:[#allocation34_spill] sm:$0xff] }
 0x134   :  { %676 = vadd.xlane.f32.xlu0 %v675_v48  ;;  %v519_v48 = vmul.f32 1.442695, %v394_v25  ;;  %v395_v44 = vsub.f32 %v4883_v31, %v3487_v62  ;;  %v699_v25 = vsel %vm140_vm0, %v2406_v21, 0.0  ;;  %v79_v62 = vld [vmem:[%s4712_s1 + $0x18] sm:$0xff] }
 0x136   :  { %v3547_v5 = vpop.xlane.xlu2 %556  ;;  %v3549_v42 = vpop.xlane.xlu1 %553  ;;  %2411 = vpow2.f32 %v519_v48  ;;  %v521_v7 = vmul.f32 1.442695, %v395_v44 }
 0x137   :  { %v3551_v18 = vpop.xlane.xlu0 %550  ;;  %2413 = vpow2.f32 %v517_v49 }
 0x138   :  { %2415 = vpow2.f32 %v515_v43 }
 0x13b   :  { %691 = vadd.xlane.f32.xlu2 %v690_v54  ;;  %688 = vadd.xlane.f32.xlu1 %v687_v55  ;;  %v2767_v54 = vmov 0   ;;  %v523_v55 = vmul.f32 1.442695, %v396_v9 }
 0x13c   :  { %685 = vadd.xlane.f32.xlu0 %v684_v46  ;;  %2290 = vset.pattern.permute.xlu2 %v2767_v54  ;;  %v2412_v46 = vpop.eup %2411 }
 0x13d   :  { %2291 = vset.pattern.permute.xlu0 %v2767_v54  ;;  %2292 = vset.pattern.permute.xlu1 %v2767_v54  ;;  %v2414_v43 = vpop.eup %2413  ;;  %2417 = vpow2.f32 %v523_v55  ;;  %v708_v19 = vsel %vm140_vm0, %v2412_v46, 0.0 }
 0x13e   :  { %v3562_v57 = vpop.xlane.xlu2 %565  ;;  %v3564_v23 = vpop.xlane.xlu1 %562  ;;  %2419 = vpow2.f32 %v521_v7  ;;  %v705_v31 = vsel %vm140_vm0, %v2414_v43, 0.0 }
 0x13f   :  { %v3566_v24 = vpop.xlane.xlu0 %559  ;;  %v2416_v37 = vpop.eup %2415  ;;  %2421 = vlog2.f32 %v3502_v10 }
 0x140   :  { %v702_v9 = vsel %vm140_vm0, %v2416_v37, 0.0  ;;  %2423 = vlog2.f32 %v3504_v61 }
 0x141   :  { %2425 = vlog2.f32 %v3517_v22 }
 0x142   :  { %2427 = vlog2.f32 %v3519_v58 }
 0x143   :  { %700 = vadd.xlane.f32.xlu2 %v699_v25  ;;  %697 = vadd.xlane.f32.xlu1 %v696_v13  ;;  %v2418_v13 = vpop.eup %2417  ;;  %2429 = vlog2.f32 %v3521_v36  ;;  %v4918_v36 = vld [vmem:[#allocation17_spill] sm:$0xff] }
 0x144   :  { %694 = vadd.xlane.f32.xlu0 %v693_v34  ;;  %v2420_v54 = vpop.eup %2419  ;;  %v714_v55 = vsel %vm140_vm0, %v2418_v13, 0.0  ;;  %v76_v13 = vld [vmem:[%s4712_s1] sm:$0xff]  ;;  %2431 = vlog2.f32 %v3532_v60 }
 0x145   :  { %v711_v7 = vsel %vm140_vm0, %v2420_v54, 0.0  ;;  %v77_v54 = vld [vmem:[%s4712_s1 + $0x8] sm:$0xff]  ;;  %2433 = vlog2.f32 %v3534_v59 }
 0x146   :  { %v3575_v48 = vpop.xlane.xlu2 %574  ;;  %v3577_v49 = vpop.xlane.xlu1 %571  ;;  %2435 = vlog2.f32 %v3536_v12 }
 0x147   :  { %v3579_v21 = vpop.xlane.xlu0 %568  ;;  %2437 = vlog2.f32 %v3547_v5 }
 0x148   :  { %2439 = vlog2.f32 %v3549_v42 }
 0x149   :  { %2441 = vlog2.f32 %v3551_v18  ;;  %v117_v18 = vld [vmem:[%s4712_s1 + $0x148] sm:$0xff] }
 0x14a   :  { %2443 = vlog2.f32 %v3562_v57 }
 0x14b   :  { %709 = vadd.xlane.f32.xlu2 %v708_v19  ;;  %706 = vadd.xlane.f32.xlu1 %v705_v31  ;;  %2445 = vlog2.f32 %v3564_v23 }
 0x14c   :  { %703 = vadd.xlane.f32.xlu0 %v702_v9  ;;  %2447 = vlog2.f32 %v3566_v24  ;;  %v4919_v24 = vld [vmem:[#allocation14_spill] sm:$0xff] }
 0x14d   :  { %2449 = vlog2.f32 %v3575_v48 }
 0x14e   :  { %v3584_v44 = vpop.xlane.xlu2 %583  ;;  %v3586_v25 = vpop.xlane.xlu1 %580 }
 0x14f   :  { %v3588_v34 = vpop.xlane.xlu0 %577 }
 0x153   :  { %715 = vadd.xlane.f32.xlu1 %v714_v55 }
 0x154   :  { %712 = vadd.xlane.f32.xlu0 %v711_v7 }
 0x156   :  { %v3592_v46 = vpop.xlane.xlu2 %592  ;;  %v3594_v43 = vpop.xlane.xlu1 %589 }
 0x157   :  { %v3596_v37 = vpop.xlane.xlu0 %586 }
 0x15e   :  { %v3598_v19 = vpop.xlane.xlu2 %601  ;;  %v3600_v31 = vpop.xlane.xlu1 %598 }
 0x15f   :  { %v3602_v9 = vpop.xlane.xlu0 %595 }
 0x163   :  { %848 = vperm.xlu2 %2290, %v76_v13   ;;  %v84_v13 = vld [vmem:[%s4712_s1 + $0x40] sm:$0xff] }
 0x166   :  { %v3610_v55 = vpop.xlane.xlu2 %610  ;;  %v3612_v7 = vpop.xlane.xlu1 %607 }
 0x167   :  { %v3614_v30 = vpop.xlane.xlu0 %604 }
 0x168   :  { %851 = vperm.xlu0 %2291, %v77_v54   ;;  %v80_v54 = vld [vmem:[%s4712_s1 + $0x20] sm:$0xff] }
 0x16b   :  { %857 = vperm.xlu2 %2290, %v79_v62   ;;  %v81_v62 = vld [vmem:[%s4712_s1 + $0x28] sm:$0xff] }
 0x16c   :  { %854 = vperm.xlu1 %2292, %v78_v56   ;;  %v87_v56 = vld [vmem:[%s4712_s1 + $0x58] sm:$0xff] }
 0x16e   :  { %v3625_v50 = vpop.xlane.xlu2 %619  ;;  %v3627_v47 = vpop.xlane.xlu1 %616 }
 0x16f   :  { %4884 = vst [vmem:[#allocation21_spill] sm:$0xff] %v3627_v47  ;;  %v3629_v39 = vpop.xlane.xlu0 %613 }
 0x170   :  { %4885 = vst [vmem:[#allocation12_spill] sm:$0xff] %v3629_v39  ;;  %872 = vperm.xlu0 %2291, %v84_v13   ;;  %v82_v13 = vld [vmem:[%s4712_s1 + $0x30] sm:$0xff] }
 0x173   :  { %860 = vperm.xlu2 %2290, %v80_v54   ;;  %v83_v54 = vld [vmem:[%s4712_s1 + $0x38] sm:$0xff] }
 0x174   :  { %863 = vperm.xlu1 %2292, %v81_v62   ;;  %v90_v62 = vld [vmem:[%s4712_s1 + $0x70] sm:$0xff] }
 0x176   :  { %v3640_v0 = vpop.xlane.xlu2 %628  ;;  %v3642_v6 = vpop.xlane.xlu1 %625 }
 0x177   :  { %4886 = vst [vmem:[#allocation24_spill] sm:$0xff] %v3640_v0  ;;  %v3644_v38 = vpop.xlane.xlu0 %622 }
 0x178   :  { %4887 = vst [vmem:[#allocation26_spill] sm:$0xff] %v3642_v6  ;;  %881 = vperm.xlu0 %2291, %v87_v56   ;;  %v85_v56 = vld [vmem:[%s4712_s1 + $0x48] sm:$0xff] }
 0x179   :  { %4888 = vst [vmem:[#allocation18_spill] sm:$0xff] %v3644_v38 }
 0x17b   :  { %866 = vperm.xlu2 %2290, %v82_v13   ;;  %v86_v13 = vld [vmem:[%s4712_s1 + $0x50] sm:$0xff] }
 0x17c   :  { %869 = vperm.xlu1 %2292, %v83_v54   ;;  %v93_v54 = vld [vmem:[%s4712_s1 + $0x88] sm:$0xff] }
 0x17e   :  { %v3655_v16 = vpop.xlane.xlu2 %637  ;;  %v3657_v6 = vpop.xlane.xlu1 %634 }
 0x17f   :  { %4889 = vst [vmem:[#allocation29_spill] sm:$0xff] %v3655_v16  ;;  %v3659_v1 = vpop.xlane.xlu0 %631 }
 0x180   :  { %4890 = vst [vmem:[#allocation30_spill] sm:$0xff] %v3657_v6  ;;  %890 = vperm.xlu0 %2291, %v90_v62   ;;  %v88_v62 = vld [vmem:[%s4712_s1 + $0x60] sm:$0xff] }
 0x181   :  { %4891 = vst [vmem:[#allocation23_spill] sm:$0xff] %v3659_v1 }
 0x183   :  { %875 = vperm.xlu2 %2290, %v85_v56   ;;  %v89_v56 = vld [vmem:[%s4712_s1 + $0x68] sm:$0xff] }
 0x184   :  { %878 = vperm.xlu1 %2292, %v86_v13   ;;  %v96_v13 = vld [vmem:[%s4712_s1 + $0xa0] sm:$0xff] }
 0x186   :  { %v3670_v16 = vpop.xlane.xlu2 %646  ;;  %v3672_v6 = vpop.xlane.xlu1 %643 }
 0x187   :  { %4892 = vst [vmem:[#allocation32_spill] sm:$0xff] %v3670_v16  ;;  %v3674_v1 = vpop.xlane.xlu0 %640 }
 0x188   :  { %4893 = vst [vmem:[#allocation33_spill] sm:$0xff] %v3672_v6  ;;  %899 = vperm.xlu0 %2291, %v93_v54   ;;  %v91_v54 = vld [vmem:[%s4712_s1 + $0x78] sm:$0xff] }
 0x189   :  { %4894 = vst [vmem:[#allocation28_spill] sm:$0xff] %v3674_v1 }
 0x18b   :  { %884 = vperm.xlu2 %2290, %v88_v62   ;;  %v92_v62 = vld [vmem:[%s4712_s1 + $0x80] sm:$0xff] }
 0x18c   :  { %887 = vperm.xlu1 %2292, %v89_v56   ;;  %v99_v56 = vld [vmem:[%s4712_s1 + $0xb8] sm:$0xff] }
 0x18e   :  { %v3685_v16 = vpop.xlane.xlu2 %655  ;;  %v3689_v1 = vpop.xlane.xlu1 %652 }
 0x18f   :  { %4895 = vst [vmem:[#allocation35_spill] sm:$0xff] %v3685_v16  ;;  %v3687_v6 = vpop.xlane.xlu0 %649 }
 0x190   :  { %4896 = vst [vmem:[#allocation31_spill] sm:$0xff] %v3687_v6  ;;  %908 = vperm.xlu0 %2291, %v96_v13   ;;  %v94_v13 = vld [vmem:[%s4712_s1 + $0x90] sm:$0xff] }
 0x191   :  { %4897 = vst [vmem:[#allocation34_spill] sm:$0xff] %v3689_v1  ;;  %v95_v1 = vld [vmem:[%s4712_s1 + $0x98] sm:$0xff] }
 0x193   :  { %893 = vperm.xlu2 %2290, %v91_v54   ;;  %v102_v54 = vld [vmem:[%s4712_s1 + $0xd0] sm:$0xff] }
 0x194   :  { %896 = vperm.xlu1 %2292, %v92_v62  }
 0x196   :  { %v3700_v16 = vpop.xlane.xlu2 %664  ;;  %v3710_v32 = vpop.xlane.xlu1 %661 }
 0x197   :  { %4898 = vst [vmem:[#allocation68_spill] sm:$0xff] %v3700_v16  ;;  %v3702_v6 = vpop.xlane.xlu0 %658 }
 0x198   :  { %4899 = vst [vmem:[#allocation69_spill] sm:$0xff] %v3702_v6  ;;  %917 = vperm.xlu0 %2291, %v99_v56   ;;  %v97_v56 = vld [vmem:[%s4712_s1 + $0xa8] sm:$0xff]  ;;  %v98_v6 = vld [vmem:[%s4712_s1 + $0xb0] sm:$0xff] }
 0x199   :  { %4900 = vst [vmem:[#allocation70_spill] sm:$0xff] %v3710_v32 }
 0x19b   :  { %902 = vperm.xlu2 %2290, %v94_v13  }
 0x19c   :  { %905 = vperm.xlu1 %2292, %v95_v1   ;;  %v105_v1 = vld [vmem:[%s4712_s1 + $0xe8] sm:$0xff] }
 0x19e   :  { %v3715_v62 = vpop.xlane.xlu2 %673  ;;  %v3725_v13 = vpop.xlane.xlu1 %670 }
 0x19f   :  { %4901 = vst [vmem:[#allocation71_spill] sm:$0xff] %v3715_v62  ;;  %v3717_v16 = vpop.xlane.xlu0 %667 }
 0x1a0   :  { %4902 = vst [vmem:[#allocation72_spill] sm:$0xff] %v3717_v16  ;;  %926 = vperm.xlu0 %2291, %v102_v54   ;;  %v100_v54 = vld [vmem:[%s4712_s1 + $0xc0] sm:$0xff]  ;;  %v101_v16 = vld [vmem:[%s4712_s1 + $0xc8] sm:$0xff] }
 0x1a1   :  { %4903 = vst [vmem:[#allocation73_spill] sm:$0xff] %v3725_v13  ;;  %v104_v13 = vld [vmem:[%s4712_s1 + $0xe0] sm:$0xff] }
 0x1a3   :  { %911 = vperm.xlu2 %2290, %v97_v56  }
 0x1a4   :  { %914 = vperm.xlu1 %2292, %v98_v6   ;;  %v108_v6 = vld [vmem:[%s4712_s1 + $0x100] sm:$0xff] }
 0x1a6   :  { %v3730_v62 = vpop.xlane.xlu2 %682  ;;  %v3743_v56 = vpop.xlane.xlu1 %679 }
 0x1a7   :  { %4904 = vst [vmem:[#allocation74_spill] sm:$0xff] %v3730_v62  ;;  %v3738_v32 = vpop.xlane.xlu0 %676 }
 0x1a8   :  { %935 = vperm.xlu0 %2291, %v105_v1   ;;  %4905 = vst [vmem:[#allocation75_spill] sm:$0xff] %v3738_v32  ;;  %v103_v1 = vld [vmem:[%s4712_s1 + $0xd8] sm:$0xff] }
 0x1a9   :  { %4906 = vst [vmem:[#allocation76_spill] sm:$0xff] %v3743_v56 }
 0x1ab   :  { %920 = vperm.xlu2 %2290, %v100_v54  }
 0x1ac   :  { %923 = vperm.xlu1 %2292, %v101_v16   ;;  %v111_v16 = vld [vmem:[%s4712_s1 + $0x118] sm:$0xff] }
 0x1ae   :  { %v3745_v62 = vpop.xlane.xlu2 %691 }
 0x1af   :  { %4907 = vst [vmem:[#allocation77_spill] sm:$0xff] %v3745_v62  ;;  %v3753_v54 = vpop.xlane.xlu0 %685  ;;  %v3760_v62 = vpop.xlane.xlu1 %688 }
 0x1b0   :  { %944 = vperm.xlu0 %2291, %v108_v6   ;;  %4908 = vst [vmem:[#allocation78_spill] sm:$0xff] %v3753_v54  ;;  %v106_v6 = vld [vmem:[%s4712_s1 + $0xf0] sm:$0xff] }
 0x1b1   :  { %4910 = vst [vmem:[#allocation80_spill] sm:$0xff] %v3760_v62  ;;  %v110_v62 = vld [vmem:[%s4712_s1 + $0x110] sm:$0xff] }
 0x1b3   :  { %929 = vperm.xlu2 %2290, %v103_v1   ;;  %v107_v1 = vld [vmem:[%s4712_s1 + $0xf8] sm:$0xff] }
 0x1b4   :  { %932 = vperm.xlu1 %2292, %v104_v13   ;;  %v114_v13 = vld [vmem:[%s4712_s1 + $0x130] sm:$0xff] }
 0x1b6   :  { %v3758_v32 = vpop.xlane.xlu2 %700 }
 0x1b7   :  { %4909 = vst [vmem:[#allocation79_spill] sm:$0xff] %v3758_v32  ;;  %v3771_v54 = vpop.xlane.xlu0 %694  ;;  %v3781_v56 = vpop.xlane.xlu1 %697 }
 0x1b8   :  { %953 = vperm.xlu0 %2291, %v111_v16   ;;  %4911 = vst [vmem:[#allocation81_spill] sm:$0xff] %v3771_v54  ;;  %v109_v16 = vld [vmem:[%s4712_s1 + $0x108] sm:$0xff] }
 0x1b9   :  { %4913 = vst [vmem:[#allocation83_spill] sm:$0xff] %v3781_v56 }
 0x1bb   :  { %938 = vperm.xlu2 %2290, %v106_v6  }
 0x1bc   :  { %941 = vperm.xlu1 %2292, %v107_v1  }
 0x1be   :  { %v3773_v32 = vpop.xlane.xlu2 %709 }
 0x1bf   :  { %4912 = vst [vmem:[#allocation82_spill] sm:$0xff] %v3773_v32  ;;  %v3783_v1 = vpop.xlane.xlu0 %703  ;;  %v112_v32 = vld [vmem:[%s4712_s1 + $0x120] sm:$0xff]  ;;  %v3791_v54 = vpop.xlane.xlu1 %706 }
 0x1c0   :  { %962 = vperm.xlu0 %2291, %v114_v13   ;;  %4914 = vst [vmem:[#allocation84_spill] sm:$0xff] %v3783_v1  ;;  %v113_v13 = vld [vmem:[%s4712_s1 + $0x128] sm:$0xff]  ;;  %v845_v1 = vlaneseq }
 0x1c1   :  { %4915 = vst [vmem:[#allocation85_spill] sm:$0xff] %v3791_v54 }
 0x1c2   :  { %v3797_v17 = vand.u32 127, %v845_v1 }
 0x1c3   :  { %947 = vperm.xlu2 %2290, %v109_v16  }
 0x1c4   :  { %950 = vperm.xlu1 %2292, %v110_v62  }
 0x1c6   :  { %v849_v6 = vpop.permute.xlu2 %848 }
 0x1c7   :  { %v3793_v0 = vpop.xlane.xlu0 %712  ;;  %v3795_v16 = vpop.xlane.xlu1 %715  ;;  %vm1039_vm1 = vcmp.eq.s32.totalorder %v3797_v17, %v849_v6  ;;  %v2678_v6 = vld [vmem:[%s4711_s0 + $0x20] sm:$0xff] }
 0x1c8   :  { %4916 = vst [vmem:[#allocation86_spill] sm:$0xff] %v3793_v0 }
 0x1c9   :  { %4917 = vst [vmem:[#allocation87_spill] sm:$0xff] %v3795_v16 }
 0x1cb   :  { %956 = vperm.xlu2 %2290, %v112_v32   ;;  %v2677_v32 = vld [vmem:[%s4711_s0] sm:$0xff] }
 0x1cc   :  { %959 = vperm.xlu1 %2292, %v113_v13   ;;  %v1103_v13 = vsel %vm1039_vm1, %v2677_v32, 0.0  ;;  %v2679_v32 = vld [vmem:[%s4711_s0 + $0x8] sm:$0xff] }
 0x1cd   :  { %v1167_v16 = vsel %vm140_vm0, %v1103_v13, 0.0 }
 0x1ce   :  { %v858_v51 = vpop.permute.xlu2 %857 }
 0x1cf   :  { %vm1042_vm6 = vcmp.eq.s32.totalorder %v3797_v17, %v858_v51 }
 0x1d6   :  { %v861_v62 = vpop.permute.xlu2 %860 }
 0x1d7   :  { %vm1043_vm2 = vcmp.eq.s32.totalorder %v3797_v17, %v861_v62 }
 0x1d8   :  { %v1107_v1 = vsel %vm1043_vm2, %v2678_v6, 0.0 }
 0x1da   :  { %v852_v56 = vpop.permute.xlu0 %851 }
 0x1db   :  { %vm1040_vm3 = vcmp.eq.s32.totalorder %v3797_v17, %v852_v56 }
 0x1dc   :  { %v1104_v15 = vsel %vm1040_vm3, %v2679_v32, 0.0  ;;  %v2681_v32 = vld [vmem:[%s4711_s0 + $0x38] sm:$0xff] }
 0x1dd   :  { %v1170_v56 = vsel %vm140_vm0, %v1104_v15, 0.0  ;;  %v2682_v15 = vld [vmem:[%s4711_s0 + $0x18] sm:$0xff] }
 0x1de   :  { %v867_v38 = vpop.permute.xlu2 %866  ;;  %v855_v40 = vpop.permute.xlu1 %854 }
 0x1df   :  { %vm1041_vm4 = vcmp.eq.s32.totalorder %v3797_v17, %v855_v40  ;;  %v1179_v40 = vsel %vm140_vm0, %v1107_v1, 0.0  ;;  %vm1045_vm9 = vcmp.eq.s32.totalorder %v3797_v17, %v867_v38  ;;  %v2686_v38 = vld [vmem:[%s4711_s0 + $0x40] sm:$0xff] }
 0x1e2   :  { %v873_v26 = vpop.permute.xlu0 %872 }
 0x1e3   :  { %vm1047_vm10 = vcmp.eq.s32.totalorder %v3797_v17, %v873_v26 }
 0x1e6   :  { %v3803_v54 = vpop.permute.xlu2 %875  ;;  %v864_v0 = vpop.permute.xlu1 %863 }
 0x1e7   :  { %vm1044_vm7 = vcmp.eq.s32.totalorder %v3797_v17, %v864_v0  ;;  %v2684_v0 = vld [vmem:[%s4711_s0 + $0x50] sm:$0xff]  ;;  %vm1048_vm12 = vcmp.eq.s32.totalorder %v3797_v17, %v3803_v54 }
 0x1ea   :  { %1168 = vadd.xlane.f32.xlu0 %v1167_v16  ;;  %v3806_v39 = vpop.permute.xlu0 %881  ;;  %v2680_v16 = vld [vmem:[%s4711_s0 + $0x10] sm:$0xff] }
 0x1eb   :  { %v1105_v62 = vsel %vm1041_vm4, %v2680_v16, 0.0  ;;  %vm1050_vm13 = vcmp.eq.s32.totalorder %v3797_v17, %v3806_v39 }
 0x1ec   :  { %v1173_v6 = vsel %vm140_vm0, %v1105_v62, 0.0  ;;  %v2683_v62 = vld [vmem:[%s4711_s0 + $0x28] sm:$0xff] }
 0x1ee   :  { %v870_v13 = vpop.permute.xlu1 %869  ;;  %v3820_v47 = vpop.permute.xlu2 %884 }
 0x1ef   :  { %vm1046_vm5 = vcmp.eq.s32.totalorder %v3797_v17, %v870_v13  ;;  %v1106_v13 = vsel %vm1042_vm6, %v2682_v15, 0.0  ;;  %vm1051_vm15 = vcmp.eq.s32.totalorder %v3797_v17, %v3820_v47 }
 0x1f0   :  { %v1110_v2 = vsel %vm1046_vm5, %v2681_v32, 0.0  ;;  %v1176_v51 = vsel %vm140_vm0, %v1106_v13, 0.0 }
 0x1f1   :  { %v1188_v1 = vsel %vm140_vm0, %v1110_v2, 0.0 }
 0x1f2   :  { %1180 = vadd.xlane.f32.xlu0 %v1179_v40  ;;  %v3829_v20 = vpop.permute.xlu0 %890  ;;  %v1108_v40 = vsel %vm1044_vm7, %v2683_v62, 0.0  ;;  %v1111_v62 = vsel %vm1047_vm10, %v2686_v38, 0.0 }
 0x1f3   :  { %v1182_v2 = vsel %vm140_vm0, %v1108_v40, 0.0  ;;  %v1191_v26 = vsel %vm140_vm0, %v1111_v62, 0.0  ;;  %vm1053_vm1 = vcmp.eq.s32.totalorder %v3797_v17, %v3829_v20 }
 0x1f4   :  { %1171 = vadd.xlane.f32.xlu2 %v1170_v56 }
 0x1f6   :  { %1174 = vadd.xlane.f32.xlu1 %v1173_v6  ;;  %v879_v16 = vpop.permute.xlu1 %878  ;;  %v3840_v32 = vpop.permute.xlu2 %893 }
 0x1f7   :  { %vm1049_vm8 = vcmp.eq.s32.totalorder %v3797_v17, %v879_v16  ;;  %v2685_v16 = vld [vmem:[%s4711_s0 + $0x30] sm:$0xff]  ;;  %vm1054_vm3 = vcmp.eq.s32.totalorder %v3797_v17, %v3840_v32  ;;  %v2695_v32 = vld [vmem:[%s4711_s0 + $0x88] sm:$0xff] }
 0x1f8   :  { %v1113_v56 = vsel %vm1049_vm8, %v2684_v0, 0.0 }
 0x1f9   :  { %v1197_v13 = vsel %vm140_vm0, %v1113_v56, 0.0 }
 0x1fa   :  { %1189 = vadd.xlane.f32.xlu0 %v1188_v1  ;;  %v900_v6 = vpop.permute.xlu0 %899  ;;  %v1109_v1 = vsel %vm1045_vm9, %v2685_v16, 0.0 }
 0x1fb   :  { %v1185_v40 = vsel %vm140_vm0, %v1109_v1, 0.0  ;;  %vm1056_vm4 = vcmp.eq.s32.totalorder %v3797_v17, %v900_v6 }
 0x1fc   :  { %1177 = vadd.xlane.f32.xlu2 %v1176_v51 }
 0x1fe   :  { %1183 = vadd.xlane.f32.xlu1 %v1182_v2  ;;  %v888_v15 = vpop.permute.xlu1 %887  ;;  %v3859_v51 = vpop.permute.xlu2 %902  ;;  %v2687_v2 = vld [vmem:[%s4711_s0 + $0x68] sm:$0xff] }
 0x1ff   :  { %vm1052_vm11 = vcmp.eq.s32.totalorder %v3797_v17, %v888_v15  ;;  %v2688_v15 = vld [vmem:[%s4711_s0 + $0x48] sm:$0xff]  ;;  %vm1057_vm6 = vcmp.eq.s32.totalorder %v3797_v17, %v3859_v51  ;;  %v2698_v51 = vld [vmem:[%s4711_s0 + $0xa0] sm:$0xff] }
 0x200   :  { %v1116_v0 = vsel %vm1052_vm11, %v2687_v2, 0.0  ;;  %v1112_v16 = vsel %vm1048_vm12, %v2688_v15, 0.0 }
 0x201   :  { %v1206_v54 = vsel %vm140_vm0, %v1116_v0, 0.0  ;;  %v1194_v62 = vsel %vm140_vm0, %v1112_v16, 0.0  ;;  %v2692_v16 = vld [vmem:[%s4711_s0 + $0x70] sm:$0xff] }
 0x202   :  { %1198 = vadd.xlane.f32.xlu0 %v1197_v13  ;;  %v909_v1 = vpop.permute.xlu0 %908  ;;  %v2689_v13 = vld [vmem:[%s4711_s0 + $0x58] sm:$0xff] }
 0x203   :  { %v1114_v38 = vsel %vm1050_vm13, %v2689_v13, 0.0  ;;  %vm1059_vm7 = vcmp.eq.s32.totalorder %v3797_v17, %v909_v1 }
 0x204   :  { %1186 = vadd.xlane.f32.xlu2 %v1185_v40  ;;  %v1200_v39 = vsel %vm140_vm0, %v1114_v38, 0.0 }
 0x206   :  { %v897_v56 = vpop.permute.xlu1 %896  ;;  %1192 = vadd.xlane.f32.xlu1 %v1191_v26  ;;  %v912_v40 = vpop.permute.xlu2 %911  ;;  %v2690_v26 = vld [vmem:[%s4711_s0 + $0x80] sm:$0xff] }
 0x207   :  { %vm1055_vm14 = vcmp.eq.s32.totalorder %v3797_v17, %v897_v56  ;;  %v2691_v56 = vld [vmem:[%s4711_s0 + $0x60] sm:$0xff]  ;;  %vm1060_vm9 = vcmp.eq.s32.totalorder %v3797_v17, %v912_v40  ;;  %v2701_v40 = vld [vmem:[%s4711_s0 + $0xb8] sm:$0xff] }
 0x208   :  { %v1119_v2 = vsel %vm1055_vm14, %v2690_v26, 0.0  ;;  %v1115_v15 = vsel %vm1051_vm15, %v2691_v56, 0.0 }
 0x209   :  { %v1215_v47 = vsel %vm140_vm0, %v1119_v2, 0.0  ;;  %v1203_v38 = vsel %vm140_vm0, %v1115_v15, 0.0  ;;  %v2694_v2 = vld [vmem:[%s4711_s0 + $0x78] sm:$0xff] }
 0x20a   :  { %1207 = vadd.xlane.f32.xlu0 %v1206_v54  ;;  %v1117_v54 = vsel %vm1053_vm1, %v2692_v16, 0.0  ;;  %v918_v13 = vpop.permute.xlu0 %917 }
 0x20b   :  { %v1209_v20 = vsel %vm140_vm0, %v1117_v54, 0.0  ;;  %vm1062_vm10 = vcmp.eq.s32.totalorder %v3797_v17, %v918_v13 }
 0x20c   :  { %1195 = vadd.xlane.f32.xlu2 %v1194_v62  ;;  %v2693_v62 = vld [vmem:[%s4711_s0 + $0x98] sm:$0xff] }
 0x20e   :  { %v906_v0 = vpop.permute.xlu1 %905  ;;  %1201 = vadd.xlane.f32.xlu1 %v1200_v39  ;;  %v921_v56 = vpop.permute.xlu2 %920 }
 0x20f   :  { %vm1058_vm2 = vcmp.eq.s32.totalorder %v3797_v17, %v906_v0  ;;  %v1118_v0 = vsel %vm1054_vm3, %v2694_v2, 0.0  ;;  %vm1063_vm12 = vcmp.eq.s32.totalorder %v3797_v17, %v921_v56  ;;  %v2704_v56 = vld [vmem:[%s4711_s0 + $0xd0] sm:$0xff] }
 0x210   :  { %v1122_v39 = vsel %vm1058_vm2, %v2693_v62, 0.0  ;;  %v1212_v16 = vsel %vm140_vm0, %v1118_v0, 0.0  ;;  %v1123_v0 = vsel %vm1059_vm7, %v2698_v51, 0.0 }
 0x211   :  { %v1224_v15 = vsel %vm140_vm0, %v1122_v39, 0.0  ;;  %v2697_v39 = vld [vmem:[%s4711_s0 + $0x90] sm:$0xff]  ;;  %v1227_v1 = vsel %vm140_vm0, %v1123_v0, 0.0  ;;  %v2702_v0 = vld [vmem:[%s4711_s0 + $0xe0] sm:$0xff] }
 0x212   :  { %1216 = vadd.xlane.f32.xlu0 %v1215_v47  ;;  %v1120_v47 = vsel %vm1056_vm4, %v2695_v32, 0.0  ;;  %v927_v54 = vpop.permute.xlu0 %926 }
 0x213   :  { %v1218_v6 = vsel %vm140_vm0, %v1120_v47, 0.0  ;;  %vm1065_vm13 = vcmp.eq.s32.totalorder %v3797_v17, %v927_v54 }
 0x214   :  { %1204 = vadd.xlane.f32.xlu2 %v1203_v38  ;;  %v2696_v38 = vld [vmem:[%s4711_s0 + $0xb0] sm:$0xff] }
 0x216   :  { %v915_v26 = vpop.permute.xlu1 %914  ;;  %1210 = vadd.xlane.f32.xlu1 %v1209_v20 }
 0x217   :  { %vm1061_vm5 = vcmp.eq.s32.totalorder %v3797_v17, %v915_v26  ;;  %v1121_v26 = vsel %vm1057_vm6, %v2697_v39, 0.0 }
 0x218   :  { %v1125_v20 = vsel %vm1061_vm5, %v2696_v38, 0.0  ;;  %v1221_v32 = vsel %vm140_vm0, %v1121_v26, 0.0  ;;  %v1126_v26 = vsel %vm1062_vm10, %v2701_v40, 0.0  ;;  %v2705_v40 = vld [vmem:[%s4711_s0 + $0x100] sm:$0xff]  ;;  %vm2130_vm10 = vcmask 7168  }
 0x219   :  { %v1233_v2 = vsel %vm140_vm0, %v1125_v20, 0.0  ;;  %v2700_v20 = vld [vmem:[%s4711_s0 + $0xa8] sm:$0xff]  ;;  %v1236_v13 = vsel %vm140_vm0, %v1126_v26, 0.0 }
 0x21a   :  { %1225 = vadd.xlane.f32.xlu0 %v1224_v15  ;;  %v930_v15 = vpop.permute.xlu2 %929  ;;  %v936_v47 = vpop.permute.xlu0 %935 }
 0x21b   :  { %vm1066_vm15 = vcmp.eq.s32.totalorder %v3797_v17, %v930_v15  ;;  %v2707_v15 = vld [vmem:[%s4711_s0 + $0xf8] sm:$0xff]  ;;  %vm1068_vm3 = vcmp.eq.s32.totalorder %v3797_v17, %v936_v47 }
 0x21c   :  { %1213 = vadd.xlane.f32.xlu2 %v1212_v16  ;;  %v2699_v16 = vld [vmem:[%s4711_s0 + $0xc8] sm:$0xff]  ;;  %v2710_v47 = vld [vmem:[%s4711_s0 + $0x118] sm:$0xff] }
 0x21e   :  { %v924_v62 = vpop.permute.xlu1 %923  ;;  %1219 = vadd.xlane.f32.xlu1 %v1218_v6 }
 0x21f   :  { %vm1064_vm8 = vcmp.eq.s32.totalorder %v3797_v17, %v924_v62  ;;  %v1124_v62 = vsel %vm1060_vm9, %v2700_v20, 0.0 }
 0x220   :  { %v1128_v6 = vsel %vm1064_vm8, %v2699_v16, 0.0  ;;  %v2703_v16 = vld [vmem:[%s4711_s0 + $0xc0] sm:$0xff] }
 0x221   :  { %v1242_v39 = vsel %vm140_vm0, %v1128_v6, 0.0  ;;  %v1127_v6 = vsel %vm1063_vm12, %v2703_v16, 0.0 }
 0x222   :  { %1234 = vadd.xlane.f32.xlu0 %v1233_v2  ;;  %v1230_v2 = vsel %vm140_vm0, %v1124_v62, 0.0  ;;  %v939_v51 = vpop.permute.xlu2 %938  ;;  %v1129_v62 = vsel %vm1065_vm13, %v2704_v56, 0.0  ;;  %v2708_v56 = vld [vmem:[%s4711_s0 + $0x110] sm:$0xff] }
 0x223   :  { %v1245_v54 = vsel %vm140_vm0, %v1129_v62, 0.0  ;;  %vm1069_vm6 = vcmp.eq.s32.totalorder %v3797_v17, %v939_v51 }
 0x224   :  { %1222 = vadd.xlane.f32.xlu2 %v1221_v32 }
 0x226   :  { %v933_v38 = vpop.permute.xlu1 %932  ;;  %1228 = vadd.xlane.f32.xlu1 %v1227_v1 }
 0x227   :  { %vm1067_vm11 = vcmp.eq.s32.totalorder %v3797_v17, %v933_v38  ;;  %v945_v38 = vpop.permute.xlu0 %944 }
 0x228   :  { %v1131_v32 = vsel %vm1067_vm11, %v2702_v0, 0.0  ;;  %vm1071_vm14 = vcmp.eq.s32.totalorder %v3797_v17, %v945_v38 }
 0x229   :  { %v1251_v20 = vsel %vm140_vm0, %v1131_v32, 0.0  ;;  %v1135_v26 = vsel %vm1071_vm14, %v2705_v40, 0.0 }
 0x22a   :  { %1243 = vadd.xlane.f32.xlu0 %v1242_v39  ;;  %v1239_v39 = vsel %vm140_vm0, %v1127_v6, 0.0  ;;  %v1263_v16 = vsel %vm140_vm0, %v1135_v26, 0.0 }
 0x22c   :  { %1231 = vadd.xlane.f32.xlu2 %v1230_v2  ;;  %v948_v2 = vpop.permute.xlu2 %947 }
 0x22d   :  { %vm1072_vm8 = vcmp.eq.s32.totalorder %v3797_v17, %v948_v2  ;;  %v2715_v2 = vld [vmem:[%s4711_s0 + $0x128] sm:$0xff] }
 0x22e   :  { %v942_v1 = vpop.permute.xlu1 %941  ;;  %1237 = vadd.xlane.f32.xlu1 %v1236_v13  ;;  %v2706_v13 = vld [vmem:[%s4711_s0 + $0xd8] sm:$0xff] }
 0x22f   :  { %vm1070_vm1 = vcmp.eq.s32.totalorder %v3797_v17, %v942_v1  ;;  %v1130_v0 = vsel %vm1066_vm15, %v2706_v13, 0.0 }
 0x230   :  { %v1134_v6 = vsel %vm1070_vm1, %v2707_v15, 0.0  ;;  %v1248_v38 = vsel %vm140_vm0, %v1130_v0, 0.0 }
 0x231   :  { %v1260_v1 = vsel %vm140_vm0, %v1134_v6, 0.0  ;;  %v2712_v6 = vld [vmem:[%s4711_s0 + $0xf0] sm:$0xff] }
 0x232   :  { %1252 = vadd.xlane.f32.xlu0 %v1251_v20  ;;  %v954_v20 = vpop.permute.xlu0 %953 }
 0x233   :  { %vm1074_vm4 = vcmp.eq.s32.totalorder %v3797_v17, %v954_v20 }
 0x234   :  { %1240 = vadd.xlane.f32.xlu2 %v1239_v39  ;;  %v2709_v39 = vld [vmem:[%s4711_s0 + $0xe8] sm:$0xff]  ;;  %v957_v40 = vpop.permute.xlu2 %956  ;;  %v1138_v13 = vsel %vm1074_vm4, %v2710_v47, 0.0 }
 0x235   :  { %vm1075_vm5 = vcmp.eq.s32.totalorder %v3797_v17, %v957_v40 }
 0x236   :  { %1246 = vadd.xlane.f32.xlu1 %v1245_v54  ;;  %v951_v32 = vpop.permute.xlu1 %950  ;;  %v1132_v54 = vsel %vm1068_vm3, %v2709_v39, 0.0  ;;  %v2714_v39 = vld [vmem:[%s4711_s0 + $0x108] sm:$0xff] }
 0x237   :  { %vm1073_vm2 = vcmp.eq.s32.totalorder %v3797_v17, %v951_v32  ;;  %v1254_v0 = vsel %vm140_vm0, %v1132_v54, 0.0  ;;  %v1272_v32 = vsel %vm140_vm0, %v1138_v13, 0.0  ;;  %v1136_v54 = vsel %vm1072_vm8, %v2714_v39, 0.0 }
 0x238   :  { %v1137_v62 = vsel %vm1073_vm2, %v2708_v56, 0.0  ;;  %v2713_v56 = vld [vmem:[%s4711_s0 + $0x130] sm:$0xff]  ;;  %v1266_v47 = vsel %vm140_vm0, %v1136_v54, 0.0 }
 0x239   :  { %v1269_v26 = vsel %vm140_vm0, %v1137_v62, 0.0 }
 0x23a   :  { %1264 = vadd.xlane.f32.xlu0 %v1263_v16  ;;  %v2711_v16 = vld [vmem:[%s4711_s0 + $0x120] sm:$0xff]  ;;  %v963_v20 = vpop.permute.xlu0 %962 }
 0x23b   :  { %v1139_v15 = vsel %vm1075_vm5, %v2711_v16, 0.0  ;;  %vm1077_vm7 = vcmp.eq.s32.totalorder %v3797_v17, %v963_v20 }
 0x23c   :  { %1249 = vadd.xlane.f32.xlu2 %v1248_v38  ;;  %v1133_v38 = vsel %vm1069_vm6, %v2712_v6, 0.0  ;;  %v1141_v62 = vsel %vm1077_vm7, %v2713_v56, 0.0 }
 0x23d   :  { %v1257_v51 = vsel %vm140_vm0, %v1133_v38, 0.0  ;;  %v1281_v40 = vsel %vm140_vm0, %v1141_v62, 0.0 }
 0x23e   :  { %1261 = vadd.xlane.f32.xlu1 %v1260_v1  ;;  %v1275_v1 = vsel %vm140_vm0, %v1139_v15, 0.0 }
 0x242   :  { %1270 = vadd.xlane.f32.xlu0 %v1269_v26  ;;  %v960_v26 = vpop.permute.xlu1 %959 }
 0x243   :  { %vm1076_vm9 = vcmp.eq.s32.totalorder %v3797_v17, %v960_v26  ;;  %v4920_v26 = vld [vmem:[#allocation22_spill] sm:$0xff] }
 0x244   :  { %1255 = vadd.xlane.f32.xlu2 %v1254_v0  ;;  %v1140_v13 = vsel %vm1076_vm9, %v2715_v2, 0.0  ;;  %v2422_v0 = vpop.eup %2421 }
 0x245   :  { %v1278_v10 = vsel %vm140_vm0, %v1140_v13, 0.0  ;;  %v718_v16 = vmul.f32 0.6931472, %v2422_v0 }
 0x246   :  { %1273 = vadd.xlane.f32.xlu1 %v1272_v32  ;;  %v2424_v32 = vpop.eup %2423 }
 0x247   :  { %v2426_v22 = vpop.eup %2425  ;;  %v720_v54 = vmul.f32 0.6931472, %v2424_v32  ;;  %v4921_v32 = vld [vmem:[#allocation15_spill] sm:$0xff] }
 0x248   :  { %v2428_v58 = vpop.eup %2427  ;;  %v724_v2 = vmul.f32 0.6931472, %v2426_v22 }
 0x249   :  { %v2430_v60 = vpop.eup %2429  ;;  %v726_v23 = vmul.f32 0.6931472, %v2428_v58 }
 0x24a   :  { %1276 = vadd.xlane.f32.xlu0 %v1275_v1  ;;  %v2432_v59 = vpop.eup %2431  ;;  %v722_v13 = vmul.f32 0.6931472, %v2430_v60 }
 0x24b   :  { %v2434_v12 = vpop.eup %2433  ;;  %v732_v0 = vmul.f32 0.6931472, %v2432_v59 }
 0x24c   :  { %1258 = vadd.xlane.f32.xlu2 %v1257_v51  ;;  %v2436_v38 = vpop.eup %2435 }
 0x24d   :  { %v2438_v20 = vpop.eup %2437 }
 0x24e   :  { %v2440_v42 = vpop.eup %2439 }
 0x24f   :  { %v2442_v57 = vpop.eup %2441 }
 0x250   :  { %v2444_v51 = vpop.eup %2443 }
 0x251   :  { %v2446_v62 = vpop.eup %2445 }
 0x252   :  { %1282 = vadd.xlane.f32.xlu0 %v1281_v40  ;;  %v2448_v39 = vpop.eup %2447 }
 0x254   :  { %1267 = vadd.xlane.f32.xlu2 %v1266_v47  ;;  %v2450_v47 = vpop.eup %2449 }
 0x25c   :  { %1279 = vadd.xlane.f32.xlu2 %v1278_v10 }
 0x25d   :  { %v1169_v61 = vpop.xlane.xlu0 %1168 }
 0x25e   :  { %v1359_v15 = vsub.f32 %v1169_v61, %v4918_v36  ;;  %v728_v36 = vmul.f32 0.6931472, %v2436_v38 }
 0x260   :  { %v4025_v6 = vsub.f32 %v1359_v15, %v718_v16  ;;  %v4048_v16 = vmul.f32 0.6931472, %v2434_v12  ;;  %v4060_v12 = vmul.f32 0.6931472, %v2442_v57 }
 0x262   :  { %v1487_v5 = vmul.f32 1.442695, %v4025_v6 }
 0x264   :  { %2451 = vpow2.f32 %v1487_v5  ;;  %v738_v5 = vmul.f32 0.6931472, %v2438_v20  ;;  %v4070_v20 = vmul.f32 0.6931472, %v2450_v47 }
 0x265   :  { %2453 = vlog2.f32 %v3577_v49  ;;  %v1181_v1 = vpop.xlane.xlu0 %1180 }
 0x266   :  { %2455 = vlog2.f32 %v3579_v21  ;;  %v1363_v56 = vsub.f32 %v1181_v1, %v4919_v24  ;;  %971 = vperm.xlu0 %2291, %v117_v18   ;;  %v4058_v18 = vmul.f32 0.6931472, %v2440_v42  ;;  %v4062_v1 = vmul.f32 0.6931472, %v2444_v51  ;;  %v4923_v51 = vld [vmem:[#allocation20_spill] sm:$0xff] }
 0x267   :  { %2457 = vlog2.f32 %v3584_v44  ;;  %v1172_v48 = vpop.xlane.xlu2 %1171 }
 0x268   :  { %2459 = vlog2.f32 %v3586_v25  ;;  %v4039_v40 = vsub.f32 %v1363_v56, %v726_v23  ;;  %v1360_v49 = vsub.f32 %v1172_v48, %v4920_v26  ;;  %v4066_v48 = vmul.f32 0.6931472, %v2446_v62  ;;  %v115_v62 = vld [vmem:[%s4712_s1 + $0x138] sm:$0xff] }
 0x269   :  { %2461 = vlog2.f32 %v3588_v34  ;;  %v1175_v21 = vpop.xlane.xlu1 %1174  ;;  %v120_v34 = vld [vmem:[%s4712_s1 + $0x160] sm:$0xff] }
 0x26a   :  { %v2452_v10 = vpop.eup %2451  ;;  %2463 = vlog2.f32 %v3592_v46  ;;  %v1495_v44 = vmul.f32 1.442695, %v4039_v40  ;;  %v4045_v61 = vsub.f32 %v1360_v49, %v720_v54  ;;  %v1361_v25 = vsub.f32 %v1175_v21, %v4921_v32 }
 0x26b   :  { %v2454_v58 = vpop.eup %2453  ;;  %2465 = vlog2.f32 %v3594_v43  ;;  %v1615_v46 = vsub.f32 1.0, %v2452_v10  ;;  %v4068_v54 = vmul.f32 0.6931472, %v2448_v39 }
 0x26c   :  { %v2456_v22 = vpop.eup %2455  ;;  %2467 = vlog2.f32 %v3596_v37  ;;  %v1489_v15 = vmul.f32 1.442695, %v4045_v61  ;;  %v4056_v60 = vsub.f32 %v1361_v25, %v722_v13  ;;  %v4922_v37 = vld [vmem:[#allocation25_spill] sm:$0xff]  ;;  %v4075_v10 = vmul.f32 0.6931472, %v2454_v58 }
 0x26d   :  { %v2458_v59 = vpop.eup %2457  ;;  %2469 = vpow2.f32 %v1495_v44  ;;  %v1190_v43 = vpop.xlane.xlu0 %1189  ;;  %v1679_v26 = vmul.f32 %v1615_v46, %v1615_v46  ;;  %v4077_v44 = vmul.f32 0.6931472, %v2456_v22  ;;  %v123_v22 = vld [vmem:[%s4712_s1 + $0x178] sm:$0xff] }
 0x26e   :  { %v2460_v38 = vpop.eup %2459  ;;  %2471 = vpow2.f32 %v1489_v15  ;;  %v1491_v23 = vmul.f32 1.442695, %v4056_v60  ;;  %v1366_v24 = vsub.f32 %v1190_v43, %v4922_v37  ;;  %980 = vperm.xlu0 %2291, %v120_v34   ;;  %v4087_v46 = vmul.f32 0.6931472, %v2458_v59 }
 0x26f   :  { %v2462_v56 = vpop.eup %2461  ;;  %v1178_v42 = vpop.xlane.xlu2 %1177  ;;  %v4089_v58 = vmul.f32 0.6931472, %v2460_v38  ;;  %v1743_v43 = vmul.f32 %v1679_v26, %v4025_v6 }
 0x270   :  { %v2464_v57 = vpop.eup %2463  ;;  %2473 = vpow2.f32 %v1491_v23  ;;  %v4072_v49 = vsub.f32 %v1366_v24, %v732_v0  ;;  %v1362_v13 = vsub.f32 %v1178_v42, %v4923_v51 }
 0x271   :  { %v2466_v21 = vpop.eup %2465  ;;  %v1184_v32 = vpop.xlane.xlu1 %1183  ;;  %2475 = vlog2.f32 %v3598_v19 }
 0x272   :  { %v2468_v39 = vpop.eup %2467  ;;  %v1501_v47 = vmul.f32 1.442695, %v4072_v49  ;;  %v4084_v25 = vsub.f32 %v1362_v13, %v724_v2  ;;  %v1364_v0 = vsub.f32 %v1184_v32, %v3136_v27  ;;  %v4098_v2 = vmul.f32 0.6931472, %v2462_v56 }
 0x273   :  { %v2470_v34 = vpop.eup %2469  ;;  %v4100_v27 = vmul.f32 0.6931472, %v2464_v57  ;;  %v4102_v24 = vmul.f32 0.6931472, %v2466_v21  ;;  %v4106_v26 = vmul.f32 0.6931472, %v2468_v39 }
 0x274   :  { %v2472_v15 = vpop.eup %2471  ;;  %2477 = vpow2.f32 %v1501_v47  ;;  %v1493_v19 = vmul.f32 1.442695, %v4084_v25  ;;  %v4096_v23 = vsub.f32 %v1364_v0, %v728_v36  ;;  %965 = vperm.xlu2 %2290, %v115_v62   ;;  %v1619_v36 = vsub.f32 1.0, %v2470_v34  ;;  %v4924_v47 = vld [vmem:[#allocation27_spill] sm:$0xff] }
 0x275   :  { %v1616_v59 = vsub.f32 1.0, %v2472_v15  ;;  %v1199_v38 = vpop.xlane.xlu0 %1198  ;;  %v1807_v57 = vsub.f32 0.0, %v1743_v43  ;;  %v118_v39 = vld [vmem:[%s4712_s1 + $0x150] sm:$0xff] }
 0x276   :  { %v2474_v37 = vpop.eup %2473  ;;  %2479 = vpow2.f32 %v1493_v19  ;;  %v1497_v42 = vmul.f32 1.442695, %v4096_v23  ;;  %v1369_v6 = vsub.f32 %v1199_v38, %v3192_v41  ;;  %989 = vperm.xlu0 %2291, %v123_v22   ;;  %v1683_v19 = vmul.f32 %v1619_v36, %v1619_v36  ;;  %v127_v38 = vld [vmem:[%s4712_s1 + $0x198] sm:$0xff] }
 0x277   :  { %v1680_v51 = vmul.f32 %v1616_v59, %v1616_v59  ;;  %v1617_v13 = vsub.f32 1.0, %v2474_v37  ;;  %v1187_v56 = vpop.xlane.xlu2 %1186  ;;  %v2476_v32 = vpop.eup %2475 }
 0x278   :  { %2481 = vpow2.f32 %v1497_v42  ;;  %v4108_v62 = vsub.f32 %v1369_v6, %v738_v5  ;;  %v1365_v21 = vsub.f32 %v1187_v56, %v4924_v47 }
 0x279   :  { %2483 = vlog2.f32 %v3600_v31  ;;  %v1744_v0 = vmul.f32 %v1680_v51, %v4045_v61  ;;  %v1681_v41 = vmul.f32 %v1617_v13, %v1617_v13  ;;  %v1193_v22 = vpop.xlane.xlu1 %1192  ;;  %v4122_v31 = vmul.f32 0.6931472, %v2476_v32 }
 0x27a   :  { %v2478_v34 = vpop.eup %2477  ;;  %2485 = vlog2.f32 %v3602_v9  ;;  %v1507_v15 = vmul.f32 1.442695, %v4108_v62  ;;  %v4119_v5 = vsub.f32 %v1365_v21, %v4048_v16  ;;  %v1367_v43 = vsub.f32 %v1193_v22, %v3163_v11 }
 0x27b   :  { %v1808_v61 = vsub.f32 0.0, %v1744_v0  ;;  %v1745_v59 = vmul.f32 %v1681_v41, %v4056_v60  ;;  %v2131_v9 = vsel %vm2130_vm10, %v1807_v57, 0.0  ;;  %v1622_v42 = vsub.f32 1.0, %v2478_v34 }
 0x27c   :  { %v2480_v37 = vpop.eup %2479  ;;  %v1499_v6 = vmul.f32 1.442695, %v4119_v5  ;;  %v4131_v16 = vsub.f32 %v1367_v43, %v4060_v12  ;;  %974 = vperm.xlu2 %2290, %v118_v39   ;;  %2487 = vpow2.f32 %v1507_v15  ;;  %v1747_v21 = vmul.f32 %v1683_v19, %v4039_v40 }
 0x27d   :  { %v2132_v11 = vsel %vm2130_vm10, %v1808_v61, 0.0  ;;  %v1809_v36 = vsub.f32 0.0, %v1745_v59  ;;  %v1618_v51 = vsub.f32 1.0, %v2480_v37  ;;  %v1208_v60 = vpop.xlane.xlu0 %1207  ;;  %v121_v59 = vld [vmem:[%s4712_s1 + $0x168] sm:$0xff] }
 0x27e   :  { %v2482_v13 = vpop.eup %2481  ;;  %v2133_v56 = vadd.f32 %v2132_v11, %v2131_v9  ;;  %2489 = vpow2.f32 %v1499_v6  ;;  %v1503_v32 = vmul.f32 1.442695, %v4131_v16  ;;  %v1372_v57 = vsub.f32 %v1208_v60, %v3219_v29  ;;  %1001 = vperm.xlu0 %2291, %v127_v38  }
 0x27f   :  { %v2484_v47 = vpop.eup %2483  ;;  %v2134_v12 = vsel %vm2130_vm10, %v1809_v36, 0.0  ;;  %v1682_v0 = vmul.f32 %v1618_v51, %v1618_v51  ;;  %v1620_v41 = vsub.f32 1.0, %v2482_v13  ;;  %v1196_v22 = vpop.xlane.xlu2 %1195  ;;  %v1686_v29 = vmul.f32 %v1622_v42, %v1622_v42  ;;  %v129_v42 = vld [vmem:[%s4712_s1 + $0x1a8] sm:$0xff] }
 0x280   :  { %v4138_v39 = vpop.eup %2485  ;;  %v2135_v34 = vadd.f32 %v2134_v12, %v2133_v56  ;;  %2491 = vpow2.f32 %v1503_v32  ;;  %v4141_v15 = vsub.f32 %v1372_v57, %v4062_v1  ;;  %v1368_v43 = vsub.f32 %v1196_v22, %v3199_v53 }
 0x281   :  { %2493 = vlog2.f32 %v3610_v55  ;;  %v1746_v61 = vmul.f32 %v1682_v0, %v4084_v25  ;;  %v1684_v40 = vmul.f32 %v1620_v41, %v1620_v41  ;;  %v1202_v19 = vpop.xlane.xlu1 %1201  ;;  %v1811_v55 = vsub.f32 0.0, %v1747_v21 }
 0x282   :  { %2495 = vlog2.f32 %v3612_v7  ;;  %v1513_v38 = vmul.f32 1.442695, %v4141_v15  ;;  %v4152_v1 = vsub.f32 %v1368_v43, %v4058_v18  ;;  %v1370_v53 = vsub.f32 %v1202_v19, %v3190_v52  ;;  %v2488_v37 = vpop.eup %2487 }
 0x283   :  { %2497 = vlog2.f32 %v3614_v30  ;;  %v1810_v25 = vsub.f32 0.0, %v1746_v61  ;;  %v1748_v9 = vmul.f32 %v1684_v40, %v4096_v23  ;;  %v4160_v7 = vmul.f32 0.6931472, %v2484_v47 }
 0x284   :  { %v2490_v6 = vpop.eup %2489  ;;  %2499 = vpow2.f32 %v1513_v38  ;;  %v1505_v18 = vmul.f32 1.442695, %v4152_v1  ;;  %v4164_v11 = vsub.f32 %v1370_v53, %v4068_v54  ;;  %983 = vperm.xlu2 %2290, %v121_v59   ;;  %v1750_v52 = vmul.f32 %v1686_v29, %v4072_v49  ;;  %v124_v59 = vld [vmem:[%s4712_s1 + $0x180] sm:$0xff] }
 0x285   :  { %v2136_v30 = vsel %vm2130_vm10, %v1810_v25, 0.0  ;;  %v1812_v36 = vsub.f32 0.0, %v1748_v9  ;;  %v1621_v23 = vsub.f32 1.0, %v2490_v6  ;;  %v1217_v51 = vpop.xlane.xlu0 %1216  ;;  %v2138_v54 = vsel %vm2130_vm10, %v1811_v55, 0.0 }
 0x286   :  { %v2492_v60 = vpop.eup %2491  ;;  %v2137_v13 = vadd.f32 %v2136_v30, %v2135_v34  ;;  %2501 = vpow2.f32 %v1505_v18  ;;  %v1509_v56 = vmul.f32 1.442695, %v4164_v11  ;;  %v1375_v32 = vsub.f32 %v1217_v51, %v3250_v8  ;;  %1007 = vperm.xlu0 %2291, %v129_v42   ;;  %v132_v42 = vld [vmem:[%s4712_s1 + $0x1c0] sm:$0xff] }
 0x287   :  { %v2494_v57 = vpop.eup %2493  ;;  %v1625_v47 = vsub.f32 1.0, %v2488_v37  ;;  %v1685_v21 = vmul.f32 %v1621_v23, %v1621_v23  ;;  %v1623_v12 = vsub.f32 1.0, %v2492_v60  ;;  %v1205_v49 = vpop.xlane.xlu2 %1204  ;;  %v1814_v8 = vsub.f32 0.0, %v1750_v52 }
 0x288   :  { %v4171_v0 = vpop.eup %2495  ;;  %v2139_v41 = vadd.f32 %v2138_v54, %v2137_v13  ;;  %2503 = vpow2.f32 %v1509_v56  ;;  %v4174_v22 = vsub.f32 %v1375_v32, %v4070_v20  ;;  %v1371_v34 = vsub.f32 %v1205_v49, %v3226_v4 }
 0x289   :  { %v4177_v43 = vpop.eup %2497  ;;  %v2140_v29 = vsel %vm2130_vm10, %v1812_v36, 0.0  ;;  %v1749_v61 = vmul.f32 %v1685_v21, %v4119_v5  ;;  %v1687_v40 = vmul.f32 %v1623_v12, %v1623_v12  ;;  %v1211_v19 = vpop.xlane.xlu1 %1210  ;;  %v1689_v55 = vmul.f32 %v1625_v47, %v1625_v47 }
 0x28a   :  { %v2500_v38 = vpop.eup %2499  ;;  %v2141_v53 = vadd.f32 %v2140_v29, %v2139_v41  ;;  %v1519_v20 = vmul.f32 1.442695, %v4174_v22  ;;  %v4186_v37 = vsub.f32 %v1371_v34, %v4066_v48  ;;  %v1373_v4 = vsub.f32 %v1211_v19, %v3217_v35 }
 0x28b   :  { %v1813_v25 = vsub.f32 0.0, %v1749_v61  ;;  %v1751_v9 = vmul.f32 %v1687_v40, %v4131_v16  ;;  %v1628_v5 = vsub.f32 1.0, %v2500_v38  ;;  %v4194_v18 = vmul.f32 0.6931472, %v4138_v39 }
 0x28c   :  { %v2502_v6 = vpop.eup %2501  ;;  %2505 = vpow2.f32 %v1519_v20  ;;  %v1511_v52 = vmul.f32 1.442695, %v4186_v37  ;;  %v4198_v48 = vsub.f32 %v1373_v4, %v4077_v44  ;;  %992 = vperm.xlu2 %2290, %v124_v59   ;;  %v2144_v35 = vsel %vm2130_vm10, %v1814_v8, 0.0 }
 0x28d   :  { %v2142_v16 = vsel %vm2130_vm10, %v1813_v25, 0.0  ;;  %v1815_v30 = vsub.f32 0.0, %v1751_v9  ;;  %v1624_v36 = vsub.f32 1.0, %v2502_v6  ;;  %v1226_v23 = vpop.xlane.xlu0 %1225  ;;  %v1753_v56 = vmul.f32 %v1689_v55, %v4108_v62  ;;  %v128_v62 = vld [vmem:[%s4712_s1 + $0x1a0] sm:$0xff] }
 0x28e   :  { %v2504_v51 = vpop.eup %2503  ;;  %v2143_v60 = vadd.f32 %v2142_v16, %v2141_v53  ;;  %2507 = vpow2.f32 %v1511_v52  ;;  %v1515_v39 = vmul.f32 1.442695, %v4198_v48  ;;  %v1378_v13 = vsub.f32 %v1226_v23, %v3273_v3  ;;  %1016 = vperm.xlu0 %2291, %v132_v42   ;;  %v136_v53 = vld [vmem:[%s4712_s1 + $0x1e0] sm:$0xff] }
 0x28f   :  { %v1692_v44 = vmul.f32 %v1628_v5, %v1628_v5  ;;  %v1688_v32 = vmul.f32 %v1624_v36, %v1624_v36  ;;  %v1626_v54 = vsub.f32 1.0, %v2504_v51  ;;  %v1214_v47 = vpop.xlane.xlu2 %1213  ;;  %v4209_v41 = vmul.f32 0.6931472, %v2494_v57 }
 0x290   :  { %v2145_v21 = vadd.f32 %v2144_v35, %v2143_v60  ;;  %2509 = vpow2.f32 %v1515_v39  ;;  %v4206_v12 = vsub.f32 %v1378_v13, %v4087_v46  ;;  %v1374_v49 = vsub.f32 %v1214_v47, %v3257_v45 }
 0x291   :  { %v2146_v34 = vsel %vm2130_vm10, %v1815_v30, 0.0  ;;  %v1752_v3 = vmul.f32 %v1688_v32, %v4152_v1  ;;  %v1690_v8 = vmul.f32 %v1626_v54, %v1626_v54  ;;  %v1220_v29 = vpop.xlane.xlu1 %1219  ;;  %v1817_v57 = vsub.f32 0.0, %v1753_v56 }
 0x292   :  { %v2506_v61 = vpop.eup %2505  ;;  %v2147_v40 = vadd.f32 %v2146_v34, %v2145_v21  ;;  %v1525_v19 = vmul.f32 1.442695, %v4206_v12  ;;  %v4218_v46 = vsub.f32 %v1374_v49, %v4075_v10  ;;  %v1376_v45 = vsub.f32 %v1220_v29, %v3248_v63 }
 0x293   :  { %v1816_v59 = vsub.f32 0.0, %v1752_v3  ;;  %v1754_v38 = vmul.f32 %v1690_v8, %v4164_v11  ;;  %v1631_v1 = vsub.f32 1.0, %v2506_v61  ;;  %v4226_v4 = vmul.f32 0.6931472, %v4171_v0 }
 0x294   :  { %v2508_v20 = vpop.eup %2507  ;;  %v1756_v55 = vmul.f32 %v1692_v44, %v4141_v15  ;;  %v1517_v10 = vmul.f32 1.442695, %v4218_v46  ;;  %v4231_v25 = vsub.f32 %v1376_v45, %v4098_v2  ;;  %1004 = vperm.xlu2 %2290, %v128_v62   ;;  %2511 = vpow2.f32 %v1525_v19  ;;  %v130_v44 = vld [vmem:[%s4712_s1 + $0x1b0] sm:$0xff] }
 0x295   :  { %v2148_v63 = vsel %vm2130_vm10, %v1816_v59, 0.0  ;;  %v1818_v11 = vsub.f32 0.0, %v1754_v38  ;;  %v1627_v9 = vsub.f32 1.0, %v2508_v20  ;;  %v1235_v5 = vpop.xlane.xlu0 %1234  ;;  %v2150_v15 = vsel %vm2130_vm10, %v1817_v57, 0.0  ;;  %v4926_v20 = vld [vmem:[#allocation37_spill] sm:$0xff] }
 0x296   :  { %v2510_v42 = vpop.eup %2509  ;;  %v2149_v6 = vadd.f32 %v2148_v63, %v2147_v40  ;;  %2513 = vpow2.f32 %v1517_v10  ;;  %v1521_v0 = vmul.f32 1.442695, %v4231_v25  ;;  %v1381_v52 = vsub.f32 %v1235_v5, %v3294_v14  ;;  %1028 = vperm.xlu0 %2291, %v136_v53   ;;  %v4925_v40 = vld [vmem:[#allocation39_spill] sm:$0xff]  ;;  %v4927_v63 = vld [vmem:[#allocation21_spill] sm:$0xff] }
 0x297   :  { %v1695_v35 = vmul.f32 %v1631_v1, %v1631_v1  ;;  %v1691_v2 = vmul.f32 %v1627_v9, %v1627_v9  ;;  %v1629_v16 = vsub.f32 1.0, %v2510_v42  ;;  %v1223_v30 = vpop.xlane.xlu2 %1222  ;;  %v1820_v60 = vsub.f32 0.0, %v1756_v55 }
 0x298   :  { %v2151_v36 = vadd.f32 %v2150_v15, %v2149_v6  ;;  %2515 = vpow2.f32 %v1521_v0  ;;  %v4238_v23 = vsub.f32 %v1381_v52, %v4100_v27  ;;  %v1377_v51 = vsub.f32 %v1223_v30, %v3280_v28  ;;  %v133_v6 = vld [vmem:[%s4712_s1 + $0x1c8] sm:$0xff] }
 0x299   :  { %v2152_v39 = vsel %vm2130_vm10, %v1818_v11, 0.0  ;;  %v1755_v13 = vmul.f32 %v1691_v2, %v4186_v37  ;;  %v1693_v14 = vmul.f32 %v1629_v16, %v1629_v16  ;;  %v1229_v56 = vpop.xlane.xlu1 %1228  ;;  %2517 = vlog2.f32 %v3625_v50 }
 0x29a   :  { %v2153_v32 = vadd.f32 %v2152_v39, %v2151_v36  ;;  %v1531_v54 = vmul.f32 1.442695, %v4238_v23  ;;  %v4248_v47 = vsub.f32 %v1377_v51, %v4089_v58  ;;  %v1379_v27 = vsub.f32 %v1229_v56, %v3271_v33  ;;  %v2512_v28 = vpop.eup %2511 }
 0x29b   :  { %v1759_v21 = vmul.f32 %v1695_v35, %v4174_v22  ;;  %v1819_v37 = vsub.f32 0.0, %v1755_v13  ;;  %v1757_v49 = vmul.f32 %v1693_v14, %v4198_v48  ;;  %v4255_v3 = vmul.f32 0.6931472, %v4177_v43  ;;  %v4928_v35 = vld [vmem:[#allocation36_spill] sm:$0xff] }
 0x29c   :  { %v2514_v34 = vpop.eup %2513  ;;  %2519 = vpow2.f32 %v1531_v54  ;;  %v1523_v8 = vmul.f32 1.442695, %v4248_v47  ;;  %v4259_v58 = vsub.f32 %v1379_v27, %v4106_v26  ;;  %1010 = vperm.xlu2 %2290, %v130_v44   ;;  %v2156_v33 = vsel %vm2130_vm10, %v1820_v60, 0.0  ;;  %v4929_v60 = vld [vmem:[#allocation12_spill] sm:$0xff] }
 0x29d   :  { %v2154_v50 = vsel %vm2130_vm10, %v1819_v37, 0.0  ;;  %v1821_v29 = vsub.f32 0.0, %v1757_v49  ;;  %v1630_v22 = vsub.f32 1.0, %v2514_v34  ;;  %v1244_v62 = vpop.xlane.xlu0 %1243  ;;  %v1823_v45 = vsub.f32 0.0, %v1759_v21 }
 0x29e   :  { %v2516_v61 = vpop.eup %2515  ;;  %v2155_v48 = vadd.f32 %v2154_v50, %v2153_v32  ;;  %2521 = vpow2.f32 %v1523_v8  ;;  %v1527_v43 = vmul.f32 1.442695, %v4259_v58  ;;  %v1384_v19 = vsub.f32 %v1244_v62, %v4925_v40 }
 0x29f   :  { %v1634_v57 = vsub.f32 1.0, %v2512_v28  ;;  %v1694_v59 = vmul.f32 %v1630_v22, %v1630_v22  ;;  %v1632_v26 = vsub.f32 1.0, %v2516_v61  ;;  %v1232_v38 = vpop.xlane.xlu2 %1231  ;;  %v2518_v10 = vpop.eup %2517  ;;  %v2158_v11 = vsel %vm2130_vm10, %v1821_v29, 0.0  ;;  %v4930_v28 = vld [vmem:[#allocation42_spill] sm:$0xff]  ;;  %v4931_v22 = vld [vmem:[#allocation40_spill] sm:$0xff] }
 0x2a0   :  { %v2157_v1 = vadd.f32 %v2156_v33, %v2155_v48  ;;  %2523 = vpow2.f32 %v1527_v43  ;;  %v4266_v53 = vsub.f32 %v1384_v19, %v4122_v31  ;;  %v1380_v55 = vsub.f32 %v1232_v38, %v4926_v20  ;;  %v4933_v20 = vld [vmem:[#allocation18_spill] sm:$0xff] }
 0x2a1   :  { %2525 = vlog2.f32 %v4927_v63  ;;  %v1758_v9 = vmul.f32 %v1694_v59, %v4218_v46  ;;  %v1696_v5 = vmul.f32 %v1632_v26, %v1632_v26  ;;  %v1238_v42 = vpop.xlane.xlu1 %1237  ;;  %v1698_v16 = vmul.f32 %v1634_v57, %v1634_v57  ;;  %v4932_v26 = vld [vmem:[#allocation38_spill] sm:$0xff] }
 0x2a2   :  { %v2520_v0 = vpop.eup %2519  ;;  %v2159_v52 = vadd.f32 %v2158_v11, %v2157_v1  ;;  %v1537_v31 = vmul.f32 1.442695, %v4266_v53  ;;  %v4277_v15 = vsub.f32 %v1380_v55, %v4102_v24  ;;  %v1382_v2 = vsub.f32 %v1238_v42, %v4928_v35 }
 0x2a3   :  { %v1822_v30 = vsub.f32 0.0, %v1758_v9  ;;  %v1760_v36 = vmul.f32 %v1696_v5, %v4231_v25  ;;  %v1637_v46 = vsub.f32 1.0, %v2520_v0  ;;  %2527 = vlog2.f32 %v4929_v60  ;;  %v4935_v60 = vld [vmem:[#allocation43_spill] sm:$0xff] }
 0x2a4   :  { %v2522_v51 = vpop.eup %2521  ;;  %v2162_v39 = vsel %vm2130_vm10, %v1823_v45, 0.0  ;;  %v1529_v13 = vmul.f32 1.442695, %v4277_v15  ;;  %v4285_v14 = vsub.f32 %v1382_v2, %v4194_v18  ;;  %1019 = vperm.xlu2 %2290, %v133_v6   ;;  %2529 = vpow2.f32 %v1537_v31 }
 0x2a5   :  { %v2160_v24 = vsel %vm2130_vm10, %v1822_v30, 0.0  ;;  %v1824_v56 = vsub.f32 0.0, %v1760_v36  ;;  %v1633_v44 = vsub.f32 1.0, %v2522_v51  ;;  %v1253_v32 = vpop.xlane.xlu0 %1252  ;;  %v1762_v49 = vmul.f32 %v1698_v16, %v4206_v12  ;;  %v134_v12 = vld [vmem:[%s4712_s1 + $0x1d0] sm:$0xff]  ;;  %v4934_v16 = vld [vmem:[#allocation24_spill] sm:$0xff] }
 0x2a6   :  { %v2524_v54 = vpop.eup %2523  ;;  %v2161_v25 = vadd.f32 %v2160_v24, %v2159_v52  ;;  %2531 = vpow2.f32 %v1529_v13  ;;  %v1533_v27 = vmul.f32 1.442695, %v4285_v14  ;;  %v1387_v21 = vsub.f32 %v1253_v32, %v4930_v28 }
 0x2a7   :  { %v2526_v37 = vpop.eup %2525  ;;  %v1701_v34 = vmul.f32 %v1637_v46, %v1637_v46  ;;  %v1697_v18 = vmul.f32 %v1633_v44, %v1633_v44  ;;  %v1635_v8 = vsub.f32 1.0, %v2524_v54  ;;  %v1241_v33 = vpop.xlane.xlu2 %1240  ;;  %v780_v61 = vmul.f32 0.6931472, %v2518_v10 }
 0x2a8   :  { %v2163_v50 = vadd.f32 %v2162_v39, %v2161_v25  ;;  %2533 = vpow2.f32 %v1533_v27  ;;  %v4292_v29 = vsub.f32 %v1387_v21, %v4209_v41  ;;  %v1383_v62 = vsub.f32 %v1241_v33, %v4931_v22  ;;  %v137_v25 = vld [vmem:[%s4712_s1 + $0x1e8] sm:$0xff] }
 0x2a9   :  { %v2164_v48 = vsel %vm2130_vm10, %v1824_v56, 0.0  ;;  %v1761_v43 = vmul.f32 %v1697_v18, %v4248_v47  ;;  %v1699_v40 = vmul.f32 %v1635_v8, %v1635_v8  ;;  %v1247_v19 = vpop.xlane.xlu1 %1246  ;;  %v2528_v45 = vpop.eup %2527  ;;  %2535 = vlog2.f32 %v4933_v20  ;;  %v4937_v18 = vld [vmem:[#allocation30_spill] sm:$0xff] }
 0x2aa   :  { %v2165_v57 = vadd.f32 %v2164_v48, %v2163_v50  ;;  %v1543_v59 = vmul.f32 1.442695, %v4292_v29  ;;  %v4302_v41 = vsub.f32 %v1383_v62, %v4160_v7  ;;  %v1385_v38 = vsub.f32 %v1247_v19, %v4932_v26  ;;  %v2530_v1 = vpop.eup %2529  ;;  %v4939_v62 = vld [vmem:[#allocation26_spill] sm:$0xff]  ;;  %v4940_v19 = vld [vmem:[#allocation23_spill] sm:$0xff] }
 0x2ab   :  { %v1826_v55 = vsub.f32 0.0, %v1762_v49  ;;  %v1825_v47 = vsub.f32 0.0, %v1761_v43  ;;  %v1763_v10 = vmul.f32 %v1699_v40, %v4259_v58  ;;  %v4307_v11 = vmul.f32 0.6931472, %v2526_v37  ;;  %v4936_v37 = vld [vmem:[#allocation45_spill] sm:$0xff] }
 0x2ac   :  { %v2532_v63 = vpop.eup %2531  ;;  %v1765_v9 = vmul.f32 %v1701_v34, %v4238_v23  ;;  %v1535_v5 = vmul.f32 1.442695, %v4302_v41  ;;  %v4312_v42 = vsub.f32 %v1385_v38, %v4255_v3  ;;  %1022 = vperm.xlu2 %2290, %v134_v12   ;;  %2537 = vpow2.f32 %v1543_v59 }
 0x2ad   :  { %v2166_v7 = vsel %vm2130_vm10, %v1825_v47, 0.0  ;;  %v1827_v6 = vsub.f32 0.0, %v1763_v10  ;;  %v1636_v0 = vsub.f32 1.0, %v2532_v63  ;;  %v1265_v52 = vpop.xlane.xlu0 %1264  ;;  %v1640_v58 = vsub.f32 1.0, %v2530_v1 }
 0x2ae   :  { %v2534_v31 = vpop.eup %2533  ;;  %v2167_v35 = vadd.f32 %v2166_v7, %v2165_v57  ;;  %2539 = vpow2.f32 %v1535_v5  ;;  %v1539_v2 = vmul.f32 1.442695, %v4312_v42  ;;  %v2168_v23 = vsel %vm2130_vm10, %v1826_v55, 0.0  ;;  %v4941_v7 = vld [vmem:[#allocation41_spill] sm:$0xff] }
 0x2af   :  { %2541 = vlog2.f32 %v4934_v16  ;;  %v1700_v30 = vmul.f32 %v1636_v0, %v1636_v0  ;;  %v1638_v3 = vsub.f32 1.0, %v2534_v31  ;;  %v1250_v36 = vpop.xlane.xlu2 %1249  ;;  %v776_v46 = vmul.f32 0.6931472, %v2528_v45  ;;  %v2536_v13 = vpop.eup %2535  ;;  %v138_v16 = vld [vmem:[%s4712_s1 + $0x1f0] sm:$0xff] }
 0x2b0   :  { %v2169_v51 = vadd.f32 %v2168_v23, %v2167_v35  ;;  %2543 = vpow2.f32 %v1539_v2  ;;  %v1386_v39 = vsub.f32 %v1250_v36, %v4935_v60  ;;  %v1829_v24 = vsub.f32 0.0, %v1765_v9  ;;  %v4942_v35 = vld [vmem:[#allocation48_spill] sm:$0xff] }
 0x2b1   :  { %v2170_v56 = vsel %vm2130_vm10, %v1827_v6, 0.0  ;;  %v1764_v44 = vmul.f32 %v1700_v30, %v4277_v15  ;;  %v1702_v32 = vmul.f32 %v1638_v3, %v1638_v3  ;;  %v1262_v54 = vpop.xlane.xlu1 %1261  ;;  %v1704_v28 = vmul.f32 %v1640_v58, %v1640_v58  ;;  %v4938_v15 = vld [vmem:[#allocation44_spill] sm:$0xff] }
 0x2b2   :  { %v2171_v27 = vadd.f32 %v2170_v56, %v2169_v51  ;;  %v4325_v21 = vsub.f32 %v1386_v39, %v4226_v4  ;;  %v1390_v49 = vsub.f32 %v1262_v54, %v4936_v37  ;;  %v2538_v34 = vpop.eup %2537  ;;  %2545 = vlog2.f32 %v4937_v18  ;;  %v4943_v30 = vld [vmem:[#allocation28_spill] sm:$0xff]  ;;  %v4944_v54 = vld [vmem:[#allocation47_spill] sm:$0xff] }
 0x2b3   :  { %v1828_v8 = vsub.f32 0.0, %v1764_v44  ;;  %v1766_v33 = vmul.f32 %v1702_v32, %v4285_v14  ;;  %v1391_v50 = vsub.f32 %v1265_v52, %v4938_v15  ;;  %2547 = vlog2.f32 %v4939_v62 }
 0x2b4   :  { %v2540_v22 = vpop.eup %2539  ;;  %v782_v48 = vmul.f32 0.6931472, %v2536_v13  ;;  %v1541_v43 = vmul.f32 1.442695, %v4325_v21  ;;  %v4333_v40 = vsub.f32 %v1390_v49, %v780_v61  ;;  %1031 = vperm.xlu2 %2290, %v137_v25   ;;  %2549 = vlog2.f32 %v4940_v19  ;;  %v4946_v19 = vld [vmem:[#allocation46_spill] sm:$0xff] }
 0x2b5   :  { %v2542_v4 = vpop.eup %2541  ;;  %v2172_v12 = vsel %vm2130_vm10, %v1828_v8, 0.0  ;;  %v1830_v45 = vsub.f32 0.0, %v1766_v33  ;;  %v1639_v57 = vsub.f32 1.0, %v2540_v22  ;;  %v1271_v59 = vpop.xlane.xlu0 %1270  ;;  %v2174_v26 = vsel %vm2130_vm10, %v1829_v24, 0.0 }
 0x2b6   :  { %v2544_v14 = vpop.eup %2543  ;;  %v1768_v38 = vmul.f32 %v1704_v28, %v4266_v53  ;;  %v2173_v1 = vadd.f32 %v2172_v12, %v2171_v27  ;;  %2551 = vpow2.f32 %v1541_v43  ;;  %v1643_v20 = vsub.f32 1.0, %v2538_v34 }
 0x2b7   :  { %v1703_v55 = vmul.f32 %v1639_v57, %v1639_v57  ;;  %v1641_v61 = vsub.f32 1.0, %v2544_v14  ;;  %v4339_v47 = vsub.f32 %v1391_v50, %v782_v48  ;;  %v1256_v10 = vpop.xlane.xlu2 %1255  ;;  %v786_v63 = vmul.f32 0.6931472, %v2542_v4 }
 0x2b8   :  { %v2175_v9 = vadd.f32 %v2174_v26, %v2173_v1  ;;  %v1549_v5 = vmul.f32 1.442695, %v4333_v40  ;;  %v1388_v6 = vsub.f32 %v1256_v10, %v4941_v7  ;;  %v2546_v0 = vpop.eup %2545  ;;  %v2176_v52 = vsel %vm2130_vm10, %v1830_v45, 0.0 }
 0x2b9   :  { %v1767_v31 = vmul.f32 %v1703_v55, %v4302_v41  ;;  %v1705_v53 = vmul.f32 %v1641_v61, %v1641_v61  ;;  %v1393_v58 = vsub.f32 %v1271_v59, %v4942_v35  ;;  %v1274_v2 = vpop.xlane.xlu1 %1273  ;;  %v2548_v23 = vpop.eup %2547  ;;  %2553 = vlog2.f32 %v4943_v30 }
 0x2ba   :  { %v1832_v3 = vsub.f32 0.0, %v1768_v38  ;;  %v2177_v36 = vadd.f32 %v2176_v52, %v2175_v9  ;;  %v4350_v51 = vsub.f32 %v1388_v6, %v776_v46  ;;  %v2550_v60 = vpop.eup %2549  ;;  %v1707_v39 = vmul.f32 %v1643_v20, %v1643_v20  ;;  %v4947_v52 = vld [vmem:[#allocation50_spill] sm:$0xff] }
 0x2bb   :  { %v1831_v13 = vsub.f32 0.0, %v1767_v31  ;;  %v1769_v41 = vmul.f32 %v1705_v53, %v4312_v42  ;;  %v1551_v24 = vmul.f32 1.442695, %v4339_v47  ;;  %v790_v44 = vmul.f32 0.6931472, %v2546_v0  ;;  %v4945_v42 = vld [vmem:[#allocation52_spill] sm:$0xff] }
 0x2bc   :  { %v2552_v56 = vpop.eup %2551  ;;  %2555 = vpow2.f32 %v1549_v5  ;;  %v1545_v32 = vmul.f32 1.442695, %v4350_v51  ;;  %v1394_v25 = vsub.f32 %v1274_v2, %v4944_v54  ;;  %1034 = vperm.xlu2 %2290, %v138_v16   ;;  %v4357_v37 = vsub.f32 %v1393_v58, %v786_v63  ;;  %v4948_v53 = vld [vmem:[#allocation29_spill] sm:$0xff] }
 0x2bd   :  { %v2178_v27 = vsel %vm2130_vm10, %v1831_v13, 0.0  ;;  %v1833_v28 = vsub.f32 0.0, %v1769_v41  ;;  %v1642_v46 = vsub.f32 1.0, %v2552_v56  ;;  %v1277_v49 = vpop.xlane.xlu0 %1276  ;;  %v788_v34 = vmul.f32 0.6931472, %v2550_v60 }
 0x2be   :  { %v2179_v18 = vadd.f32 %v2178_v27, %v2177_v36  ;;  %2557 = vpow2.f32 %v1545_v32  ;;  %v1395_v8 = vsub.f32 %v1277_v49, %v4945_v42  ;;  %v2180_v33 = vsel %vm2130_vm10, %v1832_v3, 0.0  ;;  %v4949_v3 = vld [vmem:[#allocation49_spill] sm:$0xff] }
 0x2bf   :  { %v1771_v15 = vmul.f32 %v1707_v39, %v4292_v29  ;;  %2559 = vpow2.f32 %v1551_v24  ;;  %v1706_v50 = vmul.f32 %v1642_v46, %v1642_v46  ;;  %v1259_v22 = vpop.xlane.xlu2 %1258  ;;  %v2554_v62 = vpop.eup %2553  ;;  %v4362_v43 = vsub.f32 %v1394_v25, %v788_v34 }
 0x2c0   :  { %v2181_v48 = vadd.f32 %v2180_v33, %v2179_v18  ;;  %v4364_v4 = vsub.f32 %v1395_v8, %v790_v44  ;;  %v1389_v12 = vsub.f32 %v1259_v22, %v4946_v19  ;;  %v2182_v45 = vsel %vm2130_vm10, %v1833_v28, 0.0 }
 0x2c1   :  { %v1770_v57 = vmul.f32 %v1706_v50, %v4325_v21  ;;  %v1555_v59 = vmul.f32 1.442695, %v4357_v37  ;;  %v1835_v38 = vsub.f32 0.0, %v1771_v15  ;;  %v794_v55 = vmul.f32 0.6931472, %v2554_v62  ;;  %v4950_v15 = vld [vmem:[#allocation51_spill] sm:$0xff] }
 0x2c2   :  { %v2556_v14 = vpop.eup %2555  ;;  %v2183_v26 = vadd.f32 %v2182_v45, %v2181_v48  ;;  %v1453_v29 = vsub.f32 %v1389_v12, %v4307_v11  ;;  %v1557_v61 = vmul.f32 1.442695, %v4362_v43  ;;  %v1559_v0 = vmul.f32 1.442695, %v4364_v4 }
 0x2c3   :  { %v1834_v1 = vsub.f32 0.0, %v1770_v57  ;;  %v1646_v5 = vsub.f32 1.0, %v2556_v14  ;;  %2561 = vpow2.f32 %v1555_v59  ;;  %v784_v31 = vmul.f32 0.6931472, %v2548_v23 }
 0x2c4   :  { %v2558_v20 = vpop.eup %2557  ;;  %v1547_v10 = vmul.f32 1.442695, %v1453_v29  ;;  %v2186_v35 = vsel %vm2130_vm10, %v1835_v38, 0.0 }
 0x2c5   :  { %v2560_v63 = vpop.eup %2559  ;;  %v2184_v9 = vsel %vm2130_vm10, %v1834_v1, 0.0  ;;  %v1644_v7 = vsub.f32 1.0, %v2558_v20  ;;  %v1283_v21 = vpop.xlane.xlu0 %1282  ;;  %v1710_v13 = vmul.f32 %v1646_v5, %v1646_v5 }
 0x2c6   :  { %v2185_v6 = vadd.f32 %v2184_v9, %v2183_v26  ;;  %2563 = vpow2.f32 %v1547_v10  ;;  %v1397_v11 = vsub.f32 %v1283_v21, %v4947_v52  ;;  %v1647_v60 = vsub.f32 1.0, %v2560_v63 }
 0x2c7   :  { %2565 = vlog2.f32 %v4948_v53  ;;  %v1708_v58 = vmul.f32 %v1644_v7, %v1644_v7  ;;  %v1268_v2 = vpop.xlane.xlu2 %1267  ;;  %v1774_v49 = vmul.f32 %v1710_v13, %v4333_v40 }
 0x2c8   :  { %v2187_v16 = vadd.f32 %v2186_v35, %v2185_v6  ;;  %2567 = vpow2.f32 %v1557_v61  ;;  %v4377_v30 = vsub.f32 %v1397_v11, %v794_v55  ;;  %v1392_v36 = vsub.f32 %v1268_v2, %v4949_v3  ;;  %v2716_v11 = vld [vmem:[%s4711_s0 + $0x138] sm:$0xff] }
 0x2c9   :  { %v1772_v39 = vmul.f32 %v1708_v58, %v4350_v51  ;;  %2569 = vpow2.f32 %v1559_v0  ;;  %v2562_v24 = vpop.eup %2561  ;;  %v1711_v25 = vmul.f32 %v1647_v60, %v1647_v60  ;;  %v1838_v19 = vsub.f32 0.0, %v1774_v49 }
 0x2ca   :  { %v1563_v41 = vmul.f32 1.442695, %v4377_v30  ;;  %v1456_v23 = vsub.f32 %v1392_v36, %v784_v31  ;;  %v1649_v51 = vsub.f32 1.0, %v2562_v24 }
 0x2cb   :  { %v1836_v56 = vsub.f32 0.0, %v1772_v39  ;;  %v1775_v22 = vmul.f32 %v1711_v25, %v4339_v47  ;;  %v2192_v61 = vsel %vm2130_vm10, %v1838_v19, 0.0  ;;  %v122_v19 = vld [vmem:[%s4712_s1 + $0x170] sm:$0xff] }
 0x2cc   :  { %v2564_v44 = vpop.eup %2563  ;;  %v1553_v32 = vmul.f32 1.442695, %v1456_v23  ;;  %2571 = vpow2.f32 %v1563_v41  ;;  %v1713_v57 = vmul.f32 %v1649_v51, %v1649_v51 }
 0x2cd   :  { %v2566_v54 = vpop.eup %2565  ;;  %v2188_v27 = vsel %vm2130_vm10, %v1836_v56, 0.0  ;;  %v1645_v28 = vsub.f32 1.0, %v2564_v44  ;;  %v1839_v38 = vsub.f32 0.0, %v1775_v22 }
 0x2ce   :  { %v2568_v46 = vpop.eup %2567  ;;  %v2189_v34 = vadd.f32 %v2188_v27, %v2187_v16  ;;  %2573 = vpow2.f32 %v1553_v32  ;;  %v792_v33 = vmul.f32 0.6931472, %v2566_v54  ;;  %v1777_v47 = vmul.f32 %v1713_v57, %v4357_v37  ;;  %v2717_v54 = vld [vmem:[%s4711_s0 + $0x148] sm:$0xff]  ;;  %v131_v57 = vld [vmem:[%s4712_s1 + $0x1b8] sm:$0xff] }
 0x2cf   :  { %v1709_v18 = vmul.f32 %v1645_v28, %v1645_v28  ;;  %v1280_v42 = vpop.xlane.xlu2 %1279  ;;  %v2570_v8 = vpop.eup %2569  ;;  %v1650_v62 = vsub.f32 1.0, %v2568_v46  ;;  %v2194_v6 = vsel %vm2130_vm10, %v1839_v38, 0.0 }
 0x2d0   :  { %v1396_v50 = vsub.f32 %v1280_v42, %v4950_v15  ;;  %v1651_v59 = vsub.f32 1.0, %v2570_v8  ;;  %v1841_v35 = vsub.f32 0.0, %v1777_v47  ;;  %v2718_v15 = vld [vmem:[%s4711_s0 + $0x178] sm:$0xff] }
 0x2d1   :  { %v1773_v48 = vmul.f32 %v1709_v18, %v1453_v29  ;;  %v1714_v1 = vmul.f32 %v1650_v62, %v1650_v62  ;;  %v116_v62 = vld [vmem:[%s4712_s1 + $0x140] sm:$0xff] }
 0x2d2   :  { %v1460_v12 = vsub.f32 %v1396_v50, %v792_v33  ;;  %v2572_v45 = vpop.eup %2571  ;;  %v1715_v29 = vmul.f32 %v1651_v59, %v1651_v59  ;;  %v2198_v13 = vsel %vm2130_vm10, %v1841_v35, 0.0  ;;  %v135_v59 = vld [vmem:[%s4712_s1 + $0x1d8] sm:$0xff] }
 0x2d3   :  { %v1837_v14 = vsub.f32 0.0, %v1773_v48  ;;  %v1653_v63 = vsub.f32 1.0, %v2572_v45  ;;  %v1778_v0 = vmul.f32 %v1714_v1, %v4362_v43  ;;  %v119_v48 = vld [vmem:[%s4712_s1 + $0x158] sm:$0xff]  ;;  %v126_v45 = vld [vmem:[%s4712_s1 + $0x190] sm:$0xff]  ;;  %v4951_v1 = vld [vmem:[#allocation33_spill] sm:$0xff] }
 0x2d4   :  { %v2574_v40 = vpop.eup %2573  ;;  %v1561_v26 = vmul.f32 1.442695, %v1460_v12  ;;  %v1779_v58 = vmul.f32 %v1715_v29, %v4364_v4  ;;  %v4952_v29 = vld [vmem:[#allocation55_spill] sm:$0xff] }
 0x2d5   :  { %v2190_v20 = vsel %vm2130_vm10, %v1837_v14, 0.0  ;;  %v1648_v55 = vsub.f32 1.0, %v2574_v40  ;;  %v1717_v2 = vmul.f32 %v1653_v63, %v1653_v63  ;;  %v1842_v36 = vsub.f32 0.0, %v1778_v0  ;;  %v139_v14 = vld [vmem:[%s4712_s1 + $0x1f8] sm:$0xff] }
 0x2d6   :  { %v2191_v10 = vadd.f32 %v2190_v20, %v2189_v34  ;;  %2575 = vpow2.f32 %v1561_v26  ;;  %v1843_v41 = vsub.f32 0.0, %v1779_v58 }
 0x2d7   :  { %v1712_v9 = vmul.f32 %v1648_v55, %v1648_v55  ;;  %v966_v5 = vpop.permute.xlu2 %965  ;;  %v2200_v4 = vsel %vm2130_vm10, %v1842_v36, 0.0  ;;  %2577 = vlog2.f32 %v4951_v1  ;;  %v2721_v36 = vld [vmem:[%s4711_s0 + $0x1c8] sm:$0xff] }
 0x2d8   :  { %v2193_v7 = vadd.f32 %v2192_v61, %v2191_v10  ;;  %vm1078_vm11 = vcmp.eq.s32.totalorder %v3797_v17, %v966_v5  ;;  %v972_v21 = vpop.permute.xlu0 %971  ;;  %v2202_v28 = vsel %vm2130_vm10, %v1843_v41, 0.0 }
 0x2d9   :  { %v1776_v52 = vmul.f32 %v1712_v9, %v1456_v23  ;;  %v1142_v31 = vsel %vm1078_vm11, %v2716_v11, 0.0  ;;  %vm1080_vm12 = vcmp.eq.s32.totalorder %v3797_v17, %v972_v21  ;;  %v1781_v23 = vmul.f32 %v1717_v2, %v4377_v30  ;;  %v2720_v11 = vld [vmem:[%s4711_s0 + $0x1b0] sm:$0xff] }
 0x2da   :  { %v2195_v53 = vadd.f32 %v2194_v6, %v2193_v7  ;;  %v1284_v37 = vsel %vm140_vm0, %v1142_v31, 0.0  ;;  %v1144_v25 = vsel %vm1080_vm12, %v2717_v54, 0.0  ;;  %v2719_v7 = vld [vmem:[%s4711_s0 + $0x160] sm:$0xff] }
 0x2db   :  { %v1840_v16 = vsub.f32 0.0, %v1776_v52  ;;  %1285 = vadd.xlane.f32.xlu1 %v1284_v37  ;;  %v1845_v46 = vsub.f32 0.0, %v1781_v23  ;;  %v1290_v51 = vsel %vm140_vm0, %v1144_v25, 0.0 }
 0x2dc   :  { %v2576_v3 = vpop.eup %2575 }
 0x2dd   :  { %v2196_v60 = vsel %vm2130_vm10, %v1840_v16, 0.0  ;;  %v1652_v43 = vsub.f32 1.0, %v2576_v3  ;;  %v2206_v42 = vsel %vm2130_vm10, %v1845_v46, 0.0  ;;  %v2578_v61 = vpop.eup %2577 }
 0x2de   :  { %v2197_v39 = vadd.f32 %v2196_v60, %v2195_v53  ;;  %v796_v47 = vmul.f32 0.6931472, %v2578_v61 }
 0x2df   :  { %v1716_v24 = vmul.f32 %v1652_v43, %v1652_v43  ;;  %v975_v40 = vpop.permute.xlu2 %974 }
 0x2e0   :  { %v2199_v56 = vadd.f32 %v2198_v13, %v2197_v39  ;;  %v981_v44 = vpop.permute.xlu0 %980  ;;  %vm1081_vm4 = vcmp.eq.s32.totalorder %v3797_v17, %v975_v40 }
 0x2e1   :  { %v1780_v32 = vmul.f32 %v1716_v24, %v1460_v12  ;;  %v125_v12 = vld [vmem:[%s4712_s1 + $0x188] sm:$0xff]  ;;  %vm1083_vm14 = vcmp.eq.s32.totalorder %v3797_v17, %v981_v44 }
 0x2e2   :  { %v2201_v27 = vadd.f32 %v2200_v4, %v2199_v56  ;;  %v1147_v21 = vsel %vm1083_vm14, %v2719_v7, 0.0  ;;  %v2722_v56 = vld [vmem:[%s4711_s0 + $0x140] sm:$0xff] }
 0x2e3   :  { %v1844_v49 = vsub.f32 0.0, %v1780_v32  ;;  %v1299_v52 = vsel %vm140_vm0, %v1147_v21, 0.0  ;;  %v2723_v32 = vld [vmem:[%s4711_s0 + $0x1e0] sm:$0xff] }
 0x2e4   :  { %v2203_v34 = vadd.f32 %v2202_v28, %v2201_v27  ;;  %v2724_v27 = vld [vmem:[%s4711_s0 + $0x150] sm:$0xff] }
 0x2e5   :  { %v2204_v30 = vsel %vm2130_vm10, %v1844_v49, 0.0  ;;  %1291 = vadd.xlane.f32.xlu2 %v1290_v51  ;;  %v1145_v28 = vsel %vm1081_vm4, %v2724_v27, 0.0 }
 0x2e6   :  { %v2205_v18 = vadd.f32 %v2204_v30, %v2203_v34  ;;  %v1293_v49 = vsel %vm140_vm0, %v1145_v28, 0.0  ;;  %v2725_v34 = vld [vmem:[%s4711_s0 + $0x158] sm:$0xff] }
 0x2e7   :  { %v4438_v26 = vpop.permute.xlu2 %983 }
 0x2e8   :  { %v990_v8 = vpop.permute.xlu0 %989  ;;  %v2207_v33 = vadd.f32 %v2206_v42, %v2205_v18  ;;  %vm1084_vm6 = vcmp.eq.s32.totalorder %v3797_v17, %v4438_v26  ;;  %v2726_v42 = vld [vmem:[%s4711_s0 + $0x168] sm:$0xff]  ;;  %v2730_v26 = vld [vmem:[%s4711_s0 + $0x180] sm:$0xff] }
 0x2e9   :  { %vm1086_vm13 = vcmp.eq.s32.totalorder %v3797_v17, %v990_v8  ;;  %v1148_v8 = vsel %vm1084_vm6, %v2726_v42, 0.0  ;;  %v4956_v42 = vld [vmem:[#allocation34_spill] sm:$0xff] }
 0x2ea   :  { %v1150_v50 = vsel %vm1086_vm13, %v2718_v15, 0.0  ;;  %v2727_v15 = vld [vmem:[%s4711_s0 + $0x188] sm:$0xff] }
 0x2eb   :  { %v1308_v22 = vsel %vm140_vm0, %v1150_v50, 0.0 }
 0x2ed   :  { %1309 = vadd.xlane.f32.xlu2 %v1308_v22  ;;  %v1302_v22 = vsel %vm140_vm0, %v1148_v8, 0.0 }
 0x2ef   :  { %v4440_v38 = vpop.permute.xlu2 %992 }
 0x2f0   :  { %v4443_v20 = vpop.permute.xlu0 %1001  ;;  %vm1087_vm11 = vcmp.eq.s32.totalorder %v3797_v17, %v4440_v38  ;;  %v2732_v38 = vld [vmem:[%s4711_s0 + $0x1c0] sm:$0xff] }
 0x2f1   :  { %vm1090_vm8 = vcmp.eq.s32.totalorder %v3797_v17, %v4443_v20  ;;  %v1151_v1 = vsel %vm1087_vm11, %v2730_v26, 0.0  ;;  %v2731_v20 = vld [vmem:[%s4711_s0 + $0x1a8] sm:$0xff] }
 0x2f4   :  { %968 = vperm.xlu1 %2292, %v116_v62  }
 0x2f7   :  { %v4445_v55 = vpop.permute.xlu2 %1004 }
 0x2f8   :  { %v4449_v9 = vpop.permute.xlu0 %1007 }
 0x2f9   :  { %vm1092_vm12 = vcmp.eq.s32.totalorder %v3797_v17, %v4449_v9 }
 0x2fa   :  { %v1156_v61 = vsel %vm1092_vm12, %v2731_v20, 0.0  ;;  %v4961_v20 = vld [vmem:[#allocation58_spill] sm:$0xff] }
 0x2fc   :  { %977 = vperm.xlu1 %2292, %v119_v48   ;;  %v2728_v48 = vld [vmem:[%s4711_s0 + $0x198] sm:$0xff] }
 0x2ff   :  { %v1011_v6 = vpop.permute.xlu2 %1010 }
 0x300   :  { %vm1093_vm15 = vcmp.eq.s32.totalorder %v3797_v17, %v1011_v6  ;;  %v4459_v53 = vpop.permute.xlu0 %1016 }
 0x301   :  { %v1157_v31 = vsel %vm1093_vm15, %v2720_v11, 0.0  ;;  %vm1095_vm13 = vcmp.eq.s32.totalorder %v3797_v17, %v4459_v53  ;;  %vm1091_vm15 = vcmp.eq.s32.totalorder %v3797_v17, %v4445_v55  ;;  %v2736_v55 = vld [vmem:[%s4711_s0 + $0x1f8] sm:$0xff] }
 0x302   :  { %v1329_v2 = vsel %vm140_vm0, %v1157_v31, 0.0  ;;  %v2735_v31 = vld [vmem:[%s4711_s0 + $0x1d8] sm:$0xff] }
 0x304   :  { %986 = vperm.xlu1 %2292, %v122_v19   ;;  %v1154_v19 = vsel %vm1090_vm8, %v2728_v48, 0.0 }
 0x307   :  { %v1020_v35 = vpop.permute.xlu2 %1019 }
 0x308   :  { %vm1096_vm1 = vcmp.eq.s32.totalorder %v3797_v17, %v1020_v35  ;;  %v1029_v39 = vpop.permute.xlu0 %1028 }
 0x309   :  { %v1160_v60 = vsel %vm1096_vm1, %v2721_v36, 0.0  ;;  %vm1099_vm2 = vcmp.eq.s32.totalorder %v3797_v17, %v1029_v39  ;;  %v2737_v36 = vld [vmem:[%s4711_s0 + $0x1f0] sm:$0xff] }
 0x30a   :  { %v1338_v23 = vsel %vm140_vm0, %v1160_v60, 0.0  ;;  %v1163_v54 = vsel %vm1099_vm2, %v2723_v32, 0.0 }
 0x30b   :  { %v1347_v25 = vsel %vm140_vm0, %v1163_v54, 0.0 }
 0x30c   :  { %995 = vperm.xlu1 %2292, %v125_v12   ;;  %v2729_v12 = vld [vmem:[%s4711_s0 + $0x170] sm:$0xff] }
 0x30f   :  { %v1023_v40 = vpop.permute.xlu2 %1022 }
 0x314   :  { %998 = vperm.xlu1 %2292, %v126_v45  }
 0x317   :  { %v1032_v9 = vpop.permute.xlu2 %1031 }
 0x318   :  { %vm1100_vm6 = vcmp.eq.s32.totalorder %v3797_v17, %v1032_v9 }
 0x31c   :  { %1013 = vperm.xlu1 %2292, %v131_v57  }
 0x31f   :  { %v1035_v35 = vpop.permute.xlu2 %1034 }
 0x324   :  { %1025 = vperm.xlu1 %2292, %v135_v59  }
 0x32c   :  { %1037 = vperm.xlu1 %2292, %v139_v14   ;;  %v1320_v14 = vsel %vm140_vm0, %v1154_v19, 0.0 }
 0x34e   :  { %v1286_v10 = vpop.xlane.xlu1 %1285 }
 0x34f   :  { %v1398_v63 = vsub.f32 %v1286_v10, %v4952_v29  ;;  %v1326_v29 = vsel %vm140_vm0, %v1156_v61, 0.0 }
 0x351   :  { %v1462_v5 = vsub.f32 %v1398_v63, %v796_v47  ;;  %v1311_v47 = vsel %vm140_vm0, %v1151_v1, 0.0  ;;  %v1159_v63 = vsel %vm1095_vm13, %v2732_v38, 0.0 }
 0x353   :  { %v1565_v0 = vmul.f32 1.442695, %v1462_v5 }
 0x355   :  { %2579 = vpow2.f32 %v1565_v0  ;;  %v1335_v0 = vsel %vm140_vm0, %v1159_v63, 0.0 }
 0x356   :  { %1300 = vadd.xlane.f32.xlu1 %v1299_v52  ;;  %v2734_v52 = vld [vmem:[%s4711_s0 + $0x1a0] sm:$0xff] }
 0x357   :  { %v1155_v11 = vsel %vm1091_vm15, %v2734_v52, 0.0 }
 0x358   :  { %v1292_v27 = vpop.xlane.xlu2 %1291 }
 0x35b   :  { %v2580_v37 = vpop.eup %2579 }
 0x35c   :  { %v1654_v58 = vsub.f32 1.0, %v2580_v37 }
 0x35e   :  { %v1718_v16 = vmul.f32 %v1654_v58, %v1654_v58  ;;  %1330 = vadd.xlane.f32.xlu1 %v1329_v2  ;;  %v1323_v2 = vsel %vm140_vm0, %v1155_v11, 0.0 }
 0x360   :  { %v1782_v3 = vmul.f32 %v1718_v16, %v1462_v5  ;;  %v2733_v5 = vld [vmem:[%s4711_s0 + $0x190] sm:$0xff]  ;;  %v1310_v52 = vpop.xlane.xlu2 %1309 }
 0x362   :  { %v1846_v43 = vsub.f32 0.0, %v1782_v3 }
 0x364   :  { %v2208_v13 = vsel %vm2130_vm10, %v1846_v43, 0.0  ;;  %v2738_v43 = vld [vmem:[%s4711_s0 + $0x1b8] sm:$0xff] }
 0x365   :  { %v4467_v41 = vadd.f32 %v2208_v13, %v2207_v33 }
 0x366   :  { %v969_v24 = vpop.permute.xlu1 %968  ;;  %1339 = vadd.xlane.f32.xlu1 %v1338_v23 }
 0x367   :  { %vm1079_vm3 = vcmp.eq.s32.totalorder %v3797_v17, %v969_v24  ;;  %v2739_v24 = vld [vmem:[%s4711_s0 + $0x1d0] sm:$0xff] }
 0x368   :  { %v1143_v44 = vsel %vm1079_vm3, %v2722_v56, 0.0  ;;  %vm1101_vm3 = vcmp.eq.s32.totalorder %v3797_v17, %v1035_v35  ;;  %v4964_v35 = vld [vmem:[#allocation57_spill] sm:$0xff] }
 0x369   :  { %v1287_v4 = vsel %vm140_vm0, %v1143_v44, 0.0  ;;  %v1165_v60 = vsel %vm1101_vm3, %v2737_v36, 0.0 }
 0x36a   :  { %1288 = vadd.xlane.f32.xlu0 %v1287_v4  ;;  %v1353_v23 = vsel %vm140_vm0, %v1165_v60, 0.0  ;;  %v2740_v4 = vld [vmem:[%s4711_s0 + $0x1e8] sm:$0xff] }
 0x36b   :  { %v1164_v32 = vsel %vm1100_vm6, %v2740_v4, 0.0  ;;  %v4967_v4 = vld [vmem:[#allocation71_spill] sm:$0xff] }
 0x36c   :  { %v1350_v54 = vsel %vm140_vm0, %v1164_v32, 0.0 }
 0x36e   :  { %v978_v46 = vpop.permute.xlu1 %977  ;;  %1348 = vadd.xlane.f32.xlu1 %v1347_v25  ;;  %v4953_v25 = vld [vmem:[#allocation31_spill] sm:$0xff] }
 0x36f   :  { %vm1082_vm5 = vcmp.eq.s32.totalorder %v3797_v17, %v978_v46  ;;  %2581 = vlog2.f32 %v4953_v25  ;;  %v4954_v46 = vld [vmem:[#allocation53_spill] sm:$0xff] }
 0x370   :  { %v1146_v51 = vsel %vm1082_vm5, %v2725_v34, 0.0  ;;  %vm1097_vm5 = vcmp.eq.s32.totalorder %v3797_v17, %v1023_v40  ;;  %v4955_v34 = vld [vmem:[#allocation32_spill] sm:$0xff] }
 0x371   :  { %v1296_v18 = vsel %vm140_vm0, %v1146_v51, 0.0  ;;  %v1161_v56 = vsel %vm1097_vm5, %v2739_v24, 0.0  ;;  %2583 = vlog2.f32 %v4955_v34  ;;  %v4968_v34 = vld [vmem:[#allocation61_spill] sm:$0xff] }
 0x372   :  { %1294 = vadd.xlane.f32.xlu0 %v1293_v49  ;;  %v1341_v44 = vsel %vm140_vm0, %v1161_v56, 0.0  ;;  %v1400_v49 = vsub.f32 %v1292_v27, %v4954_v46  ;;  %2585 = vlog2.f32 %v4956_v42  ;;  %v4966_v56 = vld [vmem:[#allocation59_spill] sm:$0xff] }
 0x375   :  { %v2582_v28 = vpop.eup %2581 }
 0x376   :  { %v987_v30 = vpop.permute.xlu1 %986  ;;  %v800_v51 = vmul.f32 0.6931472, %v2582_v28 }
 0x377   :  { %vm1085_vm9 = vcmp.eq.s32.totalorder %v3797_v17, %v987_v30 }
 0x378   :  { %v1149_v45 = vsel %vm1085_vm9, %v2729_v12, 0.0  ;;  %v1464_v30 = vsub.f32 %v1400_v49, %v800_v51 }
 0x379   :  { %v1305_v59 = vsel %vm140_vm0, %v1149_v45, 0.0 }
 0x37a   :  { %1297 = vadd.xlane.f32.xlu0 %v1296_v18  ;;  %v2584_v18 = vpop.eup %2583 }
 0x37b   :  { %v2586_v12 = vpop.eup %2585 }
 0x37c   :  { %v802_v1 = vmul.f32 0.6931472, %v2586_v12 }
 0x37e   :  { %v996_v33 = vpop.permute.xlu1 %995 }
 0x37f   :  { %vm1088_vm7 = vcmp.eq.s32.totalorder %v3797_v17, %v996_v33  ;;  %v798_v33 = vmul.f32 0.6931472, %v2584_v18 }
 0x380   :  { %v1152_v50 = vsel %vm1088_vm7, %v2727_v15, 0.0  ;;  %v4957_v15 = vld [vmem:[#allocation69_spill] sm:$0xff] }
 0x381   :  { %v1314_v62 = vsel %vm140_vm0, %v1152_v50, 0.0  ;;  %2587 = vlog2.f32 %v4957_v15  ;;  %v4958_v50 = vld [vmem:[#allocation54_spill] sm:$0xff] }
 0x382   :  { %1303 = vadd.xlane.f32.xlu0 %v1302_v22  ;;  %1315 = vadd.xlane.f32.xlu2 %v1314_v62 }
 0x386   :  { %v999_v57 = vpop.permute.xlu1 %998 }
 0x387   :  { %vm1089_vm14 = vcmp.eq.s32.totalorder %v3797_v17, %v999_v57  ;;  %v2588_v45 = vpop.eup %2587  ;;  %v4959_v57 = vld [vmem:[#allocation35_spill] sm:$0xff] }
 0x388   :  { %v1153_v7 = vsel %vm1089_vm14, %v2733_v5, 0.0 }
 0x389   :  { %v1317_v6 = vsel %vm140_vm0, %v1153_v7, 0.0  ;;  %v4962_v7 = vld [vmem:[#allocation70_spill] sm:$0xff] }
 0x38a   :  { %1306 = vadd.xlane.f32.xlu0 %v1305_v59  ;;  %1321 = vadd.xlane.f32.xlu2 %v1320_v14  ;;  %v4960_v59 = vld [vmem:[#allocation56_spill] sm:$0xff] }
 0x38e   :  { %v1014_v10 = vpop.permute.xlu1 %1013 }
 0x38f   :  { %vm1094_vm4 = vcmp.eq.s32.totalorder %v3797_v17, %v1014_v10  ;;  %v806_v10 = vmul.f32 0.6931472, %v2588_v45 }
 0x390   :  { %v1158_v39 = vsel %vm1094_vm4, %v2738_v43, 0.0 }
 0x391   :  { %v1332_v13 = vsel %vm140_vm0, %v1158_v39, 0.0 }
 0x392   :  { %1312 = vadd.xlane.f32.xlu0 %v1311_v47  ;;  %1327 = vadd.xlane.f32.xlu2 %v1326_v29 }
 0x396   :  { %v1026_v21 = vpop.permute.xlu1 %1025 }
 0x397   :  { %vm1098_vm1 = vcmp.eq.s32.totalorder %v3797_v17, %v1026_v21 }
 0x398   :  { %v1162_v53 = vsel %vm1098_vm1, %v2735_v31, 0.0 }
 0x399   :  { %v1344_v16 = vsel %vm140_vm0, %v1162_v53, 0.0 }
 0x39a   :  { %1318 = vadd.xlane.f32.xlu0 %v1317_v6  ;;  %1336 = vadd.xlane.f32.xlu2 %v1335_v0  ;;  %v4963_v6 = vld [vmem:[#allocation72_spill] sm:$0xff] }
 0x39e   :  { %v1038_v37 = vpop.permute.xlu1 %1037 }
 0x39f   :  { %vm1102_vm2 = vcmp.eq.s32.totalorder %v3797_v17, %v1038_v37  ;;  %v1569_v17 = vmul.f32 1.442695, %v1464_v30 }
 0x3a0   :  { %v1166_v58 = vsel %vm1102_vm2, %v2736_v55, 0.0 }
 0x3a1   :  { %v1356_v3 = vsel %vm140_vm0, %v1166_v58, 0.0  ;;  %2589 = vpow2.f32 %v1569_v17  ;;  %vm2268_vm0 = vcmask 0  }
 0x3a2   :  { %1324 = vadd.xlane.f32.xlu0 %v1323_v2  ;;  %1345 = vadd.xlane.f32.xlu2 %v1344_v16 }
 0x3a3   :  { %1357 = vadd.xlane.f32.xlu1 %v1356_v3 }
 0x3a7   :  { %v2590_v26 = vpop.eup %2589 }
 0x3a8   :  { %v1656_v29 = vsub.f32 1.0, %v2590_v26 }
 0x3aa   :  { %1333 = vadd.xlane.f32.xlu0 %v1332_v13  ;;  %1354 = vadd.xlane.f32.xlu2 %v1353_v23  ;;  %v1720_v0 = vmul.f32 %v1656_v29, %v1656_v29  ;;  %v4965_v13 = vld [vmem:[#allocation68_spill] sm:$0xff] }
 0x3ac   :  { %v1784_v3 = vmul.f32 %v1720_v0, %v1464_v30 }
 0x3ae   :  { %v1848_v32 = vsub.f32 0.0, %v1784_v3 }
 0x3b0   :  { %v2212_v15 = vsel %vm2130_vm10, %v1848_v32, 0.0 }
 0x3b2   :  { %1342 = vadd.xlane.f32.xlu0 %v1341_v44  ;;  %v1406_v44 = vsub.f32 %v1310_v52, %v4966_v56 }
 0x3ba   :  { %1351 = vadd.xlane.f32.xlu0 %v1350_v54 }
 0x3c9   :  { %v1301_v48 = vpop.xlane.xlu1 %1300 }
 0x3ca   :  { %v1403_v14 = vsub.f32 %v1301_v48, %v4960_v59 }
 0x3cc   :  { %v4580_v38 = vsub.f32 %v1403_v14, %v806_v10 }
 0x3ce   :  { %v1575_v11 = vmul.f32 1.442695, %v4580_v38 }
 0x3dd   :  { %v1289_v8 = vpop.xlane.xlu0 %1288 }
 0x3de   :  { %v1399_v22 = vsub.f32 %v1289_v8, %v4958_v50 }
 0x3e0   :  { %v1463_v62 = vsub.f32 %v1399_v22, %v798_v33  ;;  %v4969_v33 = vld [vmem:[#allocation76_spill] sm:$0xff] }
 0x3e2   :  { %v1567_v19 = vmul.f32 1.442695, %v1463_v62 }
 0x3e4   :  { %2591 = vpow2.f32 %v1567_v19 }
 0x3e5   :  { %2593 = vlog2.f32 %v4959_v57  ;;  %v1295_v40 = vpop.xlane.xlu0 %1294  ;;  %v4970_v57 = vld [vmem:[#allocation73_spill] sm:$0xff] }
 0x3e6   :  { %v1401_v61 = vsub.f32 %v1295_v40, %v4961_v20  ;;  %2595 = vlog2.f32 %v4962_v7  ;;  %v4971_v40 = vld [vmem:[#allocation63_spill] sm:$0xff] }
 0x3e8   :  { %v1465_v47 = vsub.f32 %v1401_v61, %v802_v1 }
 0x3ea   :  { %v2592_v63 = vpop.eup %2591  ;;  %v1571_v9 = vmul.f32 1.442695, %v1465_v47 }
 0x3eb   :  { %v2594_v5 = vpop.eup %2593  ;;  %v1655_v21 = vsub.f32 1.0, %v2592_v63  ;;  %v4972_v63 = vld [vmem:[#allocation60_spill] sm:$0xff] }
 0x3ec   :  { %2597 = vpow2.f32 %v1571_v9  ;;  %v804_v37 = vmul.f32 0.6931472, %v2594_v5  ;;  %v2596_v16 = vpop.eup %2595 }
 0x3ed   :  { %2599 = vlog2.f32 %v4963_v6  ;;  %v1719_v31 = vmul.f32 %v1655_v21, %v1655_v21  ;;  %v1298_v53 = vpop.xlane.xlu0 %1297  ;;  %v808_v28 = vmul.f32 0.6931472, %v2596_v16  ;;  %v4973_v6 = vld [vmem:[#allocation67_spill] sm:$0xff] }
 0x3ee   :  { %v1402_v55 = vsub.f32 %v1298_v53, %v4964_v35  ;;  %2601 = vpow2.f32 %v1575_v11  ;;  %v4974_v11 = vld [vmem:[#allocation75_spill] sm:$0xff]  ;;  %v4975_v35 = vld [vmem:[#allocation80_spill] sm:$0xff] }
 0x3ef   :  { %v1783_v58 = vmul.f32 %v1719_v31, %v1463_v62  ;;  %2603 = vlog2.f32 %v4965_v13 }
 0x3f0   :  { %v1466_v2 = vsub.f32 %v1402_v55, %v804_v37 }
 0x3f1   :  { %v1847_v36 = vsub.f32 0.0, %v1783_v58  ;;  %v1331_v58 = vpop.xlane.xlu1 %1330 }
 0x3f2   :  { %v2598_v60 = vpop.eup %2597  ;;  %v1573_v43 = vmul.f32 1.442695, %v1466_v2 }
 0x3f3   :  { %v2600_v39 = vpop.eup %2599  ;;  %v2210_v23 = vsel %vm2130_vm10, %v1847_v36, 0.0  ;;  %v1657_v24 = vsub.f32 1.0, %v2598_v60  ;;  %v4976_v36 = vld [vmem:[#allocation78_spill] sm:$0xff] }
 0x3f4   :  { %2605 = vpow2.f32 %v1573_v43  ;;  %v812_v46 = vmul.f32 0.6931472, %v2600_v39  ;;  %v2211_v49 = vadd.f32 %v2210_v23, %v4467_v41  ;;  %v2602_v30 = vpop.eup %2601 }
 0x3f5   :  { %2607 = vlog2.f32 %v4967_v4  ;;  %v1721_v54 = vmul.f32 %v1657_v24, %v1657_v24  ;;  %v1316_v25 = vpop.xlane.xlu2 %1315  ;;  %v1304_v27 = vpop.xlane.xlu0 %1303  ;;  %v1659_v62 = vsub.f32 1.0, %v2602_v30  ;;  %v4979_v30 = vld [vmem:[#allocation81_spill] sm:$0xff] }
 0x3f6   :  { %v1404_v51 = vsub.f32 %v1304_v27, %v4968_v34  ;;  %v4592_v17 = vsub.f32 %v1406_v44, %v812_v46  ;;  %v2604_v8 = vpop.eup %2603  ;;  %2609 = vlog2.f32 %v4969_v33  ;;  %v2213_v48 = vadd.f32 %v2212_v15, %v2211_v49  ;;  %v4980_v15 = vld [vmem:[#allocation65_spill] sm:$0xff] }
 0x3f7   :  { %v1785_v18 = vmul.f32 %v1721_v54, %v1465_v47  ;;  %2611 = vlog2.f32 %v4970_v57  ;;  %v1408_v26 = vsub.f32 %v1316_v25, %v4971_v40  ;;  %v810_v10 = vmul.f32 0.6931472, %v2604_v8  ;;  %v4978_v25 = vld [vmem:[#allocation74_spill] sm:$0xff] }
 0x3f8   :  { %v1468_v42 = vsub.f32 %v1404_v51, %v808_v28  ;;  %v1581_v59 = vmul.f32 1.442695, %v4592_v17  ;;  %v1723_v29 = vmul.f32 %v1659_v62, %v1659_v62 }
 0x3f9   :  { %v1849_v50 = vsub.f32 0.0, %v1785_v18 }
 0x3fa   :  { %v2606_v22 = vpop.eup %2605  ;;  %v1577_v19 = vmul.f32 1.442695, %v1468_v42  ;;  %v1787_v55 = vmul.f32 %v1723_v29, %v4580_v38  ;;  %v4977_v38 = vld [vmem:[#allocation64_spill] sm:$0xff] }
 0x3fb   :  { %v2608_v12 = vpop.eup %2607  ;;  %v2214_v41 = vsel %vm2130_vm10, %v1849_v50, 0.0  ;;  %v1658_v45 = vsub.f32 1.0, %v2606_v22 }
 0x3fc   :  { %v2215_v14 = vadd.f32 %v2214_v41, %v2213_v48  ;;  %2613 = vpow2.f32 %v1577_v19  ;;  %v816_v47 = vmul.f32 0.6931472, %v2608_v12  ;;  %v2610_v5 = vpop.eup %2609  ;;  %v1851_v44 = vsub.f32 0.0, %v1787_v55  ;;  %v4981_v48 = vld [vmem:[#allocation83_spill] sm:$0xff]  ;;  %v4982_v19 = vld [vmem:[#allocation5_spill] sm:$0xff] }
 0x3fd   :  { %v1722_v1 = vmul.f32 %v1658_v45, %v1658_v45  ;;  %v1322_v20 = vpop.xlane.xlu2 %1321  ;;  %v1307_v61 = vpop.xlane.xlu0 %1306  ;;  %2615 = vpow2.f32 %v1581_v59  ;;  %v820_v37 = vmul.f32 0.6931472, %v2610_v5 }
 0x3fe   :  { %v1405_v9 = vsub.f32 %v1307_v61, %v4972_v63  ;;  %v4601_v21 = vsub.f32 %v1408_v26, %v816_v47  ;;  %v1410_v0 = vsub.f32 %v1322_v20, %v4973_v6  ;;  %2617 = vlog2.f32 %v4974_v11  ;;  %v2612_v53 = vpop.eup %2611  ;;  %v1340_v45 = vpop.xlane.xlu1 %1339 }
 0x3ff   :  { %v1786_v7 = vmul.f32 %v1722_v1, %v1466_v2  ;;  %2619 = vlog2.f32 %v4975_v35  ;;  %v814_v56 = vmul.f32 0.6931472, %v2612_v53  ;;  %v2218_v8 = vsel %vm2130_vm10, %v1851_v44, 0.0 }
 0x400   :  { %v1469_v52 = vsub.f32 %v1405_v9, %v810_v10  ;;  %2621 = vlog2.f32 %v4976_v36  ;;  %v1585_v60 = vmul.f32 1.442695, %v4601_v21  ;;  %v4610_v39 = vsub.f32 %v1410_v0, %v820_v37  ;;  %v4983_v9 = vld [vmem:[#allocation62_spill] sm:$0xff]  ;;  %v4984_v0 = vld [vmem:[#allocation84_spill] sm:$0xff]  ;;  %v4986_v36 = vld [vmem:[#allocation85_spill] sm:$0xff] }
 0x401   :  { %v1850_v31 = vsub.f32 0.0, %v1786_v7 }
 0x402   :  { %v1579_v16 = vmul.f32 1.442695, %v1469_v52  ;;  %v2614_v3 = vpop.eup %2613  ;;  %v1589_v49 = vmul.f32 1.442695, %v4610_v39 }
 0x403   :  { %v2216_v2 = vsel %vm2130_vm10, %v1850_v31, 0.0  ;;  %v1660_v43 = vsub.f32 1.0, %v2614_v3  ;;  %v2616_v24 = vpop.eup %2615 }
 0x404   :  { %2623 = vpow2.f32 %v1579_v16  ;;  %v2618_v54 = vpop.eup %2617  ;;  %v2217_v27 = vadd.f32 %v2216_v2, %v2215_v14  ;;  %v1662_v18 = vsub.f32 1.0, %v2616_v24 }
 0x405   :  { %v1328_v13 = vpop.xlane.xlu2 %1327  ;;  %v1313_v23 = vpop.xlane.xlu0 %1312  ;;  %v1724_v4 = vmul.f32 %v1660_v43, %v1660_v43  ;;  %2625 = vlog2.f32 %v4978_v25  ;;  %v818_v47 = vmul.f32 0.6931472, %v2618_v54 }
 0x406   :  { %v1407_v32 = vsub.f32 %v1313_v23, %v4977_v38  ;;  %v2620_v28 = vpop.eup %2619  ;;  %2627 = vpow2.f32 %v1585_v60  ;;  %v1412_v50 = vsub.f32 %v1328_v13, %v4980_v15  ;;  %v2219_v12 = vadd.f32 %v2218_v8, %v2217_v27  ;;  %v4987_v23 = vld [vmem:[#allocation77_spill] sm:$0xff]  ;;  %v4990_v8 = vld [vmem:[#allocation66_spill] sm:$0xff] }
 0x407   :  { %v1788_v46 = vmul.f32 %v1724_v4, %v1468_v42  ;;  %v2622_v51 = vpop.eup %2621  ;;  %2629 = vlog2.f32 %v4979_v30  ;;  %v1413_v42 = vsub.f32 %v1331_v58, %v4982_v19  ;;  %v826_v40 = vmul.f32 0.6931472, %v2620_v28  ;;  %v4985_v58 = vld [vmem:[#allocation7_spill] sm:$0xff]  ;;  %v4992_v19 = vld [vmem:[#allocation10_spill] sm:$0xff] }
 0x408   :  { %v4615_v34 = vsub.f32 %v1407_v32, %v814_v56  ;;  %2631 = vlog2.f32 %v4981_v48  ;;  %v824_v41 = vmul.f32 0.6931472, %v2622_v51  ;;  %v1726_v26 = vmul.f32 %v1662_v18, %v1662_v18  ;;  %v4988_v56 = vld [vmem:[#allocation6_spill] sm:$0xff]  ;;  %v4989_v4 = vld [vmem:[#allocation87_spill] sm:$0xff]  ;;  %v1349_v51 = vpop.xlane.xlu1 %1348 }
 0x409   :  { %v1852_v33 = vsub.f32 0.0, %v1788_v46  ;;  %2633 = vpow2.f32 %v1589_v49  ;;  %v4627_v6 = vsub.f32 %v1413_v42, %v826_v40  ;;  %v1416_v44 = vsub.f32 %v1340_v45, %v4988_v56 }
 0x40a   :  { %v1583_v22 = vmul.f32 1.442695, %v4615_v34  ;;  %v2624_v62 = vpop.eup %2623  ;;  %v4624_v63 = vsub.f32 %v1412_v50, %v824_v41  ;;  %v1790_v35 = vmul.f32 %v1726_v26, %v4592_v17 }
 0x40b   :  { %v2220_v57 = vsel %vm2130_vm10, %v1852_v33, 0.0  ;;  %v1661_v59 = vsub.f32 1.0, %v2624_v62  ;;  %v2626_v14 = vpop.eup %2625  ;;  %v1595_v24 = vmul.f32 1.442695, %v4627_v6  ;;  %v4991_v62 = vld [vmem:[#allocation86_spill] sm:$0xff] }
 0x40c   :  { %v2221_v1 = vadd.f32 %v2220_v57, %v2219_v12  ;;  %2635 = vpow2.f32 %v1583_v22  ;;  %v2628_v10 = vpop.eup %2627  ;;  %v822_v37 = vmul.f32 0.6931472, %v2626_v14  ;;  %v1593_v60 = vmul.f32 1.442695, %v4624_v63  ;;  %v4993_v57 = vld [vmem:[#allocation9_spill] sm:$0xff] }
 0x40d   :  { %v1337_v20 = vpop.xlane.xlu2 %1336  ;;  %v1319_v61 = vpop.xlane.xlu0 %1318  ;;  %v1725_v29 = vmul.f32 %v1661_v59, %v1661_v59  ;;  %2637 = vlog2.f32 %v4984_v0  ;;  %v1664_v55 = vsub.f32 1.0, %v2628_v10  ;;  %v1854_v54 = vsub.f32 0.0, %v1790_v35 }
 0x40e   :  { %v1409_v5 = vsub.f32 %v1319_v61, %v4983_v9  ;;  %v2630_v7 = vpop.eup %2629  ;;  %v1415_v16 = vsub.f32 %v1337_v20, %v4985_v58  ;;  %2639 = vlog2.f32 %v4986_v36  ;;  %v1419_v59 = vsub.f32 %v1349_v51, %v4993_v57 }
 0x40f   :  { %v1789_v11 = vmul.f32 %v1725_v29, %v1469_v52  ;;  %v2632_v53 = vpop.eup %2631  ;;  %2641 = vlog2.f32 %v4987_v23  ;;  %v830_v52 = vmul.f32 0.6931472, %v2630_v7  ;;  %v1728_v25 = vmul.f32 %v1664_v55, %v1664_v55 }
 0x410   :  { %v4630_v31 = vsub.f32 %v1409_v5, %v818_v47  ;;  %v2634_v3 = vpop.eup %2633  ;;  %v832_v17 = vmul.f32 0.6931472, %v2632_v53  ;;  %2643 = vlog2.f32 %v4989_v4  ;;  %v4994_v47 = vld [vmem:[#allocation79_spill] sm:$0xff] }
 0x411   :  { %v1853_v2 = vsub.f32 0.0, %v1789_v11  ;;  %v4642_v27 = vsub.f32 %v1415_v16, %v830_v52  ;;  %v1666_v30 = vsub.f32 1.0, %v2634_v3  ;;  %v1792_v14 = vmul.f32 %v1728_v25, %v4601_v21 }
 0x412   :  { %v1587_v43 = vmul.f32 1.442695, %v4630_v31  ;;  %v2636_v13 = vpop.eup %2635  ;;  %v4645_v15 = vsub.f32 %v1416_v44, %v832_v17 }
 0x413   :  { %v2222_v38 = vsel %vm2130_vm10, %v1853_v2, 0.0  ;;  %v1663_v32 = vsub.f32 1.0, %v2636_v13  ;;  %v2638_v49 = vpop.eup %2637  ;;  %v1599_v40 = vmul.f32 1.442695, %v4642_v27  ;;  %v1730_v20 = vmul.f32 %v1666_v30, %v1666_v30  ;;  %v4995_v13 = vld [vmem:[#allocation8_spill] sm:$0xff] }
 0x414   :  { %2645 = vpow2.f32 %v1587_v43  ;;  %v2223_v50 = vadd.f32 %v2222_v38, %v2221_v1  ;;  %v2640_v22 = vpop.eup %2639  ;;  %v836_v45 = vmul.f32 0.6931472, %v2638_v49  ;;  %v2224_v1 = vsel %vm2130_vm10, %v1854_v54, 0.0  ;;  %v4997_v54 = vld [vmem:[#allocation82_spill] sm:$0xff] }
 0x415   :  { %v1346_v28 = vpop.xlane.xlu2 %1345  ;;  %v1325_v46 = vpop.xlane.xlu0 %1324  ;;  %2647 = vpow2.f32 %v1593_v60  ;;  %v1727_v18 = vmul.f32 %v1663_v32, %v1663_v32  ;;  %v838_v29 = vmul.f32 0.6931472, %v2640_v22  ;;  %v1601_v9 = vmul.f32 1.442695, %v4645_v15 }
 0x416   :  { %v1411_v33 = vsub.f32 %v1325_v46, %v4990_v8  ;;  %2649 = vpow2.f32 %v1595_v24  ;;  %v1418_v42 = vsub.f32 %v1346_v28, %v4992_v19  ;;  %v2642_v41 = vpop.eup %2641  ;;  %v2225_v5 = vadd.f32 %v2224_v1, %v2223_v50  ;;  %v1358_v43 = vpop.xlane.xlu1 %1357  ;;  %v4996_v24 = vld [vmem:[#allocation13_spill] sm:$0xff]  ;;  %v4998_v28 = vld [vmem:[#allocation19_spill] sm:$0xff] }
 0x417   :  { %2651 = vlog2.f32 %v4991_v62  ;;  %v1791_v48 = vmul.f32 %v1727_v18, %v4615_v34  ;;  %v2644_v26 = vpop.eup %2643  ;;  %v828_v0 = vmul.f32 0.6931472, %v2642_v41  ;;  %v4662_v35 = vsub.f32 %v1419_v59, %v838_v29  ;;  %v4999_v1 = vld [vmem:[#allocation11_spill] sm:$0xff] }
 0x418   :  { %v4650_v12 = vsub.f32 %v1411_v33, %v822_v37  ;;  %2653 = vlog2.f32 %v4994_v47  ;;  %v4660_v53 = vsub.f32 %v1418_v42, %v836_v45  ;;  %v1856_v55 = vsub.f32 0.0, %v1792_v14 }
 0x419   :  { %v1855_v61 = vsub.f32 0.0, %v1791_v48  ;;  %2655 = vpow2.f32 %v1599_v40  ;;  %v1794_v2 = vmul.f32 %v1730_v20, %v4610_v39  ;;  %v1607_v25 = vmul.f32 1.442695, %v4662_v35 }
 0x41a   :  { %v1591_v10 = vmul.f32 1.442695, %v4650_v12  ;;  %v2646_v34 = vpop.eup %2645  ;;  %v1605_v4 = vmul.f32 1.442695, %v4660_v53  ;;  %v1422_v46 = vsub.f32 %v1358_v43, %v4998_v28  ;;  %v2228_v49 = vsel %vm2130_vm10, %v1856_v55, 0.0 }
 0x41b   :  { %v2648_v7 = vpop.eup %2647  ;;  %v2226_v21 = vsel %vm2130_vm10, %v1855_v61, 0.0  ;;  %v1665_v11 = vsub.f32 1.0, %v2646_v34  ;;  %v1858_v51 = vsub.f32 0.0, %v1794_v2 }
 0x41c   :  { %v2650_v37 = vpop.eup %2649  ;;  %v2227_v58 = vadd.f32 %v2226_v21, %v2225_v5  ;;  %2657 = vpow2.f32 %v1591_v10  ;;  %v1668_v52 = vsub.f32 1.0, %v2648_v7 }
 0x41d   :  { %v1355_v16 = vpop.xlane.xlu2 %1354  ;;  %v1334_v3 = vpop.xlane.xlu0 %1333  ;;  %v1729_v60 = vmul.f32 %v1665_v11, %v1665_v11  ;;  %2659 = vpow2.f32 %v1601_v9  ;;  %v1669_v44 = vsub.f32 1.0, %v2650_v37  ;;  %v2232_v40 = vsel %vm2130_vm10, %v1858_v51, 0.0 }
 0x41e   :  { %v2652_v36 = vpop.eup %2651  ;;  %v1414_v23 = vsub.f32 %v1334_v3, %v4995_v13  ;;  %v1421_v56 = vsub.f32 %v1355_v16, %v4996_v24  ;;  %2661 = vlog2.f32 %v4997_v54  ;;  %v1732_v33 = vmul.f32 %v1668_v52, %v1668_v52 }
 0x41f   :  { %v1793_v17 = vmul.f32 %v1729_v60, %v4630_v31  ;;  %v2654_v32 = vpop.eup %2653  ;;  %v842_v39 = vmul.f32 0.6931472, %v2652_v36  ;;  %v844_v31 = vmul.f32 0.6931472, %v2644_v26  ;;  %v2229_v50 = vadd.f32 %v2228_v49, %v2227_v58 }
 0x420   :  { %v4669_v38 = vsub.f32 %v1414_v23, %v828_v0  ;;  %v2656_v8 = vpop.eup %2655  ;;  %v834_v48 = vmul.f32 0.6931472, %v2654_v32  ;;  %v1733_v19 = vmul.f32 %v1669_v44, %v1669_v44  ;;  %2663 = vpow2.f32 %v1605_v4 }
 0x421   :  { %v1857_v30 = vsub.f32 0.0, %v1793_v17  ;;  %v4676_v22 = vsub.f32 %v1421_v56, %v842_v39  ;;  %v4679_v57 = vsub.f32 %v1422_v46, %v844_v31  ;;  %v1671_v26 = vsub.f32 1.0, %v2656_v8  ;;  %v5000_v56 = vld [vmem:[#allocation16_spill] sm:$0xff] }
 0x422   :  { %v1597_v18 = vmul.f32 1.442695, %v4669_v38  ;;  %v2658_v62 = vpop.eup %2657  ;;  %v1796_v10 = vmul.f32 %v1732_v33, %v4624_v63  ;;  %v1797_v7 = vmul.f32 %v1733_v19, %v4627_v6 }
 0x423   :  { %v2230_v42 = vsel %vm2130_vm10, %v1857_v30, 0.0  ;;  %v2660_v41 = vpop.eup %2659  ;;  %v1667_v59 = vsub.f32 1.0, %v2658_v62  ;;  %v1611_v29 = vmul.f32 1.442695, %v4676_v22  ;;  %v1613_v0 = vmul.f32 1.442695, %v4679_v57 }
 0x424   :  { %v2231_v45 = vadd.f32 %v2230_v42, %v2229_v50  ;;  %2665 = vpow2.f32 %v1597_v18  ;;  %v2662_v61 = vpop.eup %2661  ;;  %v1672_v9 = vsub.f32 1.0, %v2660_v41  ;;  %v1735_v37 = vmul.f32 %v1671_v26, %v1671_v26 }
 0x425   :  { %v1343_v14 = vpop.xlane.xlu0 %1342  ;;  %2667 = vpow2.f32 %v1607_v25  ;;  %v1731_v47 = vmul.f32 %v1667_v59, %v1667_v59  ;;  %v1860_v16 = vsub.f32 0.0, %v1796_v10  ;;  %v840_v36 = vmul.f32 0.6931472, %v2662_v61 }
 0x426   :  { %v1417_v20 = vsub.f32 %v1343_v14, %v4999_v1  ;;  %v2233_v34 = vadd.f32 %v2232_v40, %v2231_v45  ;;  %v2664_v11 = vpop.eup %2663  ;;  %2669 = vpow2.f32 %v1611_v29  ;;  %v1736_v2 = vmul.f32 %v1672_v9, %v1672_v9 }
 0x427   :  { %v1795_v21 = vmul.f32 %v1731_v47, %v4650_v12  ;;  %v1861_v43 = vsub.f32 0.0, %v1797_v7  ;;  %v1674_v13 = vsub.f32 1.0, %v2664_v11  ;;  %v1799_v12 = vmul.f32 %v1735_v37, %v4642_v27 }
 0x428   :  { %v1481_v5 = vsub.f32 %v1417_v20, %v834_v48  ;;  %v2236_v4 = vsel %vm2130_vm10, %v1860_v16, 0.0  ;;  %v1800_v32 = vmul.f32 %v1736_v2, %v4645_v15 }
 0x429   :  { %v1859_v3 = vsub.f32 0.0, %v1795_v21  ;;  %v2238_v46 = vsel %vm2130_vm10, %v1861_v43, 0.0  ;;  %v1738_v49 = vmul.f32 %v1674_v13, %v1674_v13  ;;  %v1863_v30 = vsub.f32 0.0, %v1799_v12 }
 0x42a   :  { %v1603_v55 = vmul.f32 1.442695, %v1481_v5  ;;  %v2666_v58 = vpop.eup %2665  ;;  %v1864_v62 = vsub.f32 0.0, %v1800_v32 }
 0x42b   :  { %v2668_v63 = vpop.eup %2667  ;;  %v1670_v60 = vsub.f32 1.0, %v2666_v58  ;;  %v2234_v6 = vsel %vm2130_vm10, %v1859_v3, 0.0  ;;  %v1802_v15 = vmul.f32 %v1738_v49, %v4660_v53  ;;  %v2242_v41 = vsel %vm2130_vm10, %v1863_v30, 0.0 }
 0x42c   :  { %2671 = vpow2.f32 %v1603_v55  ;;  %v2235_v52 = vadd.f32 %v2234_v6, %v2233_v34  ;;  %v1675_v17 = vsub.f32 1.0, %v2668_v63  ;;  %v2670_v28 = vpop.eup %2669  ;;  %v2244_v26 = vsel %vm2130_vm10, %v1864_v62, 0.0 }
 0x42d   :  { %2673 = vpow2.f32 %v1613_v0  ;;  %v1352_v23 = vpop.xlane.xlu0 %1351  ;;  %v1734_v24 = vmul.f32 %v1670_v60, %v1670_v60  ;;  %v1866_v1 = vsub.f32 0.0, %v1802_v15 }
 0x42e   :  { %v1420_v44 = vsub.f32 %v1352_v23, %v5000_v56  ;;  %v2237_v54 = vadd.f32 %v2236_v4, %v2235_v52  ;;  %v1739_v33 = vmul.f32 %v1675_v17, %v1675_v17 }
 0x42f   :  { %v1798_v39 = vmul.f32 %v1734_v24, %v4669_v38  ;;  %v1677_v38 = vsub.f32 1.0, %v2670_v28  ;;  %v2248_v0 = vsel %vm2130_vm10, %v1866_v1, 0.0 }
 0x430   :  { %v1484_v25 = vsub.f32 %v1420_v44, %v840_v36  ;;  %v2239_v27 = vadd.f32 %v2238_v46, %v2237_v54  ;;  %v1803_v45 = vmul.f32 %v1739_v33, %v4662_v35 }
 0x431   :  { %v1862_v18 = vsub.f32 0.0, %v1798_v39  ;;  %v1741_v20 = vmul.f32 %v1677_v38, %v1677_v38 }
 0x432   :  { %v2672_v51 = vpop.eup %2671  ;;  %v1609_v8 = vmul.f32 1.442695, %v1484_v25  ;;  %v1867_v47 = vsub.f32 0.0, %v1803_v45 }
 0x433   :  { %v2674_v31 = vpop.eup %2673  ;;  %v1673_v50 = vsub.f32 1.0, %v2672_v51  ;;  %v2240_v48 = vsel %vm2130_vm10, %v1862_v18, 0.0  ;;  %v1805_v35 = vmul.f32 %v1741_v20, %v4676_v22 }
 0x434   :  { %2675 = vpow2.f32 %v1609_v8  ;;  %v2241_v19 = vadd.f32 %v2240_v48, %v2239_v27  ;;  %v1678_v59 = vsub.f32 1.0, %v2674_v31 }
 0x435   :  { %v1737_v42 = vmul.f32 %v1673_v50, %v1673_v50  ;;  %v1869_v16 = vsub.f32 0.0, %v1805_v35 }
 0x436   :  { %v2243_v14 = vadd.f32 %v2242_v41, %v2241_v19  ;;  %v1742_v29 = vmul.f32 %v1678_v59, %v1678_v59 }
 0x437   :  { %v1801_v40 = vmul.f32 %v1737_v42, %v1481_v5  ;;  %v2250_v5 = vsel %vm2130_vm10, %v1867_v47, 0.0  ;;  %v2254_v60 = vsel %vm2130_vm10, %v1869_v16, 0.0 }
 0x438   :  { %v2245_v61 = vadd.f32 %v2244_v26, %v2243_v14  ;;  %v1806_v37 = vmul.f32 %v1742_v29, %v4679_v57 }
 0x439   :  { %v1865_v10 = vsub.f32 0.0, %v1801_v40 }
 0x43a   :  { %v2676_v34 = vpop.eup %2675  ;;  %v1870_v63 = vsub.f32 0.0, %v1806_v37 }
 0x43b   :  { %v2246_v53 = vsel %vm2130_vm10, %v1865_v10, 0.0  ;;  %v1676_v9 = vsub.f32 1.0, %v2676_v34 }
 0x43c   :  { %v2247_v7 = vadd.f32 %v2246_v53, %v2245_v61  ;;  %v2256_v13 = vsel %vm2130_vm10, %v1870_v63, 0.0 }
 0x43d   :  { %v1740_v21 = vmul.f32 %v1676_v9, %v1676_v9 }
 0x43e   :  { %v2249_v11 = vadd.f32 %v2248_v0, %v2247_v7 }
 0x43f   :  { %v1804_v55 = vmul.f32 %v1740_v21, %v1484_v25 }
 0x440   :  { %v2251_v58 = vadd.f32 %v2250_v5, %v2249_v11 }
 0x441   :  { %v1868_v3 = vsub.f32 0.0, %v1804_v55 }
 0x443   :  { %v2252_v36 = vsel %vm2130_vm10, %v1868_v3, 0.0 }
 0x444   :  { %v2253_v2 = vadd.f32 %v2252_v36, %v2251_v58 }
 0x446   :  { %v2255_v43 = vadd.f32 %v2254_v60, %v2253_v2 }
 0x448   :  { %v2257_v22 = vadd.f32 %v2256_v13, %v2255_v43 }
 0x44a   :  { %2258 = vadd.xlane.f32.xlu0 %v2257_v22 }
 0x4bd   :  { %v2259_v6 = vpop.xlane.xlu0 %2258 }
 0x4be   :  { %v2260_v23 = vrot.slane %v2259_v6, 4 }
 0x4c0   :  { %v2261_v12 = vadd.f32 %v2260_v23, %v2259_v6 }
 0x4c2   :  { %v2262_v52 = vrot.slane %v2261_v12, 2 }
 0x4c4   :  { %v2263_v57 = vadd.f32 %v2262_v52, %v2261_v12 }
 0x4c6   :  { %v2264_v24 = vrot.slane %v2263_v57, 1 }
 0x4c8   :  { %v2265_v56 = vadd.f32 %v2264_v24, %v2263_v57 }
 0x4ca   :  { %2286 = vpush %v2265_v56 }
 0x4fb   :  { %s2287_s3 = spop %2286 }
 0x4fc   :  { %v2267_v44 = vstv %s2287_s3 }
 0x4fd   :  { %2269 = vst.msk [vmem:[#allocation2] sm:$0x1] %vm2268_vm0, %v2267_v44 }
 0x4fe   :  { %2280 = dma.vmem_to_hbm [thread:$0]  %s2276_s30, 16, %s2278_s28, [#allocation3]  }
 0x4ff   :  { %2765 = dma.done.wait [#allocation3], 16  }
 0x500   :  { %2766 = vsyncadd [#allocation3], 4294967280 }
 0x501   :  { %2285 = vsyncpa [#allocation3], 1 }

</bundles_post_ra>
